<compile_context>
chip_gen: v6e
topology: v6e:2x2x1
jax: 0.10.0
libtpu: 0.0.40
codegen_flags: <defaults>
</compile_context>

<pallas_src>
import functools
import math

import jax
import jax.numpy as jnp
from jax import lax
from jax.experimental import pallas as pl
from jax.experimental.pallas import tpu as pltpu

_NEG = -1e9  # single clamped additive "minus infinity" for masked keys


# ----------------------------------------------------------------------------
# Fused whole-decoder kernel
# ----------------------------------------------------------------------------

def _layer_norm(x, g, b, eps=1e-5):
    mu = jnp.mean(x, axis=-1, keepdims=True)
    var = jnp.mean(jnp.square(x - mu), axis=-1, keepdims=True)
    return (x - mu) * lax.rsqrt(var + eps) * g + b


def _decoder_kernel(nhead, has_norm,
                    # inputs
                    tgt_ref, qpos_ref, memk_ref, memv_ref, goalk_ref, goalv_ref,
                    qbias_ref, membias_ref, goalbias_ref,
                    attn_w_ref, ffn_w1_ref, ffn_b1_ref, ffn_w2_ref,
                    vec_ref, fnorm_ref,
                    # outputs
                    inter_ref, final_ref,
                    # scratch (persists across grid steps; re-init per batch)
                    cur_ref):
    layer = pl.program_id(1)
    n_layers = pl.num_programs(1)
    D = cur_ref.shape[-1]
    dh = D // nhead
    scale = 1.0 / math.sqrt(dh)

    @pl.when(layer == 0)
    def _():
        cur_ref[...] = tgt_ref[0].astype(jnp.float32)

    cur = cur_ref[...]                              # (Lq, D) f32 running state
    qpos = qpos_ref[0].astype(jnp.float32)
    vec = vec_ref[0]                                # (21, D) f32 packed vectors

    def vrow(i):                                    # (1, D) row of the slab
        return vec[i:i + 1, :]

    def mha(a_idx, q_in, k_in, v_in, bias):
        """One multi-head attention block.

        q_in: (Lq, D); k_in/v_in: (Lk, D); bias: additive (1, Lk) f32 key mask.
        Projections are single wide (D, D) matmuls (lane-dense, full MXU depth);
        only the score / P@V matmuls are per-head.
        """
        base = 4 * a_idx
        wq = attn_w_ref[0, base + 0]                # (D, D) bf16
        wk = attn_w_ref[0, base + 1]
        wv = attn_w_ref[0, base + 2]
        wo = attn_w_ref[0, base + 3]

        q = jnp.dot(q_in.astype(jnp.bfloat16), wq,
                    preferred_element_type=jnp.float32) + vrow(base + 0)
        k = jnp.dot(k_in.astype(jnp.bfloat16), wk,
                    preferred_element_type=jnp.float32) + vrow(base + 1)
        v = jnp.dot(v_in.astype(jnp.bfloat16), wv,
                    preferred_element_type=jnp.float32) + vrow(base + 2)

        heads = []
        for h in range(nhead):
            sl = slice(h * dh, (h + 1) * dh)
            q_h = q[:, sl].astype(jnp.bfloat16)
            k_h = k[:, sl].astype(jnp.bfloat16)
            v_h = v[:, sl].astype(jnp.bfloat16)
            # scores: (Lq, Lk) == q_h @ k_h.T (NT matmul, no explicit transpose)
            s = lax.dot_general(q_h, k_h, (((1,), (1,)), ((), ())),
                                preferred_element_type=jnp.float32)
            s = s * scale + bias
            s = s - jnp.max(s, axis=-1, keepdims=True)
            p = jnp.exp(s)
            p = p * pl.reciprocal(jnp.sum(p, axis=-1, keepdims=True), approx=True)
            heads.append(jnp.dot(p.astype(jnp.bfloat16), v_h,
                                 preferred_element_type=jnp.float32))
        o = jnp.concatenate(heads, axis=-1)          # (Lq, D)
        return jnp.dot(o.astype(jnp.bfloat16), wo,
                       preferred_element_type=jnp.float32) + vrow(base + 3)

    # ---- self-attention + residual + LN1 ----------------------------------
    qk = cur + qpos
    cur = _layer_norm(cur + mha(0, qk, qk, cur, qbias_ref[0]),
                      vrow(12), vrow(13))

    # ---- cross-attention over encoder memory + residual + LN2 -------------
    cur = _layer_norm(
        cur + mha(1, cur + qpos, memk_ref[0], memv_ref[0], membias_ref[0]),
        vrow(14), vrow(15))

    # ---- cross-attention over goal tokens + residual + LN3 ----------------
    cur = _layer_norm(
        cur + mha(2, cur + qpos, goalk_ref[0], goalv_ref[0], goalbias_ref[0]),
        vrow(16), vrow(17))

    # ---- FFN (Linear -> ReLU -> Linear) + residual + LN4 ------------------
    h1 = jnp.maximum(
        jnp.dot(cur.astype(jnp.bfloat16), ffn_w1_ref[0],
                preferred_element_type=jnp.float32) + ffn_b1_ref[0], 0.0)
    ff = jnp.dot(h1.astype(jnp.bfloat16), ffn_w2_ref[0],
                 preferred_element_type=jnp.float32) + vrow(20)
    cur = _layer_norm(cur + ff, vrow(18), vrow(19))

    cur_ref[...] = cur

    # ---- write this layer's intermediate; final only at the last layer ----
    is_last = layer == n_layers - 1
    if has_norm:
        @pl.when(is_last)
        def _():
            g = fnorm_ref[0:1, :]
            b = fnorm_ref[1:2, :]
            n1 = _layer_norm(cur, g, b)
            # NOTE: reference applies the final norm TWICE to the last
            # intermediate (output=norm(output); intermediate[-1]=norm(output)).
            inter_ref[0, 0] = _layer_norm(n1, g, b).astype(inter_ref.dtype)
            final_ref[0] = n1.astype(final_ref.dtype)

        @pl.when(layer < n_layers - 1)
        def _():
            inter_ref[0, 0] = cur.astype(inter_ref.dtype)
    else:
        inter_ref[0, 0] = cur.astype(inter_ref.dtype)

        @pl.when(is_last)
        def _():
            final_ref[0] = cur.astype(final_ref.dtype)


# ----------------------------------------------------------------------------
# Wrapper: layout prep (once, host side) + single pallas_call
# ----------------------------------------------------------------------------

def _round_up(x, m):
    return ((x + m - 1) // m) * m


def _batch_spec(tail):           # arrays (B, *tail): vary with batch axis only
    n = len(tail)
    return pl.BlockSpec((1,) + tuple(tail), lambda b, l, n=n: (b,) + (0,) * n)


def _layer_spec(tail):           # arrays (NL, *tail): vary with layer axis only
    n = len(tail)
    return pl.BlockSpec((1,) + tuple(tail), lambda b, l, n=n: (l,) + (0,) * n)


def _const_spec(shape):          # constant across the whole grid
    n = len(shape)
    return pl.BlockSpec(tuple(shape), lambda b, l, n=n: (0,) * n)


def transformer_decoder_forward(packed, nhead, tgt, memory, mask, pos, query_pos,
                                query_mask, goal, goal_mask, goal_pos=None,
                                add_pos=False, detected_objects=None,
                                obj_mask=None, return_intermediate=True):
    # TODO(synk): detected_objects / obj_mask / add_pos branches of the original
    # (unshown) decoder layer are unspecified in the reference; not implemented.
    del add_pos, detected_objects, obj_mask

    Lq, B, D = tgt.shape
    Lmem, Lgoal = memory.shape[0], goal.shape[0]
    NL = packed["attn_w"].shape[0]
    F = packed["ffn_w1"].shape[-1]

    Lq_p = _round_up(Lq, 8)
    Lm_p = _round_up(Lmem, 8)
    Lg_p = _round_up(Lgoal, 8)

    def pad_seq(x, Lp):                      # (L, B, D) -> (Lp, B, D), zero pad
        L = x.shape[0]
        if L == Lp:
            return x
        return jnp.concatenate(
            [x, jnp.zeros((Lp - L,) + x.shape[1:], x.dtype)], axis=0)

    def to_bld(x, Lp):                       # (L, B, D) -> (B, Lp, D)
        return jnp.transpose(pad_seq(x, Lp), (1, 0, 2))

    def maybe_add(x, p):
        return x if p is None else x + p

    def attn_bias(key_mask, Lk, Lk_p):
        """Per-batch additive (B, 1, Lk_p) key-padding bias (broadcast over Lq)."""
        if key_mask is None:
            kb = jnp.zeros((B, Lk), jnp.float32)
        else:
            kb = jnp.where(key_mask, _NEG, 0.0).astype(jnp.float32)
        if Lk_p != Lk:
            kb = jnp.concatenate(
                [kb, jnp.full((B, Lk_p - Lk), _NEG, jnp.float32)], axis=1)
        return kb[:, None, :]

    tgt_b = to_bld(tgt, Lq_p).astype(jnp.float32)
    qpos_b = (to_bld(query_pos, Lq_p).astype(jnp.float32) if query_pos is not None
              else jnp.zeros((B, Lq_p, D), jnp.float32))
    memk_b = to_bld(maybe_add(memory, pos), Lm_p).astype(jnp.bfloat16)
    memv_b = to_bld(memory, Lm_p).astype(jnp.bfloat16)
    goalk_b = to_bld(maybe_add(goal, goal_pos), Lg_p).astype(jnp.bfloat16)
    goalv_b = to_bld(goal, Lg_p).astype(jnp.bfloat16)

    qbias = attn_bias(query_mask, Lq, Lq_p)      # (B, 1, Lq_p)
    membias = attn_bias(mask, Lmem, Lm_p)        # (B, 1, Lm_p)
    goalbias = attn_bias(goal_mask, Lgoal, Lg_p)  # (B, 1, Lg_p)

    has_norm = packed["final_norm"] is not None
    fnorm = (packed["final_norm"] if has_norm
             else jnp.stack([jnp.ones((D,), jnp.float32),
                             jnp.zeros((D,), jnp.float32)]))

    kernel = functools.partial(_decoder_kernel, nhead, has_norm)

    inter, final = pl.pallas_call(
        kernel,
        out_shape=(jax.ShapeDtypeStruct((NL, B, Lq_p, D), tgt.dtype),
                   jax.ShapeDtypeStruct((B, Lq_p, D), tgt.dtype)),
        grid=(B, NL),
        in_specs=[
            _batch_spec((Lq_p, D)),        # tgt (initial state)
            _batch_spec((Lq_p, D)),        # query_pos
            _batch_spec((Lm_p, D)),        # memory + pos (keys), bf16
            _batch_spec((Lm_p, D)),        # memory (values), bf16
            _batch_spec((Lg_p, D)),        # goal + goal_pos (keys), bf16
            _batch_spec((Lg_p, D)),        # goal (values), bf16
            _batch_spec((1, Lq_p)),        # self-attn key bias
            _batch_spec((1, Lm_p)),        # memory-attn key bias
            _batch_spec((1, Lg_p)),        # goal-attn key bias
            _layer_spec((12, D, D)),       # fused attn weights (Wq,Wk,Wv,Wo x3)
            _layer_spec((D, F)),           # FFN w1 (pre-transposed), bf16
            _layer_spec((1, F)),           # FFN b1
            _layer_spec((F, D)),           # FFN w2 (pre-transposed), bf16
            _layer_spec((21, D)),          # packed biases / LN params / FFN b2
            _const_spec((2, D)),           # final norm gamma / beta
        ],
        out_specs=(
            pl.BlockSpec((1, 1, Lq_p, D), lambda b, l: (l, b, 0, 0)),  # inters
            pl.BlockSpec((1, Lq_p, D), lambda b, l: (b, 0, 0)),        # final
        ),
        scratch_shapes=[pltpu.VMEM((Lq_p, D), jnp.float32)],
        compiler_params=pltpu.CompilerParams(
            dimension_semantics=("parallel", "arbitrary"),
            vmem_limit_bytes=64 * 1024 * 1024),
    )(tgt_b, qpos_b, memk_b, memv_b, goalk_b, goalv_b,
      qbias, membias, goalbias,
      packed["attn_w"], packed["ffn_w1"], packed["ffn_b1"], packed["ffn_w2"],
      packed["vec"], fnorm)

    inter = inter[:, :, :Lq, :].transpose(0, 2, 1, 3)   # (NL, Lq, B, D)
    if return_intermediate:
        return inter
    return final[:, :Lq, :].transpose(1, 0, 2)          # (Lq, B, D)


# ----------------------------------------------------------------------------
# Parameter init (PyTorch-layout) + one-time packing (all transposes hoisted)
# ----------------------------------------------------------------------------

def init_mha_params(key, d_model):
    k1, k2 = jax.random.split(key)
    return {
        "in_w": 0.02 * jax.random.normal(k1, (3 * d_model, d_model), jnp.float32),
        "in_b": jnp.zeros((3 * d_model,), jnp.float32),
        "out_w": 0.02 * jax.random.normal(k2, (d_model, d_model), jnp.float32),
        "out_b": jnp.zeros((d_model,), jnp.float32),
    }


def init_ln_params(d_model):
    return {"g": jnp.ones((d_model,), jnp.float32),
            "b": jnp.zeros((d_model,), jnp.float32)}


def init_layer_params(key, d_model, dff):
    ks = jax.random.split(key, 5)
    return {
        "self_attn": init_mha_params(ks[0], d_model),
        "cross_attn": init_mha_params(ks[1], d_model),
        "goal_attn": init_mha_params(ks[2], d_model),
        "linear1_w": 0.02 * jax.random.normal(ks[3], (dff, d_model), jnp.float32),
        "linear1_b": jnp.zeros((dff,), jnp.float32),
        "linear2_w": 0.02 * jax.random.normal(ks[4], (d_model, dff), jnp.float32),
        "linear2_b": jnp.zeros((d_model,), jnp.float32),
        "norm1": init_ln_params(d_model),
        "norm2": init_ln_params(d_model),
        "norm3": init_ln_params(d_model),
        "norm4": init_ln_params(d_model),
    }


def init_decoder_params(key, d_model, dff, num_layers, with_norm=True):
    keys = jax.random.split(key, num_layers)
    return {
        "layers": [init_layer_params(k, d_model, dff) for k in keys],
        "norm": init_ln_params(d_model) if with_norm else None,
    }


def pack_decoder_params(params, nhead, mxu_dtype=jnp.bfloat16):
    """One-time host-side packing: transpose weights for x@W, fuse all heads
    into lane-dense (D, D) matrices, coalesce small vectors into one slab,
    stack per layer, and cast MXU operands to bf16."""
    layers = params["layers"]
    D = layers[0]["norm1"]["g"].shape[0]
    F = layers[0]["linear1_b"].shape[0]
    assert D % nhead == 0

    def pack_layer(p):
        w_rows, v_rows = [], []
        for name in ("self_attn", "cross_attn", "goal_attn"):
            a = p[name]
            for r in range(3):                                   # q, k, v
                w_rows.append(a["in_w"][r * D:(r + 1) * D].T)    # (D, D): x @ W
                v_rows.append(a["in_b"][r * D:(r + 1) * D])
            w_rows.append(a["out_w"].T)                          # (D, D)
            v_rows.append(a["out_b"])
        for i in range(1, 5):                                    # LN1..LN4
            v_rows.append(p["norm%d" % i]["g"])
            v_rows.append(p["norm%d" % i]["b"])
        v_rows.append(p["linear2_b"])                            # row 20
        return dict(attn_w=jnp.stack(w_rows),                    # (12, D, D)
                    vec=jnp.stack(v_rows),                       # (21, D)
                    w1=p["linear1_w"].T,                         # (D, F)
                    b1=p["linear1_b"].reshape(1, F),
                    w2=p["linear2_w"].T)                         # (F, D)

    per_layer = [pack_layer(p) for p in layers]

    def stack(k):
        return jnp.stack([lp[k] for lp in per_layer])

    packed = {
        "attn_w": stack("attn_w").astype(mxu_dtype),   # (NL, 12, D, D)
        "vec": stack("vec").astype(jnp.float32),       # (NL, 21, D)
        "ffn_w1": stack("w1").astype(mxu_dtype),       # (NL, D, F)
        "ffn_b1": stack("b1").astype(jnp.float32),     # (NL, 1, F)
        "ffn_w2": stack("w2").astype(mxu_dtype),       # (NL, F, D)
    }
    if params.get("norm") is not None:
        packed["final_norm"] = jnp.stack(
            [params["norm"]["g"], params["norm"]["b"]]).astype(jnp.float32)
    else:
        packed["final_norm"] = None
    return packed


# ----------------------------------------------------------------------------
# Main
# ----------------------------------------------------------------------------

if __name__ == "__main__":
    B = 2            # batch
    Lq = 8           # number of queries (tgt length)
    Lmem = 16        # memory (encoder) length
    Lgoal = 4        # goal token length
    d_model = 32
    nhead = 4
    dff = 64
    num_layers = 2

    root = jax.random.PRNGKey(0)
    kp, kt, km, kpos, kqp, kg, kgp = jax.random.split(root, 7)

    params = init_decoder_params(kp, d_model, dff, num_layers, with_norm=True)
    packed = pack_decoder_params(params, nhead)   # hoisted one-time packing

    tgt = jax.random.normal(kt, (Lq, B, d_model), jnp.float32)
    memory = jax.random.normal(km, (Lmem, B, d_model), jnp.float32)
    pos = jax.random.normal(kpos, (Lmem, B, d_model), jnp.float32)
    query_pos = jax.random.normal(kqp, (Lq, B, d_model), jnp.float32)
    goal = jax.random.normal(kg, (Lgoal, B, d_model), jnp.float32)
    goal_pos = jax.random.normal(kgp, (Lgoal, B, d_model), jnp.float32)

    # key_padding_masks: True == ignore that key position
    mask = jnp.zeros((B, Lmem), bool).at[:, -2:].set(True)
    query_mask = jnp.zeros((B, Lq), bool)
    goal_mask = jnp.zeros((B, Lgoal), bool).at[1, -1].set(True)

    out = transformer_decoder_forward(
        packed, nhead, tgt, memory, mask, pos, query_pos, query_mask,
        goal, goal_mask, goal_pos=goal_pos, add_pos=False,
        detected_objects=None, obj_mask=None, return_intermediate=True,
    )
    out = jax.block_until_ready(out)

    assert out.shape == (num_layers, Lq, B, d_model), out.shape
    assert bool(jnp.all(jnp.isfinite(out)))
    print("KERNEL_OK")
</pallas_src>

<mosaic_0001>
module attributes {stable_mosaic.version = 11 : i64} {
  func.func @_decoder_kernel(%arg0: i32, %arg1: i32, %arg2: memref<1x8x32xf32, #tpu.memory_space<vmem>>, %arg3: memref<1x8x32xf32, #tpu.memory_space<vmem>>, %arg4: memref<1x16x32xbf16, #tpu.memory_space<vmem>>, %arg5: memref<1x16x32xbf16, #tpu.memory_space<vmem>>, %arg6: memref<1x8x32xbf16, #tpu.memory_space<vmem>>, %arg7: memref<1x8x32xbf16, #tpu.memory_space<vmem>>, %arg8: memref<1x1x8xf32, #tpu.memory_space<vmem>>, %arg9: memref<1x1x16xf32, #tpu.memory_space<vmem>>, %arg10: memref<1x1x8xf32, #tpu.memory_space<vmem>>, %arg11: memref<1x12x32x32xbf16, #tpu.memory_space<vmem>>, %arg12: memref<1x32x64xbf16, #tpu.memory_space<vmem>>, %arg13: memref<1x1x64xf32, #tpu.memory_space<vmem>>, %arg14: memref<1x64x32xbf16, #tpu.memory_space<vmem>>, %arg15: memref<1x21x32xf32, #tpu.memory_space<vmem>>, %arg16: memref<2x32xf32, #tpu.memory_space<vmem>>, %arg17: memref<1x1x8x32xf32, #tpu.memory_space<vmem>>, %arg18: memref<1x8x32xf32, #tpu.memory_space<vmem>>, %arg19: memref<8x32xf32, #tpu.memory_space<vmem>>) attributes {dimension_semantics = [#tpu.dimension_semantics<parallel>, #tpu.dimension_semantics<arbitrary>], iteration_bounds = array<i64: 2, 2>, scalar_prefetch = 0 : i64, scratch_operands = 1 : i64, tpu.core_type = #tpu.core_type<tc>, window_params = [{transform_indices = @transform_0, window_bounds = array<i64: 1, 8, 32>}, {transform_indices = @transform_1, window_bounds = array<i64: 1, 8, 32>}, {transform_indices = @transform_2, window_bounds = array<i64: 1, 16, 32>}, {transform_indices = @transform_3, window_bounds = array<i64: 1, 16, 32>}, {transform_indices = @transform_4, window_bounds = array<i64: 1, 8, 32>}, {transform_indices = @transform_5, window_bounds = array<i64: 1, 8, 32>}, {transform_indices = @transform_6, window_bounds = array<i64: 1, 1, 8>}, {transform_indices = @transform_7, window_bounds = array<i64: 1, 1, 16>}, {transform_indices = @transform_8, window_bounds = array<i64: 1, 1, 8>}, {transform_indices = @transform_9, window_bounds = array<i64: 1, 12, 32, 32>}, {transform_indices = @transform_10, window_bounds = array<i64: 1, 32, 64>}, {transform_indices = @transform_11, window_bounds = array<i64: 1, 1, 64>}, {transform_indices = @transform_12, window_bounds = array<i64: 1, 64, 32>}, {transform_indices = @transform_13, window_bounds = array<i64: 1, 21, 32>}, {pipeline_mode = #tpu.pipeline_mode<synchronous>, transform_indices = @transform_14, window_bounds = array<i64: 2, 32>}, {transform_indices = @transform_15, window_bounds = array<i64: 1, 1, 8, 32>}, {transform_indices = @transform_16, window_bounds = array<i64: 1, 8, 32>}]} {
    %c0_i32 = arith.constant 0 : i32
    %0 = arith.cmpi eq, %arg1, %c0_i32 : i32
    %1 = arith.extui %0 : i1 to i32
    %c0_i32_0 = arith.constant 0 : i32
    %2 = arith.cmpi ne, %1, %c0_i32_0 : i32
    scf.if %2 {
      %c0_174 = arith.constant 0 : index
      %c0_175 = arith.constant 0 : index
      %c0_176 = arith.constant 0 : index
      %508 = vector.load %arg2[%c0_174, %c0_175, %c0_176] : memref<1x8x32xf32, #tpu.memory_space<vmem>>, vector<1x8x32xf32>
      %509 = vector.shape_cast %508 : vector<1x8x32xf32> to vector<8x32xf32>
      %c0_177 = arith.constant 0 : index
      %c0_178 = arith.constant 0 : index
      %510 = vector.load %arg19[%c0_177, %c0_178] : memref<8x32xf32, #tpu.memory_space<vmem>>, vector<8x32xf32>
      tpu.vector_store %arg19[%c0_177, %c0_178], %509 {strides = array<i32>} : memref<8x32xf32, #tpu.memory_space<vmem>>, vector<8x32xf32>,
    } else {
    }
    %c0 = arith.constant 0 : index
    %c0_1 = arith.constant 0 : index
    %3 = vector.load %arg19[%c0, %c0_1] : memref<8x32xf32, #tpu.memory_space<vmem>>, vector<8x32xf32>
    %c0_2 = arith.constant 0 : index
    %c0_3 = arith.constant 0 : index
    %c0_4 = arith.constant 0 : index
    %4 = vector.load %arg3[%c0_2, %c0_3, %c0_4] : memref<1x8x32xf32, #tpu.memory_space<vmem>>, vector<1x8x32xf32>
    %5 = vector.shape_cast %4 : vector<1x8x32xf32> to vector<8x32xf32>
    %c0_5 = arith.constant 0 : index
    %c0_6 = arith.constant 0 : index
    %c0_7 = arith.constant 0 : index
    %6 = vector.load %arg15[%c0_5, %c0_6, %c0_7] : memref<1x21x32xf32, #tpu.memory_space<vmem>>, vector<1x21x32xf32>
    %7 = vector.shape_cast %6 : vector<1x21x32xf32> to vector<21x32xf32>
    %8 = arith.addf %3, %5 : vector<8x32xf32>
    %c0_8 = arith.constant 0 : index
    %c0_9 = arith.constant 0 : index
    %c0_10 = arith.constant 0 : index
    %9 = vector.load %arg8[%c0_8, %c0_9, %c0_10] : memref<1x1x8xf32, #tpu.memory_space<vmem>>, vector<1x1x8xf32>
    %10 = vector.shape_cast %9 : vector<1x1x8xf32> to vector<1x8xf32>
    %c0_11 = arith.constant 0 : index
    %c0_12 = arith.constant 0 : index
    %c0_13 = arith.constant 0 : index
    %c0_14 = arith.constant 0 : index
    %11 = vector.load %arg11[%c0_11, %c0_12, %c0_13, %c0_14] : memref<1x12x32x32xbf16, #tpu.memory_space<vmem>>, vector<1x1x32x32xbf16>
    %12 = vector.shape_cast %11 : vector<1x1x32x32xbf16> to vector<32x32xbf16>
    %c0_15 = arith.constant 0 : index
    %c1 = arith.constant 1 : index
    %c0_16 = arith.constant 0 : index
    %c0_17 = arith.constant 0 : index
    %13 = vector.load %arg11[%c0_15, %c1, %c0_16, %c0_17] : memref<1x12x32x32xbf16, #tpu.memory_space<vmem>>, vector<1x1x32x32xbf16>
    %14 = vector.shape_cast %13 : vector<1x1x32x32xbf16> to vector<32x32xbf16>
    %c0_18 = arith.constant 0 : index
    %c2 = arith.constant 2 : index
    %c0_19 = arith.constant 0 : index
    %c0_20 = arith.constant 0 : index
    %15 = vector.load %arg11[%c0_18, %c2, %c0_19, %c0_20] : memref<1x12x32x32xbf16, #tpu.memory_space<vmem>>, vector<1x1x32x32xbf16>
    %16 = vector.shape_cast %15 : vector<1x1x32x32xbf16> to vector<32x32xbf16>
    %c0_21 = arith.constant 0 : index
    %c3 = arith.constant 3 : index
    %c0_22 = arith.constant 0 : index
    %c0_23 = arith.constant 0 : index
    %17 = vector.load %arg11[%c0_21, %c3, %c0_22, %c0_23] : memref<1x12x32x32xbf16, #tpu.memory_space<vmem>>, vector<1x1x32x32xbf16>
    %18 = vector.shape_cast %17 : vector<1x1x32x32xbf16> to vector<32x32xbf16>
    %19 = arith.truncf %8 : vector<8x32xf32> to vector<8x32xbf16>
    %cst = arith.constant dense<0.000000e+00> : vector<8x32xf32>
    %20 = tpu.matmul %19, %12, %cst {dimension_numbers = #tpu.dot_dimension_numbers<[1], [0], [0], [1], [0, 0, 1, 1], [], []>} : vector<8x32xbf16>, vector<32x32xbf16>, vector<8x32xf32> -> vector<8x32xf32>
    %21 = vector.extract_strided_slice %7 {offsets = [0, 0], sizes = [1, 32], strides = [1, 1]} : vector<21x32xf32> to vector<1x32xf32>
    %22 = vector.broadcast %21 : vector<1x32xf32> to vector<8x32xf32>
    %23 = arith.addf %20, %22 : vector<8x32xf32>
    %24 = arith.truncf %8 : vector<8x32xf32> to vector<8x32xbf16>
    %cst_24 = arith.constant dense<0.000000e+00> : vector<8x32xf32>
    %25 = tpu.matmul %24, %14, %cst_24 {dimension_numbers = #tpu.dot_dimension_numbers<[1], [0], [0], [1], [0, 0, 1, 1], [], []>} : vector<8x32xbf16>, vector<32x32xbf16>, vector<8x32xf32> -> vector<8x32xf32>
    %26 = vector.extract_strided_slice %7 {offsets = [1, 0], sizes = [1, 32], strides = [1, 1]} : vector<21x32xf32> to vector<1x32xf32>
    %27 = vector.broadcast %26 : vector<1x32xf32> to vector<8x32xf32>
    %28 = arith.addf %25, %27 : vector<8x32xf32>
    %29 = arith.truncf %3 : vector<8x32xf32> to vector<8x32xbf16>
    %cst_25 = arith.constant dense<0.000000e+00> : vector<8x32xf32>
    %30 = tpu.matmul %29, %16, %cst_25 {dimension_numbers = #tpu.dot_dimension_numbers<[1], [0], [0], [1], [0, 0, 1, 1], [], []>} : vector<8x32xbf16>, vector<32x32xbf16>, vector<8x32xf32> -> vector<8x32xf32>
    %31 = vector.extract_strided_slice %7 {offsets = [2, 0], sizes = [1, 32], strides = [1, 1]} : vector<21x32xf32> to vector<1x32xf32>
    %32 = vector.broadcast %31 : vector<1x32xf32> to vector<8x32xf32>
    %33 = arith.addf %30, %32 : vector<8x32xf32>
    %34 = vector.extract_strided_slice %23 {offsets = [0, 0], sizes = [8, 8], strides = [1, 1]} : vector<8x32xf32> to vector<8x8xf32>
    %35 = arith.truncf %34 : vector<8x8xf32> to vector<8x8xbf16>
    %36 = vector.extract_strided_slice %28 {offsets = [0, 0], sizes = [8, 8], strides = [1, 1]} : vector<8x32xf32> to vector<8x8xf32>
    %37 = arith.truncf %36 : vector<8x8xf32> to vector<8x8xbf16>
    %38 = vector.extract_strided_slice %33 {offsets = [0, 0], sizes = [8, 8], strides = [1, 1]} : vector<8x32xf32> to vector<8x8xf32>
    %39 = arith.truncf %38 : vector<8x8xf32> to vector<8x8xbf16>
    %cst_26 = arith.constant dense<0.000000e+00> : vector<8x8xf32>
    %40 = tpu.matmul %35, %37, %cst_26 {dimension_numbers = #tpu.dot_dimension_numbers<[1], [1], [0], [0], [0, 0, 1, 0], [], []>} : vector<8x8xbf16>, vector<8x8xbf16>, vector<8x8xf32> -> vector<8x8xf32>
    %cst_27 = arith.constant 0.353553385 : f32
    %41 = vector.broadcast %cst_27 : f32 to vector<8x8xf32>
    %42 = arith.mulf %40, %41 : vector<8x8xf32>
    %43 = vector.broadcast %10 : vector<1x8xf32> to vector<8x8xf32>
    %44 = arith.addf %42, %43 : vector<8x8xf32>
    %cst_28 = arith.constant dense<0xFF800000> : vector<8xf32>
    %45 = vector.multi_reduction <maximumf>, %44, %cst_28 [1] : vector<8x8xf32> to vector<8xf32>
    %46 = vector.shape_cast %45 : vector<8xf32> to vector<8x1xf32>
    %47 = vector.broadcast %46 : vector<8x1xf32> to vector<8x8xf32>
    %48 = arith.subf %44, %47 : vector<8x8xf32>
    %49 = math.exp %48 : vector<8x8xf32>
    %cst_29 = arith.constant dense<0.000000e+00> : vector<8xf32>
    %50 = vector.multi_reduction <add>, %49, %cst_29 [1] : vector<8x8xf32> to vector<8xf32>
    %51 = vector.shape_cast %50 : vector<8xf32> to vector<8x1xf32>
    %52 = tpu.reciprocal %51 {approx = true} : vector<8x1xf32> -> vector<8x1xf32>
    %53 = vector.broadcast %52 : vector<8x1xf32> to vector<8x8xf32>
    %54 = arith.mulf %49, %53 : vector<8x8xf32>
    %55 = arith.truncf %54 : vector<8x8xf32> to vector<8x8xbf16>
    %cst_30 = arith.constant dense<0.000000e+00> : vector<8x8xf32>
    %56 = tpu.matmul %55, %39, %cst_30 {dimension_numbers = #tpu.dot_dimension_numbers<[1], [0], [0], [1], [0, 0, 1, 1], [], []>} : vector<8x8xbf16>, vector<8x8xbf16>, vector<8x8xf32> -> vector<8x8xf32>
    %57 = vector.extract_strided_slice %23 {offsets = [0, 8], sizes = [8, 8], strides = [1, 1]} : vector<8x32xf32> to vector<8x8xf32>
    %58 = arith.truncf %57 : vector<8x8xf32> to vector<8x8xbf16>
    %59 = vector.extract_strided_slice %28 {offsets = [0, 8], sizes = [8, 8], strides = [1, 1]} : vector<8x32xf32> to vector<8x8xf32>
    %60 = arith.truncf %59 : vector<8x8xf32> to vector<8x8xbf16>
    %61 = vector.extract_strided_slice %33 {offsets = [0, 8], sizes = [8, 8], strides = [1, 1]} : vector<8x32xf32> to vector<8x8xf32>
    %62 = arith.truncf %61 : vector<8x8xf32> to vector<8x8xbf16>
    %cst_31 = arith.constant dense<0.000000e+00> : vector<8x8xf32>
    %63 = tpu.matmul %58, %60, %cst_31 {dimension_numbers = #tpu.dot_dimension_numbers<[1], [1], [0], [0], [0, 0, 1, 0], [], []>} : vector<8x8xbf16>, vector<8x8xbf16>, vector<8x8xf32> -> vector<8x8xf32>
    %cst_32 = arith.constant 0.353553385 : f32
    %64 = vector.broadcast %cst_32 : f32 to vector<8x8xf32>
    %65 = arith.mulf %63, %64 : vector<8x8xf32>
    %66 = vector.broadcast %10 : vector<1x8xf32> to vector<8x8xf32>
    %67 = arith.addf %65, %66 : vector<8x8xf32>
    %cst_33 = arith.constant dense<0xFF800000> : vector<8xf32>
    %68 = vector.multi_reduction <maximumf>, %67, %cst_33 [1] : vector<8x8xf32> to vector<8xf32>
    %69 = vector.shape_cast %68 : vector<8xf32> to vector<8x1xf32>
    %70 = vector.broadcast %69 : vector<8x1xf32> to vector<8x8xf32>
    %71 = arith.subf %67, %70 : vector<8x8xf32>
    %72 = math.exp %71 : vector<8x8xf32>
    %cst_34 = arith.constant dense<0.000000e+00> : vector<8xf32>
    %73 = vector.multi_reduction <add>, %72, %cst_34 [1] : vector<8x8xf32> to vector<8xf32>
    %74 = vector.shape_cast %73 : vector<8xf32> to vector<8x1xf32>
    %75 = tpu.reciprocal %74 {approx = true} : vector<8x1xf32> -> vector<8x1xf32>
    %76 = vector.broadcast %75 : vector<8x1xf32> to vector<8x8xf32>
    %77 = arith.mulf %72, %76 : vector<8x8xf32>
    %78 = arith.truncf %77 : vector<8x8xf32> to vector<8x8xbf16>
    %cst_35 = arith.constant dense<0.000000e+00> : vector<8x8xf32>
    %79 = tpu.matmul %78, %62, %cst_35 {dimension_numbers = #tpu.dot_dimension_numbers<[1], [0], [0], [1], [0, 0, 1, 1], [], []>} : vector<8x8xbf16>, vector<8x8xbf16>, vector<8x8xf32> -> vector<8x8xf32>
    %80 = vector.extract_strided_slice %23 {offsets = [0, 16], sizes = [8, 8], strides = [1, 1]} : vector<8x32xf32> to vector<8x8xf32>
    %81 = arith.truncf %80 : vector<8x8xf32> to vector<8x8xbf16>
    %82 = vector.extract_strided_slice %28 {offsets = [0, 16], sizes = [8, 8], strides = [1, 1]} : vector<8x32xf32> to vector<8x8xf32>
    %83 = arith.truncf %82 : vector<8x8xf32> to vector<8x8xbf16>
    %84 = vector.extract_strided_slice %33 {offsets = [0, 16], sizes = [8, 8], strides = [1, 1]} : vector<8x32xf32> to vector<8x8xf32>
    %85 = arith.truncf %84 : vector<8x8xf32> to vector<8x8xbf16>
    %cst_36 = arith.constant dense<0.000000e+00> : vector<8x8xf32>
    %86 = tpu.matmul %81, %83, %cst_36 {dimension_numbers = #tpu.dot_dimension_numbers<[1], [1], [0], [0], [0, 0, 1, 0], [], []>} : vector<8x8xbf16>, vector<8x8xbf16>, vector<8x8xf32> -> vector<8x8xf32>
    %cst_37 = arith.constant 0.353553385 : f32
    %87 = vector.broadcast %cst_37 : f32 to vector<8x8xf32>
    %88 = arith.mulf %86, %87 : vector<8x8xf32>
    %89 = vector.broadcast %10 : vector<1x8xf32> to vector<8x8xf32>
    %90 = arith.addf %88, %89 : vector<8x8xf32>
    %cst_38 = arith.constant dense<0xFF800000> : vector<8xf32>
    %91 = vector.multi_reduction <maximumf>, %90, %cst_38 [1] : vector<8x8xf32> to vector<8xf32>
    %92 = vector.shape_cast %91 : vector<8xf32> to vector<8x1xf32>
    %93 = vector.broadcast %92 : vector<8x1xf32> to vector<8x8xf32>
    %94 = arith.subf %90, %93 : vector<8x8xf32>
    %95 = math.exp %94 : vector<8x8xf32>
    %cst_39 = arith.constant dense<0.000000e+00> : vector<8xf32>
    %96 = vector.multi_reduction <add>, %95, %cst_39 [1] : vector<8x8xf32> to vector<8xf32>
    %97 = vector.shape_cast %96 : vector<8xf32> to vector<8x1xf32>
    %98 = tpu.reciprocal %97 {approx = true} : vector<8x1xf32> -> vector<8x1xf32>
    %99 = vector.broadcast %98 : vector<8x1xf32> to vector<8x8xf32>
    %100 = arith.mulf %95, %99 : vector<8x8xf32>
    %101 = arith.truncf %100 : vector<8x8xf32> to vector<8x8xbf16>
    %cst_40 = arith.constant dense<0.000000e+00> : vector<8x8xf32>
    %102 = tpu.matmul %101, %85, %cst_40 {dimension_numbers = #tpu.dot_dimension_numbers<[1], [0], [0], [1], [0, 0, 1, 1], [], []>} : vector<8x8xbf16>, vector<8x8xbf16>, vector<8x8xf32> -> vector<8x8xf32>
    %103 = vector.extract_strided_slice %23 {offsets = [0, 24], sizes = [8, 8], strides = [1, 1]} : vector<8x32xf32> to vector<8x8xf32>
    %104 = arith.truncf %103 : vector<8x8xf32> to vector<8x8xbf16>
    %105 = vector.extract_strided_slice %28 {offsets = [0, 24], sizes = [8, 8], strides = [1, 1]} : vector<8x32xf32> to vector<8x8xf32>
    %106 = arith.truncf %105 : vector<8x8xf32> to vector<8x8xbf16>
    %107 = vector.extract_strided_slice %33 {offsets = [0, 24], sizes = [8, 8], strides = [1, 1]} : vector<8x32xf32> to vector<8x8xf32>
    %108 = arith.truncf %107 : vector<8x8xf32> to vector<8x8xbf16>
    %cst_41 = arith.constant dense<0.000000e+00> : vector<8x8xf32>
    %109 = tpu.matmul %104, %106, %cst_41 {dimension_numbers = #tpu.dot_dimension_numbers<[1], [1], [0], [0], [0, 0, 1, 0], [], []>} : vector<8x8xbf16>, vector<8x8xbf16>, vector<8x8xf32> -> vector<8x8xf32>
    %cst_42 = arith.constant 0.353553385 : f32
    %110 = vector.broadcast %cst_42 : f32 to vector<8x8xf32>
    %111 = arith.mulf %109, %110 : vector<8x8xf32>
    %112 = vector.broadcast %10 : vector<1x8xf32> to vector<8x8xf32>
    %113 = arith.addf %111, %112 : vector<8x8xf32>
    %cst_43 = arith.constant dense<0xFF800000> : vector<8xf32>
    %114 = vector.multi_reduction <maximumf>, %113, %cst_43 [1] : vector<8x8xf32> to vector<8xf32>
    %115 = vector.shape_cast %114 : vector<8xf32> to vector<8x1xf32>
    %116 = vector.broadcast %115 : vector<8x1xf32> to vector<8x8xf32>
    %117 = arith.subf %113, %116 : vector<8x8xf32>
    %118 = math.exp %117 : vector<8x8xf32>
    %cst_44 = arith.constant dense<0.000000e+00> : vector<8xf32>
    %119 = vector.multi_reduction <add>, %118, %cst_44 [1] : vector<8x8xf32> to vector<8xf32>
    %120 = vector.shape_cast %119 : vector<8xf32> to vector<8x1xf32>
    %121 = tpu.reciprocal %120 {approx = true} : vector<8x1xf32> -> vector<8x1xf32>
    %122 = vector.broadcast %121 : vector<8x1xf32> to vector<8x8xf32>
    %123 = arith.mulf %118, %122 : vector<8x8xf32>
    %124 = arith.truncf %123 : vector<8x8xf32> to vector<8x8xbf16>
    %cst_45 = arith.constant dense<0.000000e+00> : vector<8x8xf32>
    %125 = tpu.matmul %124, %108, %cst_45 {dimension_numbers = #tpu.dot_dimension_numbers<[1], [0], [0], [1], [0, 0, 1, 1], [], []>} : vector<8x8xbf16>, vector<8x8xbf16>, vector<8x8xf32> -> vector<8x8xf32>
    %126 = tpu.concatenate %56, %79, %102, %125 in 1 : vector<8x8xf32>, vector<8x8xf32>, vector<8x8xf32>, vector<8x8xf32> -> vector<8x32xf32>
    %127 = arith.truncf %126 : vector<8x32xf32> to vector<8x32xbf16>
    %cst_46 = arith.constant dense<0.000000e+00> : vector<8x32xf32>
    %128 = tpu.matmul %127, %18, %cst_46 {dimension_numbers = #tpu.dot_dimension_numbers<[1], [0], [0], [1], [0, 0, 1, 1], [], []>} : vector<8x32xbf16>, vector<32x32xbf16>, vector<8x32xf32> -> vector<8x32xf32>
    %129 = vector.extract_strided_slice %7 {offsets = [3, 0], sizes = [1, 32], strides = [1, 1]} : vector<21x32xf32> to vector<1x32xf32>
    %130 = vector.broadcast %129 : vector<1x32xf32> to vector<8x32xf32>
    %131 = arith.addf %128, %130 : vector<8x32xf32>
    %132 = arith.addf %3, %131 : vector<8x32xf32>
    %133 = vector.extract_strided_slice %7 {offsets = [12, 0], sizes = [1, 32], strides = [1, 1]} : vector<21x32xf32> to vector<1x32xf32>
    %134 = vector.extract_strided_slice %7 {offsets = [13, 0], sizes = [1, 32], strides = [1, 1]} : vector<21x32xf32> to vector<1x32xf32>
    %cst_47 = arith.constant dense<0.000000e+00> : vector<8xf32>
    %135 = vector.multi_reduction <add>, %132, %cst_47 [1] : vector<8x32xf32> to vector<8xf32>
    %136 = vector.shape_cast %135 : vector<8xf32> to vector<8x1xf32>
    %cst_48 = arith.constant 3.200000e+01 : f32
    %137 = vector.broadcast %cst_48 : f32 to vector<8x1xf32>
    %138 = arith.divf %136, %137 : vector<8x1xf32>
    %139 = vector.broadcast %138 : vector<8x1xf32> to vector<8x32xf32>
    %140 = arith.subf %132, %139 : vector<8x32xf32>
    %141 = arith.mulf %140, %140 : vector<8x32xf32>
    %cst_49 = arith.constant dense<0.000000e+00> : vector<8xf32>
    %142 = vector.multi_reduction <add>, %141, %cst_49 [1] : vector<8x32xf32> to vector<8xf32>
    %143 = vector.shape_cast %142 : vector<8xf32> to vector<8x1xf32>
    %cst_50 = arith.constant 3.200000e+01 : f32
    %144 = vector.broadcast %cst_50 : f32 to vector<8x1xf32>
    %145 = arith.divf %143, %144 : vector<8x1xf32>
    %146 = vector.broadcast %138 : vector<8x1xf32> to vector<8x32xf32>
    %147 = arith.subf %132, %146 : vector<8x32xf32>
    %cst_51 = arith.constant 9.99999974E-6 : f32
    %148 = vector.broadcast %cst_51 : f32 to vector<8x1xf32>
    %149 = arith.addf %145, %148 : vector<8x1xf32>
    %150 = math.rsqrt %149 : vector<8x1xf32>
    %151 = vector.broadcast %150 : vector<8x1xf32> to vector<8x32xf32>
    %152 = arith.mulf %147, %151 : vector<8x32xf32>
    %153 = vector.broadcast %133 : vector<1x32xf32> to vector<8x32xf32>
    %154 = arith.mulf %152, %153 : vector<8x32xf32>
    %155 = vector.broadcast %134 : vector<1x32xf32> to vector<8x32xf32>
    %156 = arith.addf %154, %155 : vector<8x32xf32>
    %157 = arith.addf %156, %5 : vector<8x32xf32>
    %c0_52 = arith.constant 0 : index
    %c0_53 = arith.constant 0 : index
    %c0_54 = arith.constant 0 : index
    %158 = vector.load %arg4[%c0_52, %c0_53, %c0_54] : memref<1x16x32xbf16, #tpu.memory_space<vmem>>, vector<1x16x32xbf16>
    %159 = vector.shape_cast %158 : vector<1x16x32xbf16> to vector<16x32xbf16>
    %c0_55 = arith.constant 0 : index
    %c0_56 = arith.constant 0 : index
    %c0_57 = arith.constant 0 : index
    %160 = vector.load %arg5[%c0_55, %c0_56, %c0_57] : memref<1x16x32xbf16, #tpu.memory_space<vmem>>, vector<1x16x32xbf16>
    %161 = vector.shape_cast %160 : vector<1x16x32xbf16> to vector<16x32xbf16>
    %c0_58 = arith.constant 0 : index
    %c0_59 = arith.constant 0 : index
    %c0_60 = arith.constant 0 : index
    %162 = vector.load %arg9[%c0_58, %c0_59, %c0_60] : memref<1x1x16xf32, #tpu.memory_space<vmem>>, vector<1x1x16xf32>
    %163 = vector.shape_cast %162 : vector<1x1x16xf32> to vector<1x16xf32>
    %c0_61 = arith.constant 0 : index
    %c4 = arith.constant 4 : index
    %c0_62 = arith.constant 0 : index
    %c0_63 = arith.constant 0 : index
    %164 = vector.load %arg11[%c0_61, %c4, %c0_62, %c0_63] : memref<1x12x32x32xbf16, #tpu.memory_space<vmem>>, vector<1x1x32x32xbf16>
    %165 = vector.shape_cast %164 : vector<1x1x32x32xbf16> to vector<32x32xbf16>
    %c0_64 = arith.constant 0 : index
    %c5 = arith.constant 5 : index
    %c0_65 = arith.constant 0 : index
    %c0_66 = arith.constant 0 : index
    %166 = vector.load %arg11[%c0_64, %c5, %c0_65, %c0_66] : memref<1x12x32x32xbf16, #tpu.memory_space<vmem>>, vector<1x1x32x32xbf16>
    %167 = vector.shape_cast %166 : vector<1x1x32x32xbf16> to vector<32x32xbf16>
    %c0_67 = arith.constant 0 : index
    %c6 = arith.constant 6 : index
    %c0_68 = arith.constant 0 : index
    %c0_69 = arith.constant 0 : index
    %168 = vector.load %arg11[%c0_67, %c6, %c0_68, %c0_69] : memref<1x12x32x32xbf16, #tpu.memory_space<vmem>>, vector<1x1x32x32xbf16>
    %169 = vector.shape_cast %168 : vector<1x1x32x32xbf16> to vector<32x32xbf16>
    %c0_70 = arith.constant 0 : index
    %c7 = arith.constant 7 : index
    %c0_71 = arith.constant 0 : index
    %c0_72 = arith.constant 0 : index
    %170 = vector.load %arg11[%c0_70, %c7, %c0_71, %c0_72] : memref<1x12x32x32xbf16, #tpu.memory_space<vmem>>, vector<1x1x32x32xbf16>
    %171 = vector.shape_cast %170 : vector<1x1x32x32xbf16> to vector<32x32xbf16>
    %172 = arith.truncf %157 : vector<8x32xf32> to vector<8x32xbf16>
    %cst_73 = arith.constant dense<0.000000e+00> : vector<8x32xf32>
    %173 = tpu.matmul %172, %165, %cst_73 {dimension_numbers = #tpu.dot_dimension_numbers<[1], [0], [0], [1], [0, 0, 1, 1], [], []>} : vector<8x32xbf16>, vector<32x32xbf16>, vector<8x32xf32> -> vector<8x32xf32>
    %174 = vector.extract_strided_slice %7 {offsets = [4, 0], sizes = [1, 32], strides = [1, 1]} : vector<21x32xf32> to vector<1x32xf32>
    %175 = vector.broadcast %174 : vector<1x32xf32> to vector<8x32xf32>
    %176 = arith.addf %173, %175 : vector<8x32xf32>
    %cst_74 = arith.constant dense<0.000000e+00> : vector<16x32xf32>
    %177 = tpu.matmul %159, %167, %cst_74 {dimension_numbers = #tpu.dot_dimension_numbers<[1], [0], [0], [1], [0, 0, 1, 1], [], []>} : vector<16x32xbf16>, vector<32x32xbf16>, vector<16x32xf32> -> vector<16x32xf32>
    %178 = vector.extract_strided_slice %7 {offsets = [5, 0], sizes = [1, 32], strides = [1, 1]} : vector<21x32xf32> to vector<1x32xf32>
    %179 = vector.broadcast %178 : vector<1x32xf32> to vector<16x32xf32>
    %180 = arith.addf %177, %179 : vector<16x32xf32>
    %cst_75 = arith.constant dense<0.000000e+00> : vector<16x32xf32>
    %181 = tpu.matmul %161, %169, %cst_75 {dimension_numbers = #tpu.dot_dimension_numbers<[1], [0], [0], [1], [0, 0, 1, 1], [], []>} : vector<16x32xbf16>, vector<32x32xbf16>, vector<16x32xf32> -> vector<16x32xf32>
    %182 = vector.extract_strided_slice %7 {offsets = [6, 0], sizes = [1, 32], strides = [1, 1]} : vector<21x32xf32> to vector<1x32xf32>
    %183 = vector.broadcast %182 : vector<1x32xf32> to vector<16x32xf32>
    %184 = arith.addf %181, %183 : vector<16x32xf32>
    %185 = vector.extract_strided_slice %176 {offsets = [0, 0], sizes = [8, 8], strides = [1, 1]} : vector<8x32xf32> to vector<8x8xf32>
    %186 = arith.truncf %185 : vector<8x8xf32> to vector<8x8xbf16>
    %187 = vector.extract_strided_slice %180 {offsets = [0, 0], sizes = [16, 8], strides = [1, 1]} : vector<16x32xf32> to vector<16x8xf32>
    %188 = arith.truncf %187 : vector<16x8xf32> to vector<16x8xbf16>
    %189 = vector.extract_strided_slice %184 {offsets = [0, 0], sizes = [16, 8], strides = [1, 1]} : vector<16x32xf32> to vector<16x8xf32>
    %190 = arith.truncf %189 : vector<16x8xf32> to vector<16x8xbf16>
    %cst_76 = arith.constant dense<0.000000e+00> : vector<8x16xf32>
    %191 = tpu.matmul %186, %188, %cst_76 {dimension_numbers = #tpu.dot_dimension_numbers<[1], [1], [0], [0], [0, 0, 1, 0], [], []>} : vector<8x8xbf16>, vector<16x8xbf16>, vector<8x16xf32> -> vector<8x16xf32>
    %cst_77 = arith.constant 0.353553385 : f32
    %192 = vector.broadcast %cst_77 : f32 to vector<8x16xf32>
    %193 = arith.mulf %191, %192 : vector<8x16xf32>
    %194 = vector.broadcast %163 : vector<1x16xf32> to vector<8x16xf32>
    %195 = arith.addf %193, %194 : vector<8x16xf32>
    %cst_78 = arith.constant dense<0xFF800000> : vector<8xf32>
    %196 = vector.multi_reduction <maximumf>, %195, %cst_78 [1] : vector<8x16xf32> to vector<8xf32>
    %197 = vector.shape_cast %196 : vector<8xf32> to vector<8x1xf32>
    %198 = vector.broadcast %197 : vector<8x1xf32> to vector<8x16xf32>
    %199 = arith.subf %195, %198 : vector<8x16xf32>
    %200 = math.exp %199 : vector<8x16xf32>
    %cst_79 = arith.constant dense<0.000000e+00> : vector<8xf32>
    %201 = vector.multi_reduction <add>, %200, %cst_79 [1] : vector<8x16xf32> to vector<8xf32>
    %202 = vector.shape_cast %201 : vector<8xf32> to vector<8x1xf32>
    %203 = tpu.reciprocal %202 {approx = true} : vector<8x1xf32> -> vector<8x1xf32>
    %204 = vector.broadcast %203 : vector<8x1xf32> to vector<8x16xf32>
    %205 = arith.mulf %200, %204 : vector<8x16xf32>
    %206 = arith.truncf %205 : vector<8x16xf32> to vector<8x16xbf16>
    %cst_80 = arith.constant dense<0.000000e+00> : vector<8x8xf32>
    %207 = tpu.matmul %206, %190, %cst_80 {dimension_numbers = #tpu.dot_dimension_numbers<[1], [0], [0], [1], [0, 0, 1, 1], [], []>} : vector<8x16xbf16>, vector<16x8xbf16>, vector<8x8xf32> -> vector<8x8xf32>
    %208 = vector.extract_strided_slice %176 {offsets = [0, 8], sizes = [8, 8], strides = [1, 1]} : vector<8x32xf32> to vector<8x8xf32>
    %209 = arith.truncf %208 : vector<8x8xf32> to vector<8x8xbf16>
    %210 = vector.extract_strided_slice %180 {offsets = [0, 8], sizes = [16, 8], strides = [1, 1]} : vector<16x32xf32> to vector<16x8xf32>
    %211 = arith.truncf %210 : vector<16x8xf32> to vector<16x8xbf16>
    %212 = vector.extract_strided_slice %184 {offsets = [0, 8], sizes = [16, 8], strides = [1, 1]} : vector<16x32xf32> to vector<16x8xf32>
    %213 = arith.truncf %212 : vector<16x8xf32> to vector<16x8xbf16>
    %cst_81 = arith.constant dense<0.000000e+00> : vector<8x16xf32>
    %214 = tpu.matmul %209, %211, %cst_81 {dimension_numbers = #tpu.dot_dimension_numbers<[1], [1], [0], [0], [0, 0, 1, 0], [], []>} : vector<8x8xbf16>, vector<16x8xbf16>, vector<8x16xf32> -> vector<8x16xf32>
    %cst_82 = arith.constant 0.353553385 : f32
    %215 = vector.broadcast %cst_82 : f32 to vector<8x16xf32>
    %216 = arith.mulf %214, %215 : vector<8x16xf32>
    %217 = vector.broadcast %163 : vector<1x16xf32> to vector<8x16xf32>
    %218 = arith.addf %216, %217 : vector<8x16xf32>
    %cst_83 = arith.constant dense<0xFF800000> : vector<8xf32>
    %219 = vector.multi_reduction <maximumf>, %218, %cst_83 [1] : vector<8x16xf32> to vector<8xf32>
    %220 = vector.shape_cast %219 : vector<8xf32> to vector<8x1xf32>
    %221 = vector.broadcast %220 : vector<8x1xf32> to vector<8x16xf32>
    %222 = arith.subf %218, %221 : vector<8x16xf32>
    %223 = math.exp %222 : vector<8x16xf32>
    %cst_84 = arith.constant dense<0.000000e+00> : vector<8xf32>
    %224 = vector.multi_reduction <add>, %223, %cst_84 [1] : vector<8x16xf32> to vector<8xf32>
    %225 = vector.shape_cast %224 : vector<8xf32> to vector<8x1xf32>
    %226 = tpu.reciprocal %225 {approx = true} : vector<8x1xf32> -> vector<8x1xf32>
    %227 = vector.broadcast %226 : vector<8x1xf32> to vector<8x16xf32>
    %228 = arith.mulf %223, %227 : vector<8x16xf32>
    %229 = arith.truncf %228 : vector<8x16xf32> to vector<8x16xbf16>
    %cst_85 = arith.constant dense<0.000000e+00> : vector<8x8xf32>
    %230 = tpu.matmul %229, %213, %cst_85 {dimension_numbers = #tpu.dot_dimension_numbers<[1], [0], [0], [1], [0, 0, 1, 1], [], []>} : vector<8x16xbf16>, vector<16x8xbf16>, vector<8x8xf32> -> vector<8x8xf32>
    %231 = vector.extract_strided_slice %176 {offsets = [0, 16], sizes = [8, 8], strides = [1, 1]} : vector<8x32xf32> to vector<8x8xf32>
    %232 = arith.truncf %231 : vector<8x8xf32> to vector<8x8xbf16>
    %233 = vector.extract_strided_slice %180 {offsets = [0, 16], sizes = [16, 8], strides = [1, 1]} : vector<16x32xf32> to vector<16x8xf32>
    %234 = arith.truncf %233 : vector<16x8xf32> to vector<16x8xbf16>
    %235 = vector.extract_strided_slice %184 {offsets = [0, 16], sizes = [16, 8], strides = [1, 1]} : vector<16x32xf32> to vector<16x8xf32>
    %236 = arith.truncf %235 : vector<16x8xf32> to vector<16x8xbf16>
    %cst_86 = arith.constant dense<0.000000e+00> : vector<8x16xf32>
    %237 = tpu.matmul %232, %234, %cst_86 {dimension_numbers = #tpu.dot_dimension_numbers<[1], [1], [0], [0], [0, 0, 1, 0], [], []>} : vector<8x8xbf16>, vector<16x8xbf16>, vector<8x16xf32> -> vector<8x16xf32>
    %cst_87 = arith.constant 0.353553385 : f32
    %238 = vector.broadcast %cst_87 : f32 to vector<8x16xf32>
    %239 = arith.mulf %237, %238 : vector<8x16xf32>
    %240 = vector.broadcast %163 : vector<1x16xf32> to vector<8x16xf32>
    %241 = arith.addf %239, %240 : vector<8x16xf32>
    %cst_88 = arith.constant dense<0xFF800000> : vector<8xf32>
    %242 = vector.multi_reduction <maximumf>, %241, %cst_88 [1] : vector<8x16xf32> to vector<8xf32>
    %243 = vector.shape_cast %242 : vector<8xf32> to vector<8x1xf32>
    %244 = vector.broadcast %243 : vector<8x1xf32> to vector<8x16xf32>
    %245 = arith.subf %241, %244 : vector<8x16xf32>
    %246 = math.exp %245 : vector<8x16xf32>
    %cst_89 = arith.constant dense<0.000000e+00> : vector<8xf32>
    %247 = vector.multi_reduction <add>, %246, %cst_89 [1] : vector<8x16xf32> to vector<8xf32>
    %248 = vector.shape_cast %247 : vector<8xf32> to vector<8x1xf32>
    %249 = tpu.reciprocal %248 {approx = true} : vector<8x1xf32> -> vector<8x1xf32>
    %250 = vector.broadcast %249 : vector<8x1xf32> to vector<8x16xf32>
    %251 = arith.mulf %246, %250 : vector<8x16xf32>
    %252 = arith.truncf %251 : vector<8x16xf32> to vector<8x16xbf16>
    %cst_90 = arith.constant dense<0.000000e+00> : vector<8x8xf32>
    %253 = tpu.matmul %252, %236, %cst_90 {dimension_numbers = #tpu.dot_dimension_numbers<[1], [0], [0], [1], [0, 0, 1, 1], [], []>} : vector<8x16xbf16>, vector<16x8xbf16>, vector<8x8xf32> -> vector<8x8xf32>
    %254 = vector.extract_strided_slice %176 {offsets = [0, 24], sizes = [8, 8], strides = [1, 1]} : vector<8x32xf32> to vector<8x8xf32>
    %255 = arith.truncf %254 : vector<8x8xf32> to vector<8x8xbf16>
    %256 = vector.extract_strided_slice %180 {offsets = [0, 24], sizes = [16, 8], strides = [1, 1]} : vector<16x32xf32> to vector<16x8xf32>
    %257 = arith.truncf %256 : vector<16x8xf32> to vector<16x8xbf16>
    %258 = vector.extract_strided_slice %184 {offsets = [0, 24], sizes = [16, 8], strides = [1, 1]} : vector<16x32xf32> to vector<16x8xf32>
    %259 = arith.truncf %258 : vector<16x8xf32> to vector<16x8xbf16>
    %cst_91 = arith.constant dense<0.000000e+00> : vector<8x16xf32>
    %260 = tpu.matmul %255, %257, %cst_91 {dimension_numbers = #tpu.dot_dimension_numbers<[1], [1], [0], [0], [0, 0, 1, 0], [], []>} : vector<8x8xbf16>, vector<16x8xbf16>, vector<8x16xf32> -> vector<8x16xf32>
    %cst_92 = arith.constant 0.353553385 : f32
    %261 = vector.broadcast %cst_92 : f32 to vector<8x16xf32>
    %262 = arith.mulf %260, %261 : vector<8x16xf32>
    %263 = vector.broadcast %163 : vector<1x16xf32> to vector<8x16xf32>
    %264 = arith.addf %262, %263 : vector<8x16xf32>
    %cst_93 = arith.constant dense<0xFF800000> : vector<8xf32>
    %265 = vector.multi_reduction <maximumf>, %264, %cst_93 [1] : vector<8x16xf32> to vector<8xf32>
    %266 = vector.shape_cast %265 : vector<8xf32> to vector<8x1xf32>
    %267 = vector.broadcast %266 : vector<8x1xf32> to vector<8x16xf32>
    %268 = arith.subf %264, %267 : vector<8x16xf32>
    %269 = math.exp %268 : vector<8x16xf32>
    %cst_94 = arith.constant dense<0.000000e+00> : vector<8xf32>
    %270 = vector.multi_reduction <add>, %269, %cst_94 [1] : vector<8x16xf32> to vector<8xf32>
    %271 = vector.shape_cast %270 : vector<8xf32> to vector<8x1xf32>
    %272 = tpu.reciprocal %271 {approx = true} : vector<8x1xf32> -> vector<8x1xf32>
    %273 = vector.broadcast %272 : vector<8x1xf32> to vector<8x16xf32>
    %274 = arith.mulf %269, %273 : vector<8x16xf32>
    %275 = arith.truncf %274 : vector<8x16xf32> to vector<8x16xbf16>
    %cst_95 = arith.constant dense<0.000000e+00> : vector<8x8xf32>
    %276 = tpu.matmul %275, %259, %cst_95 {dimension_numbers = #tpu.dot_dimension_numbers<[1], [0], [0], [1], [0, 0, 1, 1], [], []>} : vector<8x16xbf16>, vector<16x8xbf16>, vector<8x8xf32> -> vector<8x8xf32>
    %277 = tpu.concatenate %207, %230, %253, %276 in 1 : vector<8x8xf32>, vector<8x8xf32>, vector<8x8xf32>, vector<8x8xf32> -> vector<8x32xf32>
    %278 = arith.truncf %277 : vector<8x32xf32> to vector<8x32xbf16>
    %cst_96 = arith.constant dense<0.000000e+00> : vector<8x32xf32>
    %279 = tpu.matmul %278, %171, %cst_96 {dimension_numbers = #tpu.dot_dimension_numbers<[1], [0], [0], [1], [0, 0, 1, 1], [], []>} : vector<8x32xbf16>, vector<32x32xbf16>, vector<8x32xf32> -> vector<8x32xf32>
    %280 = vector.extract_strided_slice %7 {offsets = [7, 0], sizes = [1, 32], strides = [1, 1]} : vector<21x32xf32> to vector<1x32xf32>
    %281 = vector.broadcast %280 : vector<1x32xf32> to vector<8x32xf32>
    %282 = arith.addf %279, %281 : vector<8x32xf32>
    %283 = arith.addf %156, %282 : vector<8x32xf32>
    %284 = vector.extract_strided_slice %7 {offsets = [14, 0], sizes = [1, 32], strides = [1, 1]} : vector<21x32xf32> to vector<1x32xf32>
    %285 = vector.extract_strided_slice %7 {offsets = [15, 0], sizes = [1, 32], strides = [1, 1]} : vector<21x32xf32> to vector<1x32xf32>
    %cst_97 = arith.constant dense<0.000000e+00> : vector<8xf32>
    %286 = vector.multi_reduction <add>, %283, %cst_97 [1] : vector<8x32xf32> to vector<8xf32>
    %287 = vector.shape_cast %286 : vector<8xf32> to vector<8x1xf32>
    %cst_98 = arith.constant 3.200000e+01 : f32
    %288 = vector.broadcast %cst_98 : f32 to vector<8x1xf32>
    %289 = arith.divf %287, %288 : vector<8x1xf32>
    %290 = vector.broadcast %289 : vector<8x1xf32> to vector<8x32xf32>
    %291 = arith.subf %283, %290 : vector<8x32xf32>
    %292 = arith.mulf %291, %291 : vector<8x32xf32>
    %cst_99 = arith.constant dense<0.000000e+00> : vector<8xf32>
    %293 = vector.multi_reduction <add>, %292, %cst_99 [1] : vector<8x32xf32> to vector<8xf32>
    %294 = vector.shape_cast %293 : vector<8xf32> to vector<8x1xf32>
    %cst_100 = arith.constant 3.200000e+01 : f32
    %295 = vector.broadcast %cst_100 : f32 to vector<8x1xf32>
    %296 = arith.divf %294, %295 : vector<8x1xf32>
    %297 = vector.broadcast %289 : vector<8x1xf32> to vector<8x32xf32>
    %298 = arith.subf %283, %297 : vector<8x32xf32>
    %cst_101 = arith.constant 9.99999974E-6 : f32
    %299 = vector.broadcast %cst_101 : f32 to vector<8x1xf32>
    %300 = arith.addf %296, %299 : vector<8x1xf32>
    %301 = math.rsqrt %300 : vector<8x1xf32>
    %302 = vector.broadcast %301 : vector<8x1xf32> to vector<8x32xf32>
    %303 = arith.mulf %298, %302 : vector<8x32xf32>
    %304 = vector.broadcast %284 : vector<1x32xf32> to vector<8x32xf32>
    %305 = arith.mulf %303, %304 : vector<8x32xf32>
    %306 = vector.broadcast %285 : vector<1x32xf32> to vector<8x32xf32>
    %307 = arith.addf %305, %306 : vector<8x32xf32>
    %308 = arith.addf %307, %5 : vector<8x32xf32>
    %c0_102 = arith.constant 0 : index
    %c0_103 = arith.constant 0 : index
    %c0_104 = arith.constant 0 : index
    %309 = vector.load %arg6[%c0_102, %c0_103, %c0_104] : memref<1x8x32xbf16, #tpu.memory_space<vmem>>, vector<1x8x32xbf16>
    %310 = vector.shape_cast %309 : vector<1x8x32xbf16> to vector<8x32xbf16>
    %c0_105 = arith.constant 0 : index
    %c0_106 = arith.constant 0 : index
    %c0_107 = arith.constant 0 : index
    %311 = vector.load %arg7[%c0_105, %c0_106, %c0_107] : memref<1x8x32xbf16, #tpu.memory_space<vmem>>, vector<1x8x32xbf16>
    %312 = vector.shape_cast %311 : vector<1x8x32xbf16> to vector<8x32xbf16>
    %c0_108 = arith.constant 0 : index
    %c0_109 = arith.constant 0 : index
    %c0_110 = arith.constant 0 : index
    %313 = vector.load %arg10[%c0_108, %c0_109, %c0_110] : memref<1x1x8xf32, #tpu.memory_space<vmem>>, vector<1x1x8xf32>
    %314 = vector.shape_cast %313 : vector<1x1x8xf32> to vector<1x8xf32>
    %c0_111 = arith.constant 0 : index
    %c8 = arith.constant 8 : index
    %c0_112 = arith.constant 0 : index
    %c0_113 = arith.constant 0 : index
    %315 = vector.load %arg11[%c0_111, %c8, %c0_112, %c0_113] : memref<1x12x32x32xbf16, #tpu.memory_space<vmem>>, vector<1x1x32x32xbf16>
    %316 = vector.shape_cast %315 : vector<1x1x32x32xbf16> to vector<32x32xbf16>
    %c0_114 = arith.constant 0 : index
    %c9 = arith.constant 9 : index
    %c0_115 = arith.constant 0 : index
    %c0_116 = arith.constant 0 : index
    %317 = vector.load %arg11[%c0_114, %c9, %c0_115, %c0_116] : memref<1x12x32x32xbf16, #tpu.memory_space<vmem>>, vector<1x1x32x32xbf16>
    %318 = vector.shape_cast %317 : vector<1x1x32x32xbf16> to vector<32x32xbf16>
    %c0_117 = arith.constant 0 : index
    %c10 = arith.constant 10 : index
    %c0_118 = arith.constant 0 : index
    %c0_119 = arith.constant 0 : index
    %319 = vector.load %arg11[%c0_117, %c10, %c0_118, %c0_119] : memref<1x12x32x32xbf16, #tpu.memory_space<vmem>>, vector<1x1x32x32xbf16>
    %320 = vector.shape_cast %319 : vector<1x1x32x32xbf16> to vector<32x32xbf16>
    %c0_120 = arith.constant 0 : index
    %c11 = arith.constant 11 : index
    %c0_121 = arith.constant 0 : index
    %c0_122 = arith.constant 0 : index
    %321 = vector.load %arg11[%c0_120, %c11, %c0_121, %c0_122] : memref<1x12x32x32xbf16, #tpu.memory_space<vmem>>, vector<1x1x32x32xbf16>
    %322 = vector.shape_cast %321 : vector<1x1x32x32xbf16> to vector<32x32xbf16>
    %323 = arith.truncf %308 : vector<8x32xf32> to vector<8x32xbf16>
    %cst_123 = arith.constant dense<0.000000e+00> : vector<8x32xf32>
    %324 = tpu.matmul %323, %316, %cst_123 {dimension_numbers = #tpu.dot_dimension_numbers<[1], [0], [0], [1], [0, 0, 1, 1], [], []>} : vector<8x32xbf16>, vector<32x32xbf16>, vector<8x32xf32> -> vector<8x32xf32>
    %325 = vector.extract_strided_slice %7 {offsets = [8, 0], sizes = [1, 32], strides = [1, 1]} : vector<21x32xf32> to vector<1x32xf32>
    %326 = vector.broadcast %325 : vector<1x32xf32> to vector<8x32xf32>
    %327 = arith.addf %324, %326 : vector<8x32xf32>
    %cst_124 = arith.constant dense<0.000000e+00> : vector<8x32xf32>
    %328 = tpu.matmul %310, %318, %cst_124 {dimension_numbers = #tpu.dot_dimension_numbers<[1], [0], [0], [1], [0, 0, 1, 1], [], []>} : vector<8x32xbf16>, vector<32x32xbf16>, vector<8x32xf32> -> vector<8x32xf32>
    %329 = vector.extract_strided_slice %7 {offsets = [9, 0], sizes = [1, 32], strides = [1, 1]} : vector<21x32xf32> to vector<1x32xf32>
    %330 = vector.broadcast %329 : vector<1x32xf32> to vector<8x32xf32>
    %331 = arith.addf %328, %330 : vector<8x32xf32>
    %cst_125 = arith.constant dense<0.000000e+00> : vector<8x32xf32>
    %332 = tpu.matmul %312, %320, %cst_125 {dimension_numbers = #tpu.dot_dimension_numbers<[1], [0], [0], [1], [0, 0, 1, 1], [], []>} : vector<8x32xbf16>, vector<32x32xbf16>, vector<8x32xf32> -> vector<8x32xf32>
    %333 = vector.extract_strided_slice %7 {offsets = [10, 0], sizes = [1, 32], strides = [1, 1]} : vector<21x32xf32> to vector<1x32xf32>
    %334 = vector.broadcast %333 : vector<1x32xf32> to vector<8x32xf32>
    %335 = arith.addf %332, %334 : vector<8x32xf32>
    %336 = vector.extract_strided_slice %327 {offsets = [0, 0], sizes = [8, 8], strides = [1, 1]} : vector<8x32xf32> to vector<8x8xf32>
    %337 = arith.truncf %336 : vector<8x8xf32> to vector<8x8xbf16>
    %338 = vector.extract_strided_slice %331 {offsets = [0, 0], sizes = [8, 8], strides = [1, 1]} : vector<8x32xf32> to vector<8x8xf32>
    %339 = arith.truncf %338 : vector<8x8xf32> to vector<8x8xbf16>
    %340 = vector.extract_strided_slice %335 {offsets = [0, 0], sizes = [8, 8], strides = [1, 1]} : vector<8x32xf32> to vector<8x8xf32>
    %341 = arith.truncf %340 : vector<8x8xf32> to vector<8x8xbf16>
    %cst_126 = arith.constant dense<0.000000e+00> : vector<8x8xf32>
    %342 = tpu.matmul %337, %339, %cst_126 {dimension_numbers = #tpu.dot_dimension_numbers<[1], [1], [0], [0], [0, 0, 1, 0], [], []>} : vector<8x8xbf16>, vector<8x8xbf16>, vector<8x8xf32> -> vector<8x8xf32>
    %cst_127 = arith.constant 0.353553385 : f32
    %343 = vector.broadcast %cst_127 : f32 to vector<8x8xf32>
    %344 = arith.mulf %342, %343 : vector<8x8xf32>
    %345 = vector.broadcast %314 : vector<1x8xf32> to vector<8x8xf32>
    %346 = arith.addf %344, %345 : vector<8x8xf32>
    %cst_128 = arith.constant dense<0xFF800000> : vector<8xf32>
    %347 = vector.multi_reduction <maximumf>, %346, %cst_128 [1] : vector<8x8xf32> to vector<8xf32>
    %348 = vector.shape_cast %347 : vector<8xf32> to vector<8x1xf32>
    %349 = vector.broadcast %348 : vector<8x1xf32> to vector<8x8xf32>
    %350 = arith.subf %346, %349 : vector<8x8xf32>
    %351 = math.exp %350 : vector<8x8xf32>
    %cst_129 = arith.constant dense<0.000000e+00> : vector<8xf32>
    %352 = vector.multi_reduction <add>, %351, %cst_129 [1] : vector<8x8xf32> to vector<8xf32>
    %353 = vector.shape_cast %352 : vector<8xf32> to vector<8x1xf32>
    %354 = tpu.reciprocal %353 {approx = true} : vector<8x1xf32> -> vector<8x1xf32>
    %355 = vector.broadcast %354 : vector<8x1xf32> to vector<8x8xf32>
    %356 = arith.mulf %351, %355 : vector<8x8xf32>
    %357 = arith.truncf %356 : vector<8x8xf32> to vector<8x8xbf16>
    %cst_130 = arith.constant dense<0.000000e+00> : vector<8x8xf32>
    %358 = tpu.matmul %357, %341, %cst_130 {dimension_numbers = #tpu.dot_dimension_numbers<[1], [0], [0], [1], [0, 0, 1, 1], [], []>} : vector<8x8xbf16>, vector<8x8xbf16>, vector<8x8xf32> -> vector<8x8xf32>
    %359 = vector.extract_strided_slice %327 {offsets = [0, 8], sizes = [8, 8], strides = [1, 1]} : vector<8x32xf32> to vector<8x8xf32>
    %360 = arith.truncf %359 : vector<8x8xf32> to vector<8x8xbf16>
    %361 = vector.extract_strided_slice %331 {offsets = [0, 8], sizes = [8, 8], strides = [1, 1]} : vector<8x32xf32> to vector<8x8xf32>
    %362 = arith.truncf %361 : vector<8x8xf32> to vector<8x8xbf16>
    %363 = vector.extract_strided_slice %335 {offsets = [0, 8], sizes = [8, 8], strides = [1, 1]} : vector<8x32xf32> to vector<8x8xf32>
    %364 = arith.truncf %363 : vector<8x8xf32> to vector<8x8xbf16>
    %cst_131 = arith.constant dense<0.000000e+00> : vector<8x8xf32>
    %365 = tpu.matmul %360, %362, %cst_131 {dimension_numbers = #tpu.dot_dimension_numbers<[1], [1], [0], [0], [0, 0, 1, 0], [], []>} : vector<8x8xbf16>, vector<8x8xbf16>, vector<8x8xf32> -> vector<8x8xf32>
    %cst_132 = arith.constant 0.353553385 : f32
    %366 = vector.broadcast %cst_132 : f32 to vector<8x8xf32>
    %367 = arith.mulf %365, %366 : vector<8x8xf32>
    %368 = vector.broadcast %314 : vector<1x8xf32> to vector<8x8xf32>
    %369 = arith.addf %367, %368 : vector<8x8xf32>
    %cst_133 = arith.constant dense<0xFF800000> : vector<8xf32>
    %370 = vector.multi_reduction <maximumf>, %369, %cst_133 [1] : vector<8x8xf32> to vector<8xf32>
    %371 = vector.shape_cast %370 : vector<8xf32> to vector<8x1xf32>
    %372 = vector.broadcast %371 : vector<8x1xf32> to vector<8x8xf32>
    %373 = arith.subf %369, %372 : vector<8x8xf32>
    %374 = math.exp %373 : vector<8x8xf32>
    %cst_134 = arith.constant dense<0.000000e+00> : vector<8xf32>
    %375 = vector.multi_reduction <add>, %374, %cst_134 [1] : vector<8x8xf32> to vector<8xf32>
    %376 = vector.shape_cast %375 : vector<8xf32> to vector<8x1xf32>
    %377 = tpu.reciprocal %376 {approx = true} : vector<8x1xf32> -> vector<8x1xf32>
    %378 = vector.broadcast %377 : vector<8x1xf32> to vector<8x8xf32>
    %379 = arith.mulf %374, %378 : vector<8x8xf32>
    %380 = arith.truncf %379 : vector<8x8xf32> to vector<8x8xbf16>
    %cst_135 = arith.constant dense<0.000000e+00> : vector<8x8xf32>
    %381 = tpu.matmul %380, %364, %cst_135 {dimension_numbers = #tpu.dot_dimension_numbers<[1], [0], [0], [1], [0, 0, 1, 1], [], []>} : vector<8x8xbf16>, vector<8x8xbf16>, vector<8x8xf32> -> vector<8x8xf32>
    %382 = vector.extract_strided_slice %327 {offsets = [0, 16], sizes = [8, 8], strides = [1, 1]} : vector<8x32xf32> to vector<8x8xf32>
    %383 = arith.truncf %382 : vector<8x8xf32> to vector<8x8xbf16>
    %384 = vector.extract_strided_slice %331 {offsets = [0, 16], sizes = [8, 8], strides = [1, 1]} : vector<8x32xf32> to vector<8x8xf32>
    %385 = arith.truncf %384 : vector<8x8xf32> to vector<8x8xbf16>
    %386 = vector.extract_strided_slice %335 {offsets = [0, 16], sizes = [8, 8], strides = [1, 1]} : vector<8x32xf32> to vector<8x8xf32>
    %387 = arith.truncf %386 : vector<8x8xf32> to vector<8x8xbf16>
    %cst_136 = arith.constant dense<0.000000e+00> : vector<8x8xf32>
    %388 = tpu.matmul %383, %385, %cst_136 {dimension_numbers = #tpu.dot_dimension_numbers<[1], [1], [0], [0], [0, 0, 1, 0], [], []>} : vector<8x8xbf16>, vector<8x8xbf16>, vector<8x8xf32> -> vector<8x8xf32>
    %cst_137 = arith.constant 0.353553385 : f32
    %389 = vector.broadcast %cst_137 : f32 to vector<8x8xf32>
    %390 = arith.mulf %388, %389 : vector<8x8xf32>
    %391 = vector.broadcast %314 : vector<1x8xf32> to vector<8x8xf32>
    %392 = arith.addf %390, %391 : vector<8x8xf32>
    %cst_138 = arith.constant dense<0xFF800000> : vector<8xf32>
    %393 = vector.multi_reduction <maximumf>, %392, %cst_138 [1] : vector<8x8xf32> to vector<8xf32>
    %394 = vector.shape_cast %393 : vector<8xf32> to vector<8x1xf32>
    %395 = vector.broadcast %394 : vector<8x1xf32> to vector<8x8xf32>
    %396 = arith.subf %392, %395 : vector<8x8xf32>
    %397 = math.exp %396 : vector<8x8xf32>
    %cst_139 = arith.constant dense<0.000000e+00> : vector<8xf32>
    %398 = vector.multi_reduction <add>, %397, %cst_139 [1] : vector<8x8xf32> to vector<8xf32>
    %399 = vector.shape_cast %398 : vector<8xf32> to vector<8x1xf32>
    %400 = tpu.reciprocal %399 {approx = true} : vector<8x1xf32> -> vector<8x1xf32>
    %401 = vector.broadcast %400 : vector<8x1xf32> to vector<8x8xf32>
    %402 = arith.mulf %397, %401 : vector<8x8xf32>
    %403 = arith.truncf %402 : vector<8x8xf32> to vector<8x8xbf16>
    %cst_140 = arith.constant dense<0.000000e+00> : vector<8x8xf32>
    %404 = tpu.matmul %403, %387, %cst_140 {dimension_numbers = #tpu.dot_dimension_numbers<[1], [0], [0], [1], [0, 0, 1, 1], [], []>} : vector<8x8xbf16>, vector<8x8xbf16>, vector<8x8xf32> -> vector<8x8xf32>
    %405 = vector.extract_strided_slice %327 {offsets = [0, 24], sizes = [8, 8], strides = [1, 1]} : vector<8x32xf32> to vector<8x8xf32>
    %406 = arith.truncf %405 : vector<8x8xf32> to vector<8x8xbf16>
    %407 = vector.extract_strided_slice %331 {offsets = [0, 24], sizes = [8, 8], strides = [1, 1]} : vector<8x32xf32> to vector<8x8xf32>
    %408 = arith.truncf %407 : vector<8x8xf32> to vector<8x8xbf16>
    %409 = vector.extract_strided_slice %335 {offsets = [0, 24], sizes = [8, 8], strides = [1, 1]} : vector<8x32xf32> to vector<8x8xf32>
    %410 = arith.truncf %409 : vector<8x8xf32> to vector<8x8xbf16>
    %cst_141 = arith.constant dense<0.000000e+00> : vector<8x8xf32>
    %411 = tpu.matmul %406, %408, %cst_141 {dimension_numbers = #tpu.dot_dimension_numbers<[1], [1], [0], [0], [0, 0, 1, 0], [], []>} : vector<8x8xbf16>, vector<8x8xbf16>, vector<8x8xf32> -> vector<8x8xf32>
    %cst_142 = arith.constant 0.353553385 : f32
    %412 = vector.broadcast %cst_142 : f32 to vector<8x8xf32>
    %413 = arith.mulf %411, %412 : vector<8x8xf32>
    %414 = vector.broadcast %314 : vector<1x8xf32> to vector<8x8xf32>
    %415 = arith.addf %413, %414 : vector<8x8xf32>
    %cst_143 = arith.constant dense<0xFF800000> : vector<8xf32>
    %416 = vector.multi_reduction <maximumf>, %415, %cst_143 [1] : vector<8x8xf32> to vector<8xf32>
    %417 = vector.shape_cast %416 : vector<8xf32> to vector<8x1xf32>
    %418 = vector.broadcast %417 : vector<8x1xf32> to vector<8x8xf32>
    %419 = arith.subf %415, %418 : vector<8x8xf32>
    %420 = math.exp %419 : vector<8x8xf32>
    %cst_144 = arith.constant dense<0.000000e+00> : vector<8xf32>
    %421 = vector.multi_reduction <add>, %420, %cst_144 [1] : vector<8x8xf32> to vector<8xf32>
    %422 = vector.shape_cast %421 : vector<8xf32> to vector<8x1xf32>
    %423 = tpu.reciprocal %422 {approx = true} : vector<8x1xf32> -> vector<8x1xf32>
    %424 = vector.broadcast %423 : vector<8x1xf32> to vector<8x8xf32>
    %425 = arith.mulf %420, %424 : vector<8x8xf32>
    %426 = arith.truncf %425 : vector<8x8xf32> to vector<8x8xbf16>
    %cst_145 = arith.constant dense<0.000000e+00> : vector<8x8xf32>
    %427 = tpu.matmul %426, %410, %cst_145 {dimension_numbers = #tpu.dot_dimension_numbers<[1], [0], [0], [1], [0, 0, 1, 1], [], []>} : vector<8x8xbf16>, vector<8x8xbf16>, vector<8x8xf32> -> vector<8x8xf32>
    %428 = tpu.concatenate %358, %381, %404, %427 in 1 : vector<8x8xf32>, vector<8x8xf32>, vector<8x8xf32>, vector<8x8xf32> -> vector<8x32xf32>
    %429 = arith.truncf %428 : vector<8x32xf32> to vector<8x32xbf16>
    %cst_146 = arith.constant dense<0.000000e+00> : vector<8x32xf32>
    %430 = tpu.matmul %429, %322, %cst_146 {dimension_numbers = #tpu.dot_dimension_numbers<[1], [0], [0], [1], [0, 0, 1, 1], [], []>} : vector<8x32xbf16>, vector<32x32xbf16>, vector<8x32xf32> -> vector<8x32xf32>
    %431 = vector.extract_strided_slice %7 {offsets = [11, 0], sizes = [1, 32], strides = [1, 1]} : vector<21x32xf32> to vector<1x32xf32>
    %432 = vector.broadcast %431 : vector<1x32xf32> to vector<8x32xf32>
    %433 = arith.addf %430, %432 : vector<8x32xf32>
    %434 = arith.addf %307, %433 : vector<8x32xf32>
    %435 = vector.extract_strided_slice %7 {offsets = [16, 0], sizes = [1, 32], strides = [1, 1]} : vector<21x32xf32> to vector<1x32xf32>
    %436 = vector.extract_strided_slice %7 {offsets = [17, 0], sizes = [1, 32], strides = [1, 1]} : vector<21x32xf32> to vector<1x32xf32>
    %cst_147 = arith.constant dense<0.000000e+00> : vector<8xf32>
    %437 = vector.multi_reduction <add>, %434, %cst_147 [1] : vector<8x32xf32> to vector<8xf32>
    %438 = vector.shape_cast %437 : vector<8xf32> to vector<8x1xf32>
    %cst_148 = arith.constant 3.200000e+01 : f32
    %439 = vector.broadcast %cst_148 : f32 to vector<8x1xf32>
    %440 = arith.divf %438, %439 : vector<8x1xf32>
    %441 = vector.broadcast %440 : vector<8x1xf32> to vector<8x32xf32>
    %442 = arith.subf %434, %441 : vector<8x32xf32>
    %443 = arith.mulf %442, %442 : vector<8x32xf32>
    %cst_149 = arith.constant dense<0.000000e+00> : vector<8xf32>
    %444 = vector.multi_reduction <add>, %443, %cst_149 [1] : vector<8x32xf32> to vector<8xf32>
    %445 = vector.shape_cast %444 : vector<8xf32> to vector<8x1xf32>
    %cst_150 = arith.constant 3.200000e+01 : f32
    %446 = vector.broadcast %cst_150 : f32 to vector<8x1xf32>
    %447 = arith.divf %445, %446 : vector<8x1xf32>
    %448 = vector.broadcast %440 : vector<8x1xf32> to vector<8x32xf32>
    %449 = arith.subf %434, %448 : vector<8x32xf32>
    %cst_151 = arith.constant 9.99999974E-6 : f32
    %450 = vector.broadcast %cst_151 : f32 to vector<8x1xf32>
    %451 = arith.addf %447, %450 : vector<8x1xf32>
    %452 = math.rsqrt %451 : vector<8x1xf32>
    %453 = vector.broadcast %452 : vector<8x1xf32> to vector<8x32xf32>
    %454 = arith.mulf %449, %453 : vector<8x32xf32>
    %455 = vector.broadcast %435 : vector<1x32xf32> to vector<8x32xf32>
    %456 = arith.mulf %454, %455 : vector<8x32xf32>
    %457 = vector.broadcast %436 : vector<1x32xf32> to vector<8x32xf32>
    %458 = arith.addf %456, %457 : vector<8x32xf32>
    %459 = arith.truncf %458 : vector<8x32xf32> to vector<8x32xbf16>
    %c0_152 = arith.constant 0 : index
    %c0_153 = arith.constant 0 : index
    %c0_154 = arith.constant 0 : index
    %460 = vector.load %arg12[%c0_152, %c0_153, %c0_154] : memref<1x32x64xbf16, #tpu.memory_space<vmem>>, vector<1x32x64xbf16>
    %461 = vector.shape_cast %460 : vector<1x32x64xbf16> to vector<32x64xbf16>
    %cst_155 = arith.constant dense<0.000000e+00> : vector<8x64xf32>
    %462 = tpu.matmul %459, %461, %cst_155 {dimension_numbers = #tpu.dot_dimension_numbers<[1], [0], [0], [1], [0, 0, 1, 1], [], []>} : vector<8x32xbf16>, vector<32x64xbf16>, vector<8x64xf32> -> vector<8x64xf32>
    %c0_156 = arith.constant 0 : index
    %c0_157 = arith.constant 0 : index
    %c0_158 = arith.constant 0 : index
    %463 = vector.load %arg13[%c0_156, %c0_157, %c0_158] : memref<1x1x64xf32, #tpu.memory_space<vmem>>, vector<1x1x64xf32>
    %464 = vector.shape_cast %463 : vector<1x1x64xf32> to vector<1x64xf32>
    %465 = vector.broadcast %464 : vector<1x64xf32> to vector<8x64xf32>
    %466 = arith.addf %462, %465 : vector<8x64xf32>
    %cst_159 = arith.constant 0.000000e+00 : f32
    %467 = vector.broadcast %cst_159 : f32 to vector<8x64xf32>
    %468 = arith.maximumf %466, %467 : vector<8x64xf32>
    %469 = arith.truncf %468 : vector<8x64xf32> to vector<8x64xbf16>
    %c0_160 = arith.constant 0 : index
    %c0_161 = arith.constant 0 : index
    %c0_162 = arith.constant 0 : index
    %470 = vector.load %arg14[%c0_160, %c0_161, %c0_162] : memref<1x64x32xbf16, #tpu.memory_space<vmem>>, vector<1x64x32xbf16>
    %471 = vector.shape_cast %470 : vector<1x64x32xbf16> to vector<64x32xbf16>
    %cst_163 = arith.constant dense<0.000000e+00> : vector<8x32xf32>
    %472 = tpu.matmul %469, %471, %cst_163 {dimension_numbers = #tpu.dot_dimension_numbers<[1], [0], [0], [1], [0, 0, 1, 1], [], []>} : vector<8x64xbf16>, vector<64x32xbf16>, vector<8x32xf32> -> vector<8x32xf32>
    %473 = vector.extract_strided_slice %7 {offsets = [20, 0], sizes = [1, 32], strides = [1, 1]} : vector<21x32xf32> to vector<1x32xf32>
    %474 = vector.broadcast %473 : vector<1x32xf32> to vector<8x32xf32>
    %475 = arith.addf %472, %474 : vector<8x32xf32>
    %476 = arith.addf %458, %475 : vector<8x32xf32>
    %477 = vector.extract_strided_slice %7 {offsets = [18, 0], sizes = [1, 32], strides = [1, 1]} : vector<21x32xf32> to vector<1x32xf32>
    %478 = vector.extract_strided_slice %7 {offsets = [19, 0], sizes = [1, 32], strides = [1, 1]} : vector<21x32xf32> to vector<1x32xf32>
    %cst_164 = arith.constant dense<0.000000e+00> : vector<8xf32>
    %479 = vector.multi_reduction <add>, %476, %cst_164 [1] : vector<8x32xf32> to vector<8xf32>
    %480 = vector.shape_cast %479 : vector<8xf32> to vector<8x1xf32>
    %cst_165 = arith.constant 3.200000e+01 : f32
    %481 = vector.broadcast %cst_165 : f32 to vector<8x1xf32>
    %482 = arith.divf %480, %481 : vector<8x1xf32>
    %483 = vector.broadcast %482 : vector<8x1xf32> to vector<8x32xf32>
    %484 = arith.subf %476, %483 : vector<8x32xf32>
    %485 = arith.mulf %484, %484 : vector<8x32xf32>
    %cst_166 = arith.constant dense<0.000000e+00> : vector<8xf32>
    %486 = vector.multi_reduction <add>, %485, %cst_166 [1] : vector<8x32xf32> to vector<8xf32>
    %487 = vector.shape_cast %486 : vector<8xf32> to vector<8x1xf32>
    %cst_167 = arith.constant 3.200000e+01 : f32
    %488 = vector.broadcast %cst_167 : f32 to vector<8x1xf32>
    %489 = arith.divf %487, %488 : vector<8x1xf32>
    %490 = vector.broadcast %482 : vector<8x1xf32> to vector<8x32xf32>
    %491 = arith.subf %476, %490 : vector<8x32xf32>
    %cst_168 = arith.constant 9.99999974E-6 : f32
    %492 = vector.broadcast %cst_168 : f32 to vector<8x1xf32>
    %493 = arith.addf %489, %492 : vector<8x1xf32>
    %494 = math.rsqrt %493 : vector<8x1xf32>
    %495 = vector.broadcast %494 : vector<8x1xf32> to vector<8x32xf32>
    %496 = arith.mulf %491, %495 : vector<8x32xf32>
    %497 = vector.broadcast %477 : vector<1x32xf32> to vector<8x32xf32>
    %498 = arith.mulf %496, %497 : vector<8x32xf32>
    %499 = vector.broadcast %478 : vector<1x32xf32> to vector<8x32xf32>
    %500 = arith.addf %498, %499 : vector<8x32xf32>
    %c0_169 = arith.constant 0 : index
    %c0_170 = arith.constant 0 : index
    %501 = vector.load %arg19[%c0_169, %c0_170] : memref<8x32xf32, #tpu.memory_space<vmem>>, vector<8x32xf32>
    tpu.vector_store %arg19[%c0_169, %c0_170], %500 {strides = array<i32>} : memref<8x32xf32, #tpu.memory_space<vmem>>, vector<8x32xf32>,
    %c1_i32 = arith.constant 1 : i32
    %502 = arith.cmpi eq, %arg1, %c1_i32 : i32
    %503 = arith.extui %502 : i1 to i32
    %c0_i32_171 = arith.constant 0 : i32
    %504 = arith.cmpi ne, %503, %c0_i32_171 : i32
    scf.if %504 {
      %c0_174 = arith.constant 0 : index
      %c0_175 = arith.constant 0 : index
      %508 = vector.load %arg16[%c0_174, %c0_175] : memref<2x32xf32, #tpu.memory_space<vmem>>, vector<1x32xf32>
      %c1_176 = arith.constant 1 : index
      %c0_177 = arith.constant 0 : index
      %509 = vector.load %arg16[%c1_176, %c0_177] : memref<2x32xf32, #tpu.memory_space<vmem>>, vector<1x32xf32>
      %cst_178 = arith.constant dense<0.000000e+00> : vector<8xf32>
      %510 = vector.multi_reduction <add>, %500, %cst_178 [1] : vector<8x32xf32> to vector<8xf32>
      %511 = vector.shape_cast %510 : vector<8xf32> to vector<8x1xf32>
      %cst_179 = arith.constant 3.200000e+01 : f32
      %512 = vector.broadcast %cst_179 : f32 to vector<8x1xf32>
      %513 = arith.divf %511, %512 : vector<8x1xf32>
      %514 = vector.broadcast %513 : vector<8x1xf32> to vector<8x32xf32>
      %515 = arith.subf %500, %514 : vector<8x32xf32>
      %516 = arith.mulf %515, %515 : vector<8x32xf32>
      %cst_180 = arith.constant dense<0.000000e+00> : vector<8xf32>
      %517 = vector.multi_reduction <add>, %516, %cst_180 [1] : vector<8x32xf32> to vector<8xf32>
      %518 = vector.shape_cast %517 : vector<8xf32> to vector<8x1xf32>
      %cst_181 = arith.constant 3.200000e+01 : f32
      %519 = vector.broadcast %cst_181 : f32 to vector<8x1xf32>
      %520 = arith.divf %518, %519 : vector<8x1xf32>
      %521 = vector.broadcast %513 : vector<8x1xf32> to vector<8x32xf32>
      %522 = arith.subf %500, %521 : vector<8x32xf32>
      %cst_182 = arith.constant 9.99999974E-6 : f32
      %523 = vector.broadcast %cst_182 : f32 to vector<8x1xf32>
      %524 = arith.addf %520, %523 : vector<8x1xf32>
      %525 = math.rsqrt %524 : vector<8x1xf32>
      %526 = vector.broadcast %525 : vector<8x1xf32> to vector<8x32xf32>
      %527 = arith.mulf %522, %526 : vector<8x32xf32>
      %528 = vector.broadcast %508 : vector<1x32xf32> to vector<8x32xf32>
      %529 = arith.mulf %527, %528 : vector<8x32xf32>
      %530 = vector.broadcast %509 : vector<1x32xf32> to vector<8x32xf32>
      %531 = arith.addf %529, %530 : vector<8x32xf32>
      %cst_183 = arith.constant dense<0.000000e+00> : vector<8xf32>
      %532 = vector.multi_reduction <add>, %531, %cst_183 [1] : vector<8x32xf32> to vector<8xf32>
      %533 = vector.shape_cast %532 : vector<8xf32> to vector<8x1xf32>
      %cst_184 = arith.constant 3.200000e+01 : f32
      %534 = vector.broadcast %cst_184 : f32 to vector<8x1xf32>
      %535 = arith.divf %533, %534 : vector<8x1xf32>
      %536 = vector.broadcast %535 : vector<8x1xf32> to vector<8x32xf32>
      %537 = arith.subf %531, %536 : vector<8x32xf32>
      %538 = arith.mulf %537, %537 : vector<8x32xf32>
      %cst_185 = arith.constant dense<0.000000e+00> : vector<8xf32>
      %539 = vector.multi_reduction <add>, %538, %cst_185 [1] : vector<8x32xf32> to vector<8xf32>
      %540 = vector.shape_cast %539 : vector<8xf32> to vector<8x1xf32>
      %cst_186 = arith.constant 3.200000e+01 : f32
      %541 = vector.broadcast %cst_186 : f32 to vector<8x1xf32>
      %542 = arith.divf %540, %541 : vector<8x1xf32>
      %543 = vector.broadcast %535 : vector<8x1xf32> to vector<8x32xf32>
      %544 = arith.subf %531, %543 : vector<8x32xf32>
      %cst_187 = arith.constant 9.99999974E-6 : f32
      %545 = vector.broadcast %cst_187 : f32 to vector<8x1xf32>
      %546 = arith.addf %542, %545 : vector<8x1xf32>
      %547 = math.rsqrt %546 : vector<8x1xf32>
      %548 = vector.broadcast %547 : vector<8x1xf32> to vector<8x32xf32>
      %549 = arith.mulf %544, %548 : vector<8x32xf32>
      %550 = vector.broadcast %508 : vector<1x32xf32> to vector<8x32xf32>
      %551 = arith.mulf %549, %550 : vector<8x32xf32>
      %552 = vector.broadcast %509 : vector<1x32xf32> to vector<8x32xf32>
      %553 = arith.addf %551, %552 : vector<8x32xf32>
      %c0_188 = arith.constant 0 : index
      %c0_189 = arith.constant 0 : index
      %c0_190 = arith.constant 0 : index
      %c0_191 = arith.constant 0 : index
      %554 = vector.load %arg17[%c0_188, %c0_189, %c0_190, %c0_191] : memref<1x1x8x32xf32, #tpu.memory_space<vmem>>, vector<1x1x8x32xf32>
      %555 = vector.shape_cast %554 : vector<1x1x8x32xf32> to vector<8x32xf32>
      %556 = vector.shape_cast %553 : vector<8x32xf32> to vector<1x1x8x32xf32>
      tpu.vector_store %arg17[%c0_188, %c0_189, %c0_190, %c0_191], %556 {strides = array<i32>} : memref<1x1x8x32xf32, #tpu.memory_space<vmem>>, vector<1x1x8x32xf32>,
      %c0_192 = arith.constant 0 : index
      %c0_193 = arith.constant 0 : index
      %c0_194 = arith.constant 0 : index
      %557 = vector.load %arg18[%c0_192, %c0_193, %c0_194] : memref<1x8x32xf32, #tpu.memory_space<vmem>>, vector<1x8x32xf32>
      %558 = vector.shape_cast %557 : vector<1x8x32xf32> to vector<8x32xf32>
      %559 = vector.shape_cast %531 : vector<8x32xf32> to vector<1x8x32xf32>
      tpu.vector_store %arg18[%c0_192, %c0_193, %c0_194], %559 {strides = array<i32>} : memref<1x8x32xf32, #tpu.memory_space<vmem>>, vector<1x8x32xf32>,
    } else {
    }
    %c1_i32_172 = arith.constant 1 : i32
    %505 = arith.cmpi slt, %arg1, %c1_i32_172 : i32
    %506 = arith.extui %505 : i1 to i32
    %c0_i32_173 = arith.constant 0 : i32
    %507 = arith.cmpi ne, %506, %c0_i32_173 : i32
    scf.if %507 {
      %c0_174 = arith.constant 0 : index
      %c0_175 = arith.constant 0 : index
      %c0_176 = arith.constant 0 : index
      %c0_177 = arith.constant 0 : index
      %508 = vector.load %arg17[%c0_174, %c0_175, %c0_176, %c0_177] : memref<1x1x8x32xf32, #tpu.memory_space<vmem>>, vector<1x1x8x32xf32>
      %509 = vector.shape_cast %508 : vector<1x1x8x32xf32> to vector<8x32xf32>
      %510 = vector.shape_cast %500 : vector<8x32xf32> to vector<1x1x8x32xf32>
      tpu.vector_store %arg17[%c0_174, %c0_175, %c0_176, %c0_177], %510 {strides = array<i32>} : memref<1x1x8x32xf32, #tpu.memory_space<vmem>>, vector<1x1x8x32xf32>,
    } else {
    }
    return
  }
  func.func @transform_0(%arg0: i32, %arg1: i32) -> (i32, i32, i32) {
    %c0_i32 = arith.constant 0 : i32
    %c0_i32_0 = arith.constant 0 : i32
    %c0_i32_1 = arith.constant 0 : i32
    return %arg0, %c0_i32, %c0_i32_0 : i32, i32, i32
  }
  func.func @transform_1(%arg0: i32, %arg1: i32) -> (i32, i32, i32) {
    %c0_i32 = arith.constant 0 : i32
    %c0_i32_0 = arith.constant 0 : i32
    %c0_i32_1 = arith.constant 0 : i32
    return %arg0, %c0_i32, %c0_i32_0 : i32, i32, i32
  }
  func.func @transform_2(%arg0: i32, %arg1: i32) -> (i32, i32, i32) {
    %c0_i32 = arith.constant 0 : i32
    %c0_i32_0 = arith.constant 0 : i32
    %c0_i32_1 = arith.constant 0 : i32
    return %arg0, %c0_i32, %c0_i32_0 : i32, i32, i32
  }
  func.func @transform_3(%arg0: i32, %arg1: i32) -> (i32, i32, i32) {
    %c0_i32 = arith.constant 0 : i32
    %c0_i32_0 = arith.constant 0 : i32
    %c0_i32_1 = arith.constant 0 : i32
    return %arg0, %c0_i32, %c0_i32_0 : i32, i32, i32
  }
  func.func @transform_4(%arg0: i32, %arg1: i32) -> (i32, i32, i32) {
    %c0_i32 = arith.constant 0 : i32
    %c0_i32_0 = arith.constant 0 : i32
    %c0_i32_1 = arith.constant 0 : i32
    return %arg0, %c0_i32, %c0_i32_0 : i32, i32, i32
  }
  func.func @transform_5(%arg0: i32, %arg1: i32) -> (i32, i32, i32) {
    %c0_i32 = arith.constant 0 : i32
    %c0_i32_0 = arith.constant 0 : i32
    %c0_i32_1 = arith.constant 0 : i32
    return %arg0, %c0_i32, %c0_i32_0 : i32, i32, i32
  }
  func.func @transform_6(%arg0: i32, %arg1: i32) -> (i32, i32, i32) {
    %c0_i32 = arith.constant 0 : i32
    %c0_i32_0 = arith.constant 0 : i32
    %c0_i32_1 = arith.constant 0 : i32
    return %arg0, %c0_i32, %c0_i32_0 : i32, i32, i32
  }
  func.func @transform_7(%arg0: i32, %arg1: i32) -> (i32, i32, i32) {
    %c0_i32 = arith.constant 0 : i32
    %c0_i32_0 = arith.constant 0 : i32
    %c0_i32_1 = arith.constant 0 : i32
    return %arg0, %c0_i32, %c0_i32_0 : i32, i32, i32
  }
  func.func @transform_8(%arg0: i32, %arg1: i32) -> (i32, i32, i32) {
    %c0_i32 = arith.constant 0 : i32
    %c0_i32_0 = arith.constant 0 : i32
    %c0_i32_1 = arith.constant 0 : i32
    return %arg0, %c0_i32, %c0_i32_0 : i32, i32, i32
  }
  func.func @transform_9(%arg0: i32, %arg1: i32) -> (i32, i32, i32, i32) {
    %c0_i32 = arith.constant 0 : i32
    %c0_i32_0 = arith.constant 0 : i32
    %c0_i32_1 = arith.constant 0 : i32
    %c0_i32_2 = arith.constant 0 : i32
    return %arg1, %c0_i32, %c0_i32_0, %c0_i32_1 : i32, i32, i32, i32
  }
  func.func @transform_10(%arg0: i32, %arg1: i32) -> (i32, i32, i32) {
    %c0_i32 = arith.constant 0 : i32
    %c0_i32_0 = arith.constant 0 : i32
    %c0_i32_1 = arith.constant 0 : i32
    return %arg1, %c0_i32, %c0_i32_0 : i32, i32, i32
  }
  func.func @transform_11(%arg0: i32, %arg1: i32) -> (i32, i32, i32) {
    %c0_i32 = arith.constant 0 : i32
    %c0_i32_0 = arith.constant 0 : i32
    %c0_i32_1 = arith.constant 0 : i32
    return %arg1, %c0_i32, %c0_i32_0 : i32, i32, i32
  }
  func.func @transform_12(%arg0: i32, %arg1: i32) -> (i32, i32, i32) {
    %c0_i32 = arith.constant 0 : i32
    %c0_i32_0 = arith.constant 0 : i32
    %c0_i32_1 = arith.constant 0 : i32
    return %arg1, %c0_i32, %c0_i32_0 : i32, i32, i32
  }
  func.func @transform_13(%arg0: i32, %arg1: i32) -> (i32, i32, i32) {
    %c0_i32 = arith.constant 0 : i32
    %c0_i32_0 = arith.constant 0 : i32
    %c0_i32_1 = arith.constant 0 : i32
    return %arg1, %c0_i32, %c0_i32_0 : i32, i32, i32
  }
  func.func @transform_14(%arg0: i32, %arg1: i32) -> (i32, i32) {
    %c0_i32 = arith.constant 0 : i32
    %c0_i32_0 = arith.constant 0 : i32
    %c0_i32_1 = arith.constant 0 : i32
    return %c0_i32, %c0_i32_0 : i32, i32
  }
  func.func @transform_15(%arg0: i32, %arg1: i32) -> (i32, i32, i32, i32) {
    %c0_i32 = arith.constant 0 : i32
    %c0_i32_0 = arith.constant 0 : i32
    %c0_i32_1 = arith.constant 0 : i32
    return %arg1, %arg0, %c0_i32, %c0_i32_0 : i32, i32, i32, i32
  }
  func.func @transform_16(%arg0: i32, %arg1: i32) -> (i32, i32, i32) {
    %c0_i32 = arith.constant 0 : i32
    %c0_i32_0 = arith.constant 0 : i32
    %c0_i32_1 = arith.constant 0 : i32
    return %arg0, %c0_i32, %c0_i32_0 : i32, i32, i32
  }
}

</mosaic_0001>

<bundles_post_ra>
// kernel: tpu_custom_call.1
= control target key start
LH: loop header
LB: loop body
LE: loop exit
PB: predicated region body
PF: predicated region fallthrough
CT: control target
= control target key end

     0   :  { %s5415_s0 = inlined_call_operand.vmem [shape: f32[2,8,32], index: 0, kind: input, shape index: {}]   ;;  %s5416_s1 = inlined_call_operand.vmem [shape: f32[2,8,32], index: 1, kind: input, shape index: {}]   ;;  %s5417_s2 = inlined_call_operand.vmem [shape: bf16[2,16,32], index: 2, kind: input, shape index: {}]   ;;  %s5418_s3 = inlined_call_operand.vmem [shape: bf16[2,16,32], index: 3, kind: input, shape index: {}]   ;;  %s5419_s4 = inlined_call_operand.vmem [shape: bf16[2,8,32], index: 4, kind: input, shape index: {}]   ;;  %s5420_s5 = inlined_call_operand.vmem [shape: bf16[2,8,32], index: 5, kind: input, shape index: {}]   ;;  %s5421_s6 = inlined_call_operand.vmem [shape: f32[2,1,8], index: 6, kind: input, shape index: {}]   ;;  %s5422_s7 = inlined_call_operand.vmem [shape: f32[2,1,16], index: 7, kind: input, shape index: {}]   ;;  %s5423_s8 = inlined_call_operand.vmem [shape: f32[2,1,8], index: 8, kind: input, shape index: {}]   ;;  %s5424_s9 = inlined_call_operand.hbm [shape: bf16[2,12,32,32], index: 9, kind: input, shape index: {}]   ;;  %s5425_s10 = inlined_call_operand.vmem [shape: bf16[2,32,64], index: 10, kind: input, shape index: {}]   ;;  %s5426_s11 = inlined_call_operand.vmem [shape: f32[2,1,64], index: 11, kind: input, shape index: {}]   ;;  %s5427_s12 = inlined_call_operand.vmem [shape: bf16[2,64,32], index: 12, kind: input, shape index: {}]   ;;  %s5428_s13 = inlined_call_operand.vmem [shape: f32[2,21,32], index: 13, kind: input, shape index: {}]   ;;  %s5429_s14 = inlined_call_operand.vmem [shape: f32[2,32], index: 14, kind: input, shape index: {}]   ;;  %s5430_s15 = inlined_call_operand.hbm [shape: f32[2,2,8,32], index: 15, kind: output, shape index: {0}]   ;;  %s5431_s16 = inlined_call_operand.hbm [shape: f32[2,8,32], index: 16, kind: output, shape index: {1}]  }
   0x1   :  { %5459 = sst [smem:[#allocation35_spill]] %s5415_s0 }
   0x2   :  { %5460 = sst [smem:[#allocation36_spill]] %s5416_s1 }
   0x3   :  { %5461 = sst [smem:[#allocation37_spill]] %s5417_s2 }
   0x4   :  { %5462 = sst [smem:[#allocation38_spill]] %s5418_s3 }
   0x5   :  { %5463 = sst [smem:[#allocation39_spill]] %s5419_s4 }
   0x6   :  { %5464 = sst [smem:[#allocation40_spill]] %s5420_s5 }
   0x7   :  { %5465 = sst [smem:[#allocation41_spill]] %s5422_s7 }
   0x8   :  { %5466 = sst [smem:[#allocation42_spill]] %s5423_s8 }
   0x9   :  { %5467 = sst [smem:[#allocation43_spill]] %s5424_s9 }
   0xa   :  { %5468 = sst [smem:[#allocation44_spill]] %s5425_s10 }
   0xb   :  { %5469 = sst [smem:[#allocation45_spill]] %s5426_s11 }
   0xc   :  { %5470 = sst [smem:[#allocation46_spill]] %s5427_s12 }
   0xd   :  { %5471 = sst [smem:[#allocation47_spill]] %s5428_s13 }
   0xe   :  { %5472 = sst [smem:[#allocation48_spill]] %s5429_s14 }
   0xf   :  { %5473 = sst [smem:[#allocation49_spill]] %s5430_s15 }
  0x10   :  { %5474 = sst [smem:[#allocation50_spill]] %s5431_s16 }
  0x11   :  { %22 = vsyncpa [#allocation4], 0 }
  0x12   :  { %24 = vsyncpa [#allocation4 + $0x1], 0 }
  0x13   :  { %25 = vsyncpa [#allocation5], 0 }
  0x14   :  { %27 = vsyncpa [#allocation5 + $0x1], 0 }
  0x15   :  { %28 = vsyncpa [#allocation8], 0 }
  0x16   :  { %30 = vsyncpa [#allocation8 + $0x1], 0  ;;  %s4638_s21 = smov 0   ;;  %s4640_s22 = smov 0  }
  0x17   :  { %s4642_s23 = smov 0   ;;  %s4644_s24 = smov 0  }
  0x18   :  { %s4646_s25 = smov 0   ;;  %s4648_s26 = smov 0  }
  0x19   :  { %s4650_s27 = smov 0   ;;  %s4652_s28 = smov 0  }
  0x1a   :  { %s4654_s29 = smov 0   ;;  %s4656_s30 = smov 0  }
  0x1b   :  { %s4658_s0 = smov 0   ;;  %s4660_s17 = smov 0  }
  0x1c   :  { %s4662_s18 = smov 0   ;;  %s4664_s19 = smov 0  }
  0x1d LB: > { %5475 = sst [smem:[#allocation12_spill]] %s4486_s21  ;;  %s3591_s20 = sadd.s32 4294967295, %s4538_s19   ;;  %s4538_s19 = sphi %s4664_s19, %s36_s19   ;;  %s4534_s18 = sphi %s4662_s18, %s5560_s18   ;;  %s4530_s17 = sphi %s4660_s17, %s5559_s17   ;;  %s4526_s0 = sphi %s4658_s0, %s5558_s0   ;;  %s4522_s30 = sphi %s4656_s30, %s5557_s30   ;;  %s4518_s29 = sphi %s4654_s29, %s5556_s29   ;;  %s4514_s28 = sphi %s4652_s28, %s5555_s28   ;;  %s4510_s27 = sphi %s4650_s27, %s5554_s27   ;;  %s4506_s26 = sphi %s4648_s26, %s5553_s26   ;;  %s4502_s25 = sphi %s4646_s25, %s5552_s25   ;;  %s4498_s24 = sphi %s4644_s24, %s5551_s24   ;;  %s4494_s23 = sphi %s4642_s23, %s5550_s23   ;;  %s4490_s22 = sphi %s4640_s22, %s5549_s22   ;;  %s4486_s21 = sphi %s4638_s21, %s5548_s21  }
  0x1e   : > { %5476 = sst [smem:[#allocation13_spill]] %s4490_s22  ;;  %s3592_s16 = sadd.s32 4294967294, %s4538_s19  }
  0x1f   : > { %5477 = sst [smem:[#allocation14_spill]] %s4494_s23  ;;  %s45_s15 = sadd.s32 1, %s4530_s17 }
  0x20   : > { %5478 = sst [smem:[#allocation15_spill]] %s4498_s24  ;;  %s48_s14 = sadd.s32 1, %s4534_s18 }
  0x21   : > { %5479 = sst [smem:[#allocation16_spill]] %s4502_s25  ;;  %p46_p0 = scmp.ge.s32.totalorder %s45_s15, 2 }
  0x22   : > { %5480 = sst [smem:[#allocation17_spill]] %s4506_s26  ;;  %s289_s13 = sadd.s32 1, %s4518_s29 }
  0x23   : > { %5481 = sst [smem:[#allocation18_spill]] %s4514_s28  ;;  %p296_p1 = scmp.ne.s32.totalorder %s4518_s29, %s4514_s28 }
  0x24   : > { %5482 = sst [smem:[#allocation19_spill]] %s4518_s29  ;;  %p297_p2 = scmp.eq.s32.totalorder %s4538_s19, 0 }
  0x25   : > { %5483 = sst [smem:[#allocation20_spill]] %s4526_s0  ;;  %s5562_s15 = smov (%p46_p0, %s45_s15), 0 }
  0x26   : > { %5484 = sst [smem:[#allocation21_spill]] %s4530_s17  ;;  %s5564_s14 = smov (!%p46_p0, %s48_s14), %s4534_s18 }
  0x27   : > { %5485 = sst [smem:[#allocation22_spill]] %s4534_s18  ;;  %s286_s12 = ssub.s32 %s4530_s17, %s5562_s15 }
  0x28   : > { %5486 = sst [smem:[#allocation23_spill]] %s4538_s19  ;;  %p4719_p3 = por %p297_p2, %p296_p1 }
  0x29   : > { %5487 = sst [smem:[#allocation24_spill]] %s5562_s15  ;;  %p50_p4 = scmp.ge.s32.totalorder %s5564_s14, 2 }
  0x2a   : > { %p287_p5 = scmp.eq.s32.totalorder %s286_s12, 0  ;;  %p302_p6 = scmp.ne.s32.totalorder %s4514_s28, %s4510_s27 }
  0x2b   : > { %p303_p7 = scmp.eq.s32.totalorder %s3591_s20, 0  ;;  %s5566_s14 = smov (%p50_p4, %s5564_s14), 0 }
  0x2c   : > { %5489 = sst [smem:[#allocation25_spill]] %s5566_s14  ;;  %s438_s8 = ssub.s32 %s4534_s18, %s5566_s14 }
  0x2d   : > { %s4727_s10 = scalar_select %p287_p5, %s4518_s29, %s289_s13  }
  0x2e   : > { %p4729_p8 = por %p303_p7, %p302_p6  ;;  %s439_s7 = sor.u32 %s438_s8, %s286_s12 }
  0x2f   : > { %5490 = sst [smem:[#allocation26_spill]] %s4727_s10  ;;  %s442_s27 = sadd.s32 1, %s4506_s26 }
  0x30   : > { %p440_p9 = scmp.eq.s32.totalorder %s439_s7, 0  ;;  %p452_p10 = scmp.ne.s32.totalorder %s4506_s26, %s4502_s25 }
  0x31   : > { %p453_p11 = scmp.eq.s32.totalorder %s3591_s20, 3  ;;  %p458_p12 = scmp.ne.s32.totalorder %s4502_s25, %s4498_s24 }
  0x32   : > { %s4741_s13 = scalar_select %p440_p9, %s4506_s26, %s442_s27  }
  0x33   : > { %p4743_p13 = por %p453_p11, %p452_p10  ;;  %p459_p0 = scmp.eq.s32.totalorder %s3592_s16, 3 }
  0x34   : > { %5492 = sst [smem:[#allocation27_spill]] %s4741_s13  ;;  %p466_p1 = scmp.eq.s32.totalorder %s438_s8, 0 }
  0x35   : > { %s5493_s10 = scalar_select %p4743_p13, 1, 0 }
  0x36   : > { %s468_s14 = sadd.s32 1, %s4494_s23  ;;  %p4748_p2 = por %p459_p0, %p458_p12 }
  0x37   : > { %5494 = sst [smem:[#allocation28_spill]] %s5493_s10  ;;  %p478_p4 = scmp.ne.s32.totalorder %s4494_s23, %s4490_s22 }
  0x38   : > { %s5495_s12 = scalar_select %p4748_p2, 1, 0 }
  0x39   : > { %s4755_s7 = scalar_select %p466_p1, %s4494_s23, %s468_s14  }
  0x3a   : > { %5496 = sst [smem:[#allocation29_spill]] %s5495_s12  ;;  %p4757_p5 = por %p478_p4, %p453_p11 }
  0x3b   : > { %5497 = sst [smem:[#allocation30_spill]] %s4755_s7  ;;  %p484_p6 = scmp.ne.s32.totalorder %s4490_s22, %s4486_s21 }
  0x3c   : > { %s5498_s20 = scalar_select %p4757_p5, 1, 0 }
  0x3d   : > { %p4119_p7 = scmp.lt.s32.totalorder %s4538_s19, 4  ;;  %p4764_p9 = por %p484_p6, %p459_p0 }
  0x3e   : > { %5499 = sst [smem:[#allocation31_spill]] %s5498_s20  ;;  %s570_s8 = sand.u32 1, %s4518_s29  }
  0x3f   : > { %s5500_s27 = scalar_select %p4764_p9, 1, 0 }
  0x40   : > { %s4098_s16 = smul.u32 192, %s570_s8  ;;  %p4772_p10 = pnand %p4119_p7, %p4719_p3 }
  0x41   : > { %5501 = sst [smem:[#allocation32_spill]] %s5500_s27  ;;  %s4099_s18 = smul.u32 3072, %s4530_s17 }
  0x42   : > { %s5503_s9 = sld [smem:[#allocation43_spill]]  ;;  %s574_s23 = scalar_lea.vmem [#allocation3], %s4098_s16 }
  0x43   : > { %s581_s21 = sshll.u32 %s574_s23, 4  ;;  %s571_s12 = scalar_lea.sflag [#allocation4], %s570_s8  ;;  %s582_s21 = int_to_ptr.vmem [resolvable:$true] %s581_s21 }
  0x44   : > { %p4338_p12 = pneg %p4772_p10  ;;  %s4349_s29 = scalar_lea.vmem %s582_s21, 3072 }
  0x45   : > { %p4350_p0 = scmp.ne.s32.totalorder %s582_s21, %s4349_s29  ;;  %s4540_s11 = smov [#allocation3]  }
  0x46   : > { %s4354_s17 = sshll.u32 %s4540_s11, 4  ;;  %s4355_s17 = int_to_ptr.vmem [resolvable:$false] %s4354_s17 }
  0x47   : > { %p4352_p1 = pnand %p4350_p0, %p4338_p12  ;;  %s4356_s27 = scalar_lea.vmem %s4355_s17, 6144 }
  0x48   : > { %s580_s7 = scalar_lea.hbm %s5503_s9, %s4099_s18  ;;  %p4357_p3 = scmp.lt.s32.totalorder %s582_s21, %s4355_s17 }
  0x49   : > { %p4353_p4 = pneg %p4352_p1  ;;  %p4358_p6 = scmp.lt.s32.totalorder %s4356_s27, %s4349_s29 }
  0x4b   : > { %p4359_p7 = por %p4358_p6, %p4357_p3 }
  0x4d   : > { %p4360_p9 = pnand %p4359_p7, %p4353_p4 }
  0x4f   : > { %4363 = shalt.err (!%p4360_p9)
}
  0x50   : > { %s4541_s26 = smov 64   ;;  %s4542_s23 = smov 4  }
  0x51   : > { %4111 = dma.hbm_to_vmem [thread:$0]  (!%p4772_p10), %s580_s7, 3072, %s582_s21, %s571_s12, %s4541_s26, %s4541_s26, %s4542_s23  }
  0x52   : > { %p619_p11 = scmp.lt.s32.totalorder %s4538_s19, 5  ;;  %p5504_p2 = scmp.ge.s32.totalorder %s4538_s19, 1 }
  0x54   : > { %p620_p12 = pnand %p5504_p2, %p619_p11 }
  0x56   : > { %623 = sbr.rel (%p620_p12) target bundleno = 6498 (0x1962), region = 80 }
  0x5b   : > { %s625_s18 = sand.u32 1, %s4514_s28  }
  0x5c   : > { %s4100_s8 = smul.u32 192, %s625_s18  ;;  %s626_s17 = scalar_lea.sflag [#allocation4], %s625_s18 }
  0x5e   : > { %s4788_s29 = scalar_lea.vmem [#allocation3], %s4100_s8 }
  0x5f   : > { %4473 = dma.done.wait (%p4729_p8), %s626_s17, 3072  }
  0x60   : > { %4475 = vsyncadd (%p4729_p8), %s626_s17, 4294964224  ;;  %s5446_s21 = sand.u32 1, %s4502_s25   ;;  %s5445_s13 = sand.u32 1, %s4490_s22  }
  0x61   : > { %s3597_s12 = sshll.u32 %s5446_s21, 3  ;;  %s4800_s7 = sshll.u32 %s5445_s13, 3 }
  0x62   : > { %p736_p2 = scmp.lt.s32.totalorder %s4526_s0, 1  ;;  %p771_p9 = scmp.lt.s32.totalorder %s4522_s30, 1 }
  0x63   : > { %s5505_s23 = sld [smem:[#allocation35_spill]]  ;;  %s4876_s3 = scalar_lea.vmem [#allocation6], %s3597_s12 }
  0x64   : > { %s4805_s27 = scalar_select %p736_p2, %s4526_s0, 1 }
  0x65   : > { %s4808_s15 = scalar_select %p771_p9, %s4522_s30, 1 }
  0x66   : > { %s4811_s16 = sshll.u32 %s4805_s27, 3  ;;  %s3605_s14 = sshll.u32 %s4805_s27, 2 }
  0x67   : > { %s5506_s1 = sld [smem:[#allocation36_spill]]  ;;  %s3744_s10 = sshll.u32 %s4808_s15, 4 }
  0x68   : > { %s5509_s4 = sld [smem:[#allocation39_spill]]  ;;  %s3745_s8 = sshll.u32 %s4808_s15, 5 }
  0x69   : > { %s739_s18 = scalar_lea.vmem %s5505_s23, %s4811_s16  ;;  %s5511_s5 = sld [smem:[#allocation40_spill]] }
  0x6a   : > { %s5516_s26 = sld [smem:[#allocation45_spill]]  ;;  %s4101_s17 = smul.u32 24, %s4808_s15 }
  0x6b   : > { %s5517_s28 = sld [smem:[#allocation46_spill]]  ;;  %p3612_p8 = scmp.ne.s32.totalorder %s4522_s30, 0 }
  0x6c   : > { %s5518_s20 = sld [smem:[#allocation47_spill]] }
  0x6d   : > { %s4822_s13 = scalar_lea.vmem %s5506_s1, %s4811_s16  ;;  %s5513_s1 = sld [smem:[#allocation41_spill]] }
  0x6e   : > { %s4835_s25 = scalar_lea.vmem %s5509_s4, %s3605_s14  ;;  %s735_s4 = scalar_lea.vmem [#allocation7], %s4800_s7 }
  0x6f   : > { %5510 = sst [smem:[#allocation33_spill]] %s4835_s25  ;;  %s4840_s23 = scalar_lea.vmem %s5511_s5, %s3605_s14 }
  0x70   : > { %5512 = sst [smem:[#allocation34_spill]] %s4840_s23  ;;  %s778_s5 = scalar_lea.vmem %s5516_s26, %s4808_s15 }
  0x71   : > { %s5515_s25 = sld [smem:[#allocation44_spill]] }
  0x72   : > { %s4874_s19 = scalar_lea.vmem %s5518_s20, %s4101_s17 }
  0x73   : > { %s767_s0 = scalar_lea.vmem %s5513_s1, %s4805_s27  ;;  %s4869_s1 = scalar_lea.vmem %s5517_s28, %s3745_s8 }
  0x74   : > { %793 = sbr.rel (%p3612_p8) target bundleno = 123 (0x7b), region = 88 }
  0x77   : > { %s4858_s2 = scalar_lea.vmem %s5515_s25, %s3744_s10 }
  0x79   : > { %v794_v0 = vld [vmem:[%s739_s18] sm:$0xff]  ;;  %vm795_vm0 = vcmask 261120  }
  0x7a   : > { %796 = vst.msk [vmem:[#allocation2] sm:$0xff] %vm795_vm0, %v794_v0 }
  0x7b PF: > { %v4243_v1 = vld [vmem:[%s4788_s29 + $0x18] sm:$0xff]   ;;  %v4543_v2 = vmov 0.0   ;;  %v4244_v3 = vld [vmem:[%s4788_s29 + $0x8] sm:$0xff]   ;;  %v4245_v4 = vld [vmem:[%s4788_s29 + $0x10] sm:$0xff]   ;;  %vm4544_vm1 = vmmov 0   ;;  %vm840_vm2 = vcmask 261120   ;;  %v824_v10 = vlaneseq  ;;  %s5519_s10 = scalar_lea.vmem %s5421_s6, %s4805_s27 }
  0x7c   : > { %3846 = vmatprep.subr.bf16.mxu1 %v4543_v2  ;;  %3838 = vmatprep.subr.bf16.mxu0 %v4543_v2  ;;  %v4246_v5 = vld [vmem:[%s4788_s29] sm:$0xff]   ;;  %v4893_v7 = vld [vmem:[%s4822_s13] sm:$0xff]  ;;  %vm1003_vm3 = vcmask 64512   ;;  %s4545_s25 = smov 112   ;;  %s4546_s12 = smov 120   ;;  %v4247_v30 = vld [vmem:[%s4788_s29 + $0x28] sm:$0xff]  }
  0x7d   : > { %3847 = vmatpush3.bf16.msra.mxu1 %v4243_v1  ;;  %3850 = vmatprep.mubr.msk.bf16.mxu1 %vm4544_vm1, %v4543_v2  ;;  %v4907_v11 = vshrl.u32 %v824_v10, 7  ;;  %v4913_v13 = vld [vmem:[%s4874_s19] sm:$0xff]  ;;  %s4547_s18 = smov 104   ;;  %v4248_v31 = vld [vmem:[%s4788_s29 + $0x20] sm:$0xff]   ;;  %vm1073_vm4 = vcmask 1043456   ;;  %s4548_s22 = smov 8  }
  0x7e   : > { %3839 = vmatpush3.bf16.msra.mxu0 %v4244_v3  ;;  %3848 = vmatprep.subr.bf16.mxu1 %v4543_v2  ;;  %v3635_v43 = vld [vmem:[%s5519_s10] ss:$0 sm:$0xff]  ;;  %s4549_s14 = smov 16   ;;  %s4550_s11 = smov 24   ;;  %vm1469_vm5 = vcmask 130048   ;;  %vm1471_vm6 = vcmask 195584  }
  0x7f   : > { %3840 = vmatprep.subr.bf16.mxu0 %v4543_v2  ;;  %3842 = vmatprep.mubr.msk.bf16.mxu0 %vm4544_vm1, %v4543_v2  ;;  %v4910_v12 = vsub.s32 1, %v4907_v11  ;;  %v4916_v14 = vsub.s32 0, %v4907_v11  ;;  %v4964_v50 = vsub.s32 2, %v4907_v11  ;;  %s5520_s17 = sld [smem:[#allocation37_spill]]  ;;  %vm3178_vm7 = vcmask 523264   ;;  %p3731_p10 = scmp.ne.s32.totalorder %s4522_s30, 1 }
  0x80   : > { %s5522_s20 = sld [smem:[#allocation38_spill]] }
  0x81   : > { %v4890_v6 = vld [vmem:[#allocation2] sm:$0xff]  ;;  %3849 = vmatpush3.bf16.msra.mxu1 %v4245_v4  ;;  %v887_v15 = vrot.slane %v4913_v13, %v4910_v12  ;;  %v827_v16 = vrot.slane %v4913_v13, %v4916_v14  ;;  %v944_v51 = vrot.slane %v4913_v13, %v4964_v50 }
  0x82   : > { %v802_v8 = vadd.f32 %v4893_v7, %v4890_v6  ;;  %3841 = vmatpush3.bf16.msra.mxu0 %v4246_v5  ;;  %3862 = vmatprep.subr.bf16.mxu1 %v4543_v2  ;;  %v940_v32 = vpack.c.bf16 %v4890_v6, %v4890_v6 }
  0x83   : > { %3854 = vmatprep.subr.bf16.mxu0 %v4543_v2 }
  0x84   : > { %v823_v9 = vpack.c.bf16 %v802_v8, %v802_v8 }
  0x85   : > { %s5521_s28 = scalar_lea.vmem %s5520_s17, %s4811_s16  ;;  %s5527_s17 = sld [smem:[#allocation42_spill]] }
  0x86   : > { %3851 = vmatmul.mubr.msk.bf16.vlgmr.msra.gmra.mxu1 %vm840_vm2, %v823_v9  ;;  %3843 = vmatmul.mubr.msk.bf16.vlgmr.msra.gmra.mxu0 %vm840_vm2, %v823_v9  ;;  %s5523_s23 = scalar_lea.vmem %s5522_s20, %s4811_s16 }
  0x87   : > { %3864 = vmatprep.mubr.msk.bf16.mxu1 %vm4544_vm1, %v4543_v2  ;;  %3858 = vmatprep.mubr.msk.bf16.mxu0 %vm4544_vm1, %v4543_v2 }
  0x88   : > { %3855 = vmatpush3.bf16.msra.mxu0 %v4247_v30 }
  0x89   : > { %3856 = vmatprep.subr.bf16.mxu0 %v4543_v2 }
  0x8c   : > { %3857 = vmatpush3.bf16.msra.mxu0 %v4248_v31 }
  0x8d   : > { %3868 = vmatprep.subr.bf16.mxu0 %v4543_v2 }
  0x8f   : > { %3859 = vmatmul.mubr.msk.bf16.vlgmr.msra.gmra.mxu0 %vm840_vm2, %v940_v32 }
  0x90   : > { %3870 = vmatprep.mubr.msk.bf16.mxu0 %vm4544_vm1, %v4543_v2 }
 0x146   : > { %v934_v17 = vpop.f32.mrf.mxu1  ;;  %v878_v19 = vpop.f32.mrf.mxu0 }
 0x147   : > { %v935_v18 = vadd.f32 %v934_v17, %v887_v15  ;;  %v879_v20 = vadd.f32 %v878_v19, %v827_v16 }
 0x148   : > { %v3852_v21 = vpop.f32.mrf.mxu1  ;;  %v3844_v23 = vpop.f32.mrf.mxu0 }
 0x149   : > { %v1001_v22 = vpack.c.bf16 %v935_v18, %v935_v18  ;;  %v1000_v25 = vpack.c.bf16 %v879_v20, %v879_v20 }
 0x14a   : > { %v937_v24 = vpop.f32.mrf.mxu1  ;;  %v881_v26 = vpop.f32.mrf.mxu0 }
 0x14b   : > { %1234 = vrot.lane.b32.xlu1 %v1001_v22, %s4545_s25  ;;  %1121 = vrot.lane.b32.xlu0 %v1001_v22, %s4546_s12  ;;  %v1008_v27 = vsel %vm1003_vm3, %v1001_v22, 0 }
 0x14c   : > { %v3853_v28 = vpop.f32.mrf.mxu1  ;;  %3863 = vmatpush3.bf16.xpose.msra.mxu1 %v1008_v27  ;;  %v3845_v29 = vpop.f32.mrf.mxu0 }
 0x14d   : > { %3874 = vmatprep.subr.bf16.mxu1 %v4543_v2 }
 0x14f   : > { %1232 = vrot.lane.b32.xlu1 %v1000_v25, %s4545_s25  ;;  %1118 = vrot.lane.b32.xlu0 %v1000_v25, %s4546_s12  ;;  %v994_v52 = vpop.f32.mrf.mxu0 }
 0x150   : > { %v995_v53 = vadd.f32 %v994_v52, %v944_v51 }
 0x151   : > { %v3860_v54 = vpop.f32.mrf.mxu0 }
 0x152   : > { %v4968_v55 = vpack.c.bf16 %v995_v53, %v995_v53 }
 0x153   : > { %1344 = vrot.lane.b32.xlu1 %v1000_v25, %s4547_s18  ;;  %1346 = vrot.lane.b32.xlu0 %v1001_v22, %s4547_s18  ;;  %v997_v56 = vpop.f32.mrf.mxu0 }
 0x154   : > { %3865 = vmatmul.mubr.msk.bf16.vlgmr.msra.gmra.mxu1 %vm1003_vm3, %v1000_v25  ;;  %v1075_v57 = vsel %vm1073_vm4, %v4968_v55, 0 }
 0x155   : > { %3876 = vmatprep.mubr.msk.bf16.mxu1 %vm4544_vm1, %v4543_v2  ;;  %v3861_v58 = vpop.f32.mrf.mxu0  ;;  %3869 = vmatpush3.bf16.msra.mxu0 %v1075_v57 }
 0x156   : > { %3880 = vmatprep.subr.bf16.mxu0 %v4543_v2 }
 0x1bd   : > { %v1122_v33 = vpop.permute.xlu0 %1121  ;;  %v1235_v35 = vpop.permute.xlu1 %1234 }
 0x1be   : > { %v1127_v34 = vsel %vm1003_vm3, %v1122_v33, 0  ;;  %v1240_v37 = vsel %vm1003_vm3, %v1235_v35, 0 }
 0x1bf   : > { %3875 = vmatpush3.bf16.xpose.msra.mxu1 %v1127_v34 }
 0x1c0   : > { %3886 = vmatprep.subr.bf16.mxu1 %v4543_v2 }
 0x1c1   : > { %v1119_v36 = vpop.permute.xlu0 %1118  ;;  %v1233_v39 = vpop.permute.xlu1 %1232 }
 0x1c5   : > { %v1347_v38 = vpop.permute.xlu0 %1346  ;;  %v1345_v41 = vpop.permute.xlu1 %1344 }
 0x1c6   : > { %3877 = vmatmul.mubr.msk.bf16.vlgmr.msra.gmra.mxu1 %vm1003_vm3, %v1119_v36  ;;  %v1352_v40 = vsel %vm1003_vm3, %v1347_v38, 0 }
 0x1c7   : > { %3887 = vmatpush3.bf16.xpose.msra.mxu1 %v1240_v37  ;;  %3888 = vmatprep.mubr.msk.bf16.mxu1 %vm4544_vm1, %v4543_v2 }
 0x1c8   : > { %3898 = vmatprep.subr.bf16.mxu1 %v4543_v2 }
 0x1ce   : > { %3889 = vmatmul.mubr.msk.bf16.vlgmr.msra.gmra.mxu1 %vm1003_vm3, %v1233_v39 }
 0x1cf   : > { %3899 = vmatpush3.bf16.xpose.msra.mxu1 %v1352_v40  ;;  %3900 = vmatprep.mubr.msk.bf16.mxu1 %vm4544_vm1, %v4543_v2 }
 0x1d0   : > { %3910 = vmatprep.subr.bf16.mxu1 %v4543_v2 }
 0x1d6   : > { %3901 = vmatmul.mubr.msk.bf16.vlgmr.msra.gmra.mxu1 %vm1003_vm3, %v1345_v41 }
 0x1d7   : > { %3914 = vmatprep.mubr.msk.bf16.mxu1 %vm4544_vm1, %v4543_v2 }
 0x214   : > { %v1044_v42 = vpop.f32.mrf.mxu1 }
 0x215   : > { %v1050_v44 = vmul.f32 0.35355338, %v1044_v42 }
 0x216   : > { %v3866_v45 = vpop.f32.mrf.mxu1 }
 0x217   : > { %v1057_v46 = vadd.f32 %v3635_v43, %v1050_v44 }
 0x218   : > { %v1047_v47 = vpop.f32.mrf.mxu1 }
 0x219   : > { %v1058_v48 = vsel %vm1003_vm3, %v1057_v46, -inf }
 0x21a   : > { %1059 = vmax.xlane.f32.xlu0 %v1058_v48  ;;  %v3867_v49 = vpop.f32.mrf.mxu1 }
 0x286   : > { %v1163_v59 = vpop.f32.mrf.mxu1 }
 0x287   : > { %v1169_v60 = vmul.f32 0.35355338, %v1163_v59 }
 0x288   : > { %v3878_v61 = vpop.f32.mrf.mxu1 }
 0x289   : > { %v1170_v62 = vadd.f32 %v3635_v43, %v1169_v60 }
 0x28a   : > { %v1166_v63 = vpop.f32.mrf.mxu1 }
 0x28b   : > { %v1171_v0 = vsel %vm1003_vm3, %v1170_v62, -inf }
 0x28c   : > { %1172 = vmax.xlane.f32.xlu1 %v1171_v0  ;;  %v3879_v1 = vpop.f32.mrf.mxu1 }
 0x28e   : > { %v1276_v3 = vpop.f32.mrf.mxu1 }
 0x28f   : > { %v1282_v4 = vmul.f32 0.35355338, %v1276_v3 }
 0x290   : > { %v3890_v5 = vpop.f32.mrf.mxu1 }
 0x291   : > { %v1283_v8 = vadd.f32 %v3635_v43, %v1282_v4 }
 0x292   : > { %v1279_v9 = vpop.f32.mrf.mxu1 }
 0x293   : > { %v1284_v10 = vsel %vm1003_vm3, %v1283_v8, -inf  ;;  %v4249_v9 = vld [vmem:[%s4788_s29 + $0x38] sm:$0xff]  }
 0x294   : > { %1285 = vmax.xlane.f32.xlu0 %v1284_v10  ;;  %v3891_v15 = vpop.f32.mrf.mxu1  ;;  %3911 = vmatpush3.bf16.msra.mxu1 %v4249_v9 }
 0x295   : > { %3912 = vmatprep.subr.bf16.mxu1 %v4543_v2 }
 0x296   : > { %v1388_v16 = vpop.f32.mrf.mxu1 }
 0x297   : > { %v1394_v17 = vmul.f32 0.35355338, %v1388_v16  ;;  %v4250_v16 = vld [vmem:[%s4788_s29 + $0x30] sm:$0xff]  }
 0x298   : > { %v3902_v18 = vpop.f32.mrf.mxu1  ;;  %3913 = vmatpush3.bf16.msra.mxu1 %v4250_v16 }
 0x299   : > { %v1395_v19 = vadd.f32 %v3635_v43, %v1394_v17  ;;  %3926 = vmatprep.subr.bf16.mxu1 %v4543_v2 }
 0x29a   : > { %v1391_v20 = vpop.f32.mrf.mxu1 }
 0x29b   : > { %v1396_v21 = vsel %vm1003_vm3, %v1395_v19, -inf }
 0x29c   : > { %1397 = vmax.xlane.f32.xlu0 %v1396_v21  ;;  %v3903_v22 = vpop.f32.mrf.mxu1 }
 0x2a3   : > { %v1060_v23 = vpop.xlane.xlu0 %1059 }
 0x2a4   : > { %v1061_v24 = vsub.f32 %v1057_v46, %v1060_v23 }
 0x2a6   : > { %v1062_v25 = vmul.f32 1.442695, %v1061_v24 }
 0x2a8   : > { %4275 = vpow2.f32 %v1062_v25 }
 0x2b5   : > { %v4276_v26 = vpop.eup %4275 }
 0x2b6   : > { %v1064_v27 = vsel %vm1003_vm3, %v4276_v26, 0.0 }
 0x2b7   : > { %1065 = vadd.xlane.f32.xlu1 %v1064_v27 }
 0x2c8   : > { %1184 = vrot.lane.b32.xlu1 %v4968_v55, %s4546_s12 }
 0x315   : > { %v1173_v28 = vpop.xlane.xlu1 %1172 }
 0x316   : > { %v1174_v29 = vsub.f32 %v1170_v62, %v1173_v28 }
 0x318   : > { %v1175_v30 = vmul.f32 1.442695, %v1174_v29 }
 0x31a   : > { %4277 = vpow2.f32 %v1175_v30 }
 0x31d   : > { %v1286_v31 = vpop.xlane.xlu0 %1285 }
 0x31e   : > { %v1287_v32 = vsub.f32 %v1283_v8, %v1286_v31 }
 0x320   : > { %v1288_v33 = vmul.f32 1.442695, %v1287_v32 }
 0x322   : > { %4279 = vpow2.f32 %v1288_v33 }
 0x325   : > { %v1398_v34 = vpop.xlane.xlu0 %1397 }
 0x326   : > { %v1399_v35 = vsub.f32 %v1395_v19, %v1398_v34  ;;  %v5018_v34 = vsub.s32 3, %v4907_v11 }
 0x327   : > { %v4278_v36 = vpop.eup %4277 }
 0x328   : > { %v1400_v37 = vmul.f32 1.442695, %v1399_v35  ;;  %v1177_v38 = vsel %vm1003_vm3, %v4278_v36, 0.0  ;;  %v1477_v35 = vrot.slane %v4913_v13, %v5018_v34 }
 0x329   : > { %1178 = vadd.xlane.f32.xlu0 %v1177_v38 }
 0x32a   : > { %4281 = vpow2.f32 %v1400_v37 }
 0x32f   : > { %v4280_v39 = vpop.eup %4279 }
 0x330   : > { %v1290_v40 = vsel %vm1003_vm3, %v4280_v39, 0.0 }
 0x331   : > { %1291 = vadd.xlane.f32.xlu1 %v1290_v40 }
 0x337   : > { %v4282_v41 = vpop.eup %4281 }
 0x338   : > { %v1402_v42 = vsel %vm1003_vm3, %v4282_v41, 0.0 }
 0x339   : > { %1403 = vadd.xlane.f32.xlu0 %v1402_v42 }
 0x340   : > { %v1066_v43 = vpop.xlane.xlu1 %1065 }
 0x341   : > { %4283 = vrcp.f32 %v1066_v43  ;;  %v4251_v43 = vld [vmem:[%s4788_s29 + $0x58] sm:$0xff]  }
 0x342   : > { %1408 = vrot.lane.b32.xlu1 %v4968_v55, %s4547_s18 }
 0x344   : > { %v1185_v45 = vpop.permute.xlu1 %1184 }
 0x345   : > { %v1190_v48 = vsel %vm1073_vm4, %v1185_v45, 0 }
 0x34e   : > { %v4284_v44 = vpop.eup %4283 }
 0x34f   : > { %1296 = vrot.lane.b32.xlu0 %v4968_v55, %s4545_s25  ;;  %v1068_v46 = vmul.f32 %v4284_v44, %v4276_v26 }
 0x351   : > { %v1069_v47 = vpack.c.bf16 %v1068_v46, %v1068_v46 }
 0x353   : > { %3871 = vmatmul.mubr.msk.bf16.vlgmr.msra.gmra.mxu0 %vm1003_vm3, %v1069_v47 }
 0x354   : > { %3881 = vmatpush3.bf16.msra.mxu0 %v1190_v48  ;;  %3882 = vmatprep.mubr.msk.bf16.mxu0 %vm4544_vm1, %v4543_v2 }
 0x355   : > { %3892 = vmatprep.subr.bf16.mxu0 %v4543_v2 }
 0x3b2   : > { %v1179_v49 = vpop.xlane.xlu0 %1178 }
 0x3b3   : > { %4285 = vrcp.f32 %v1179_v49  ;;  %v4253_v49 = vld [vmem:[%s5521_s28] sm:$0xff]   ;;  %s5528_s28 = scalar_lea.vmem %s5527_s17, %s4805_s27 }
 0x3ba   : > { %v1292_v51 = vpop.xlane.xlu1 %1291 }
 0x3bb   : > { %4287 = vrcp.f32 %v1292_v51  ;;  %v4254_v51 = vld [vmem:[%s4788_s29 + $0x48] sm:$0xff]  }
 0x3be   : > { %v1409_v60 = vpop.permute.xlu1 %1408 }
 0x3bf   : > { %v1414_v62 = vsel %vm1073_vm4, %v1409_v60, 0 }
 0x3c0   : > { %v4286_v52 = vpop.eup %4285 }
 0x3c1   : > { %v1181_v53 = vmul.f32 %v4286_v52, %v4278_v36  ;;  %v4255_v52 = vld [vmem:[%s4788_s29 + $0x40] sm:$0xff]  }
 0x3c2   : > { %v1404_v54 = vpop.xlane.xlu0 %1403 }
 0x3c3   : > { %4289 = vrcp.f32 %v1404_v54  ;;  %v1182_v55 = vpack.c.bf16 %v1181_v53, %v1181_v53 }
 0x3c5   : > { %3883 = vmatmul.mubr.msk.bf16.vlgmr.msra.gmra.mxu0 %vm1003_vm3, %v1182_v55 }
 0x3c6   : > { %v1297_v56 = vpop.permute.xlu0 %1296  ;;  %3894 = vmatprep.mubr.msk.bf16.mxu0 %vm4544_vm1, %v4543_v2 }
 0x3c7   : > { %v1302_v57 = vsel %vm1073_vm4, %v1297_v56, 0  ;;  %v5042_v56 = vsub.s32 4, %v4907_v11 }
 0x3c8   : > { %v4288_v58 = vpop.eup %4287  ;;  %3893 = vmatpush3.bf16.msra.mxu0 %v1302_v57  ;;  %v5045_v57 = vld [vmem:[%s4874_s19 + $0x8] sm:$0xff] }
 0x3c9   : > { %3904 = vmatprep.subr.bf16.mxu0 %v4543_v2  ;;  %v1294_v59 = vmul.f32 %v4288_v58, %v4280_v39  ;;  %v1555_v58 = vsub.s32 5, %v4907_v11 }
 0x3cb   : > { %v1295_v61 = vpack.c.bf16 %v1294_v59, %v1294_v59  ;;  %v1551_v59 = vrot.slane %v5045_v57, %v5042_v56 }
 0x3cd   : > { %3895 = vmatmul.mubr.msk.bf16.vlgmr.msra.gmra.mxu0 %vm1003_vm3, %v1295_v61 }
 0x3ce   : > { %3905 = vmatpush3.bf16.msra.mxu0 %v1414_v62  ;;  %3906 = vmatprep.mubr.msk.bf16.mxu0 %vm4544_vm1, %v4543_v2  ;;  %v1556_v62 = vrot.slane %v5045_v57, %v1555_v58 }
 0x3cf   : > { %3918 = vmatprep.subr.bf16.mxu0 %v4543_v2 }
 0x3d0   : > { %v4290_v63 = vpop.eup %4289 }
 0x3d1   : > { %v1406_v0 = vmul.f32 %v4290_v63, %v4282_v41 }
 0x3d3   : > { %v1407_v1 = vpack.c.bf16 %v1406_v0, %v1406_v0 }
 0x3d5   : > { %3907 = vmatmul.mubr.msk.bf16.vlgmr.msra.gmra.mxu0 %vm1003_vm3, %v1407_v1 }
 0x3d6   : > { %3922 = vmatprep.mubr.msk.bf16.mxu0 %vm4544_vm1, %v4543_v2  ;;  %3919 = vmatpush3.bf16.msra.mxu0 %v4254_v51 }
 0x3d7   : > { %3920 = vmatprep.subr.bf16.mxu0 %v4543_v2 }
 0x3da   : > { %3921 = vmatpush3.bf16.msra.mxu0 %v4255_v52 }
 0x3db   : > { %3934 = vmatprep.subr.bf16.mxu0 %v4543_v2 }
 0x413   : > { %v1111_v3 = vpop.f32.mrf.mxu0 }
 0x415   : > { %v3872_v4 = vpop.f32.mrf.mxu0 }
 0x416   : > { %v1647_v4 = vrot.slane %v4913_v13, %v1555_v58 }
 0x417   : > { %v1114_v5 = vpop.f32.mrf.mxu0 }
 0x419   : > { %v3873_v8 = vpop.f32.mrf.mxu0 }
 0x485   : > { %v1226_v10 = vpop.f32.mrf.mxu0 }
 0x486   : > { %1457 = vrot.lane.b32.xlu1 %v1226_v10, %s4548_s22 }
 0x487   : > { %v3884_v15 = vpop.f32.mrf.mxu0 }
 0x489   : > { %v1229_v17 = vpop.f32.mrf.mxu0 }
 0x48b   : > { %v3885_v18 = vpop.f32.mrf.mxu0 }
 0x48d   : > { %v1338_v19 = vpop.f32.mrf.mxu0 }
 0x48e   : > { %1461 = vrot.lane.b32.xlu0 %v1338_v19, %s4549_s14 }
 0x48f   : > { %v3896_v20 = vpop.f32.mrf.mxu0 }
 0x491   : > { %v1341_v21 = vpop.f32.mrf.mxu0 }
 0x493   : > { %v3897_v22 = vpop.f32.mrf.mxu0 }
 0x495   : > { %v1450_v23 = vpop.f32.mrf.mxu0 }
 0x496   : > { %1465 = vrot.lane.b32.xlu1 %v1450_v23, %s4550_s11 }
 0x497   : > { %v3908_v24 = vpop.f32.mrf.mxu0 }
 0x499   : > { %v1453_v25 = vpop.f32.mrf.mxu0 }
 0x49b   : > { %v3909_v26 = vpop.f32.mrf.mxu0 }
 0x4f8   : > { %v1458_v27 = vpop.permute.xlu1 %1457 }
 0x4f9   : > { %v1468_v29 = vsel %vm1003_vm3, %v1111_v3, %v1458_v27  ;;  %v4256_v27 = vld [vmem:[%s4788_s29 + $0x68] sm:$0xff]  }
 0x500   : > { %v1462_v28 = vpop.permute.xlu0 %1461 }
 0x501   : > { %v1470_v30 = vsel %vm1469_vm5, %v1468_v29, %v1462_v28  ;;  %v4257_v28 = vld [vmem:[%s4788_s29 + $0x60] sm:$0xff]   ;;  %v4258_v29 = vld [vmem:[%s5523_s23] sm:$0xff]  }
 0x508   : > { %v1466_v31 = vpop.permute.xlu1 %1465 }
 0x509   : > { %v1472_v32 = vsel %vm1471_vm6, %v1470_v30, %v1466_v31 }
 0x50a   : > { %v1473_v33 = vpack.c.bf16 %v1472_v32, %v1472_v32 }
 0x50c   : > { %3915 = vmatmul.mubr.msk.bf16.vlgmr.msra.gmra.mxu1 %vm840_vm2, %v1473_v33 }
 0x50d   : > { %3930 = vmatprep.mubr.msk.bf16.mxu1 %vm4544_vm1, %v4543_v2  ;;  %3927 = vmatpush3.bf16.msra.mxu1 %v4251_v43 }
 0x50e   : > { %3928 = vmatprep.subr.bf16.mxu1 %v4543_v2 }
 0x5cc   : > { %v1527_v36 = vpop.f32.mrf.mxu1 }
 0x5cd   : > { %v1528_v37 = vadd.f32 %v1527_v36, %v1477_v35 }
 0x5ce   : > { %v3916_v38 = vpop.f32.mrf.mxu1 }
 0x5cf   : > { %v1533_v39 = vadd.f32 %v1528_v37, %v4890_v6  ;;  %v4252_v6 = vld [vmem:[%s4788_s29 + $0x50] sm:$0xff]  }
 0x5d0   : > { %v1530_v40 = vpop.f32.mrf.mxu1  ;;  %3929 = vmatpush3.bf16.msra.mxu1 %v4252_v6 }
 0x5d1   : > { %v1534_v41 = vsel %vm840_vm2, %v1533_v39, 0.0  ;;  %3942 = vmatprep.subr.bf16.mxu1 %v4543_v2 }
 0x5d2   : > { %1535 = vadd.xlane.f32.xlu0 %v1534_v41  ;;  %v3917_v42 = vpop.f32.mrf.mxu1 }
 0x5d3   : > { %3931 = vmatmul.mubr.msk.bf16.vlgmr.msra.gmra.mxu1 %vm840_vm2, %v4253_v49 }
 0x5d4   : > { %3944 = vmatprep.mubr.msk.bf16.mxu1 %vm4544_vm1, %v4543_v2 }
 0x65b   : > { %v1536_v44 = vpop.xlane.xlu0 %1535 }
 0x65c   : > { %v1538_v45 = vmul.f32 0.03125, %v1536_v44 }
 0x65e   : > { %v1539_v46 = vsub.f32 %v1533_v39, %v1538_v45  ;;  %v3674_v39 = vld [vmem:[%s767_s0] ss:$0 sm:$0xff]  ;;  %s5525_s0 = sld [smem:[#allocation33_spill]] }
 0x660   : > { %v1540_v47 = vmul.f32 %v1539_v46, %v1539_v46 }
 0x662   : > { %v1541_v48 = vsel %vm840_vm2, %v1540_v47, 0.0 }
 0x663   : > { %1542 = vadd.xlane.f32.xlu1 %v1541_v48 }
 0x693   : > { %v1702_v5 = vpop.f32.mrf.mxu1 }
 0x694   : > { %v1703_v9 = vadd.f32 %v1702_v5, %v1647_v4 }
 0x695   : > { %v3932_v8 = vpop.f32.mrf.mxu1 }
 0x697   : > { %v1705_v10 = vpop.f32.mrf.mxu1 }
 0x698   : > { %v1706_v15 = vadd.f32 %v1705_v10, %v1647_v4 }
 0x699   : > { %v3933_v16 = vpop.f32.mrf.mxu1 }
 0x69a   : > { %v1775_v17 = vpack.c.bf16 %v1706_v15, %v1703_v9 }
 0x69c   : > { %1890 = vrot.lane.b32.xlu0 %v1775_v17, %s4546_s12  ;;  %v1781_v18 = vsel %vm1003_vm3, %v1775_v17, 0 }
 0x69d   : > { %3943 = vmatpush3.bf16.xpose.msra.mxu1 %v1781_v18 }
 0x69e   : > { %3954 = vmatprep.subr.bf16.mxu1 %v4543_v2 }
 0x6a0   : > { %2001 = vrot.lane.b32.xlu0 %v1775_v17, %s4545_s25 }
 0x6a4   : > { %2111 = vrot.lane.b32.xlu0 %v1775_v17, %s4547_s18 }
 0x6ec   : > { %v1543_v53 = vpop.xlane.xlu1 %1542 }
 0x6ed   : > { %v1544_v54 = vmul.f32 0.03125, %v1543_v53 }
 0x6ef   : > { %v1545_v55 = vadd.f32 1e-05, %v1544_v54 }
 0x6f1   : > { %4291 = vrsqrt.f32 %v1545_v55 }
 0x6fe   : > { %v4292_v60 = vpop.eup %4291 }
 0x6ff   : > { %v1547_v61 = vmul.f32 %v4292_v60, %v1539_v46  ;;  %v1711_v46 = vsub.s32 6, %v4907_v11 }
 0x701   : > { %v1552_v63 = vmul.f32 %v1551_v59, %v1547_v61  ;;  %v1712_v47 = vrot.slane %v4913_v13, %v1711_v46 }
 0x703   : > { %v5051_v0 = vadd.f32 %v1556_v62, %v1552_v63 }
 0x705   : > { %v1558_v1 = vadd.f32 %v5051_v0, %v4893_v7  ;;  %v1588_v7 = vrot.slane %v4913_v13, %v5042_v56 }
 0x707   : > { %v1584_v3 = vpack.c.bf16 %v1558_v1, %v1558_v1 }
 0x709   : > { %3923 = vmatmul.mubr.msk.bf16.vlgmr.msra.gmra.mxu0 %vm840_vm2, %v1584_v3 }
 0x70a   : > { %3938 = vmatprep.mubr.msk.bf16.mxu0 %vm4544_vm1, %v4543_v2  ;;  %3935 = vmatpush3.bf16.msra.mxu0 %v4256_v27 }
 0x70b   : > { %3936 = vmatprep.subr.bf16.mxu0 %v4543_v2 }
 0x70e   : > { %v1891_v22 = vpop.permute.xlu0 %1890  ;;  %3937 = vmatpush3.bf16.msra.mxu0 %v4257_v28 }
 0x70f   : > { %v1896_v24 = vsel %vm1003_vm3, %v1891_v22, 0  ;;  %3948 = vmatprep.subr.bf16.mxu0 %v4543_v2 }
 0x711   : > { %3939 = vmatmul.mubr.msk.bf16.vlgmr.msra.gmra.mxu0 %vm840_vm2, %v4258_v29 }
 0x712   : > { %3950 = vmatprep.mubr.msk.bf16.mxu0 %vm4544_vm1, %v4543_v2  ;;  %v2002_v30 = vpop.permute.xlu0 %2001 }
 0x713   : > { %v2007_v32 = vsel %vm1003_vm3, %v2002_v30, 0 }
 0x716   : > { %v2112_v33 = vpop.permute.xlu0 %2111 }
 0x717   : > { %v2117_v36 = vsel %vm1003_vm3, %v2112_v33, 0 }
 0x7c9   : > { %v1638_v19 = vpop.f32.mrf.mxu0 }
 0x7ca   : > { %v1639_v20 = vadd.f32 %v1638_v19, %v1588_v7 }
 0x7cb   : > { %v3924_v21 = vpop.f32.mrf.mxu0 }
 0x7cc   : > { %v1774_v23 = vpack.c.bf16 %v1639_v20, %v1639_v20 }
 0x7cd   : > { %v1641_v25 = vpop.f32.mrf.mxu0 }
 0x7ce   : > { %1887 = vrot.lane.b32.xlu1 %v1774_v23, %s4546_s12  ;;  %3945 = vmatmul.mubr.msk.bf16.vlgmr.msra.gmra.mxu1 %vm1003_vm3, %v1774_v23 }
 0x7cf   : > { %v3925_v26 = vpop.f32.mrf.mxu0  ;;  %3955 = vmatpush3.bf16.xpose.msra.mxu1 %v1896_v24  ;;  %3956 = vmatprep.mubr.msk.bf16.mxu1 %vm4544_vm1, %v4543_v2 }
 0x7d0   : > { %3966 = vmatprep.subr.bf16.mxu1 %v4543_v2 }
 0x7d1   : > { %v1767_v48 = vpop.f32.mrf.mxu0 }
 0x7d2   : > { %1999 = vrot.lane.b32.xlu1 %v1774_v23, %s4545_s25  ;;  %v1768_v49 = vadd.f32 %v1767_v48, %v1712_v47 }
 0x7d3   : > { %v3940_v6 = vpop.f32.mrf.mxu0 }
 0x7d5   : > { %v1770_v51 = vpop.f32.mrf.mxu0 }
 0x7d6   : > { %2109 = vrot.lane.b32.xlu1 %v1774_v23, %s4547_s18  ;;  %v1771_v52 = vadd.f32 %v1770_v51, %v1712_v47 }
 0x7d7   : > { %v3941_v53 = vpop.f32.mrf.mxu0 }
 0x7d8   : > { %v1776_v54 = vpack.c.bf16 %v1771_v52, %v1768_v49 }
 0x7da   : > { %3949 = vmatpush3.bf16.msra.mxu0 %v1776_v54 }
 0x7db   : > { %3960 = vmatprep.subr.bf16.mxu0 %v4543_v2 }
 0x840   : > { %v1888_v31 = vpop.permute.xlu1 %1887 }
 0x841   : > { %3957 = vmatmul.mubr.msk.bf16.vlgmr.msra.gmra.mxu1 %vm1003_vm3, %v1888_v31 }
 0x842   : > { %3967 = vmatpush3.bf16.xpose.msra.mxu1 %v2007_v32  ;;  %3968 = vmatprep.mubr.msk.bf16.mxu1 %vm4544_vm1, %v4543_v2 }
 0x843   : > { %3978 = vmatprep.subr.bf16.mxu1 %v4543_v2 }
 0x844   : > { %v2000_v35 = vpop.permute.xlu1 %1999 }
 0x848   : > { %v2110_v37 = vpop.permute.xlu1 %2109 }
 0x849   : > { %3969 = vmatmul.mubr.msk.bf16.vlgmr.msra.gmra.mxu1 %vm1003_vm3, %v2000_v35 }
 0x84a   : > { %3979 = vmatpush3.bf16.xpose.msra.mxu1 %v2117_v36  ;;  %3980 = vmatprep.mubr.msk.bf16.mxu1 %vm4544_vm1, %v4543_v2 }
 0x84b   : > { %3990 = vmatprep.subr.bf16.mxu1 %v4543_v2 }
 0x851   : > { %3981 = vmatmul.mubr.msk.bf16.vlgmr.msra.gmra.mxu1 %vm1003_vm3, %v2110_v37 }
 0x852   : > { %3994 = vmatprep.mubr.msk.bf16.mxu1 %vm4544_vm1, %v4543_v2 }
 0x88e   : > { %v1817_v38 = vpop.f32.mrf.mxu1 }
 0x88f   : > { %v1823_v40 = vmul.f32 0.35355338, %v1817_v38 }
 0x890   : > { %v3946_v41 = vpop.f32.mrf.mxu1 }
 0x891   : > { %v1830_v42 = vadd.f32 %v3674_v39, %v1823_v40 }
 0x892   : > { %v1820_v43 = vpop.f32.mrf.mxu1 }
 0x893   : > { %v1831_v44 = vsel %vm1469_vm5, %v1830_v42, -inf }
 0x894   : > { %1832 = vmax.xlane.f32.xlu0 %v1831_v44  ;;  %v3947_v45 = vpop.f32.mrf.mxu1 }
 0x901   : > { %v1932_v55 = vpop.f32.mrf.mxu1 }
 0x902   : > { %v1938_v58 = vmul.f32 0.35355338, %v1932_v55 }
 0x903   : > { %v3958_v59 = vpop.f32.mrf.mxu1 }
 0x904   : > { %v1939_v60 = vadd.f32 %v3674_v39, %v1938_v58 }
 0x905   : > { %v1935_v61 = vpop.f32.mrf.mxu1 }
 0x906   : > { %v1940_v62 = vsel %vm1469_vm5, %v1939_v60, -inf }
 0x907   : > { %1941 = vmax.xlane.f32.xlu1 %v1940_v62  ;;  %v3959_v63 = vpop.f32.mrf.mxu1 }
 0x909   : > { %v2043_v1 = vpop.f32.mrf.mxu1 }
 0x90a   : > { %v2049_v3 = vmul.f32 0.35355338, %v2043_v1 }
 0x90b   : > { %v3970_v4 = vpop.f32.mrf.mxu1 }
 0x90c   : > { %v2050_v5 = vadd.f32 %v3674_v39, %v2049_v3 }
 0x90d   : > { %v2046_v8 = vpop.f32.mrf.mxu1 }
 0x90e   : > { %v2051_v9 = vsel %vm1469_vm5, %v2050_v5, -inf  ;;  %v4259_v8 = vld [vmem:[%s4788_s29 + $0x78] sm:$0xff]  }
 0x90f   : > { %2052 = vmax.xlane.f32.xlu0 %v2051_v9  ;;  %v3971_v10 = vpop.f32.mrf.mxu1  ;;  %3991 = vmatpush3.bf16.msra.mxu1 %v4259_v8 }
 0x910   : > { %3992 = vmatprep.subr.bf16.mxu1 %v4543_v2 }
 0x911   : > { %v2153_v15 = vpop.f32.mrf.mxu1 }
 0x912   : > { %v2159_v16 = vmul.f32 0.35355338, %v2153_v15  ;;  %v4260_v15 = vld [vmem:[%s4788_s29 + $0x70] sm:$0xff]  }
 0x913   : > { %v3982_v17 = vpop.f32.mrf.mxu1  ;;  %3993 = vmatpush3.bf16.msra.mxu1 %v4260_v15  ;;  %v2346_v15 = vrot.slane %v5045_v57, %v4916_v14 }
 0x914   : > { %v2160_v18 = vadd.f32 %v3674_v39, %v2159_v16  ;;  %4006 = vmatprep.subr.bf16.mxu1 %v4543_v2 }
 0x915   : > { %v2156_v7 = vpop.f32.mrf.mxu1 }
 0x916   : > { %v2161_v19 = vsel %vm1469_vm5, %v2160_v18, -inf }
 0x917   : > { %2162 = vmax.xlane.f32.xlu0 %v2161_v19  ;;  %v3983_v20 = vpop.f32.mrf.mxu1 }
 0x91d   : > { %v1833_v21 = vpop.xlane.xlu0 %1832 }
 0x91e   : > { %v1834_v22 = vsub.f32 %v1830_v42, %v1833_v21 }
 0x920   : > { %v1835_v23 = vmul.f32 1.442695, %v1834_v22 }
 0x922   : > { %4293 = vpow2.f32 %v1835_v23 }
 0x92f   : > { %v4294_v24 = vpop.eup %4293 }
 0x930   : > { %v1837_v25 = vsel %vm1469_vm5, %v4294_v24, 0.0 }
 0x931   : > { %1838 = vadd.xlane.f32.xlu1 %v1837_v25 }
 0x942   : > { %1953 = vrot.lane.b32.xlu1 %v1776_v54, %s4546_s12 }
 0x990   : > { %v1942_v26 = vpop.xlane.xlu1 %1941 }
 0x991   : > { %v1943_v27 = vsub.f32 %v1939_v60, %v1942_v26 }
 0x993   : > { %v1944_v28 = vmul.f32 1.442695, %v1943_v27 }
 0x995   : > { %4295 = vpow2.f32 %v1944_v28 }
 0x998   : > { %v2053_v29 = vpop.xlane.xlu0 %2052 }
 0x999   : > { %v2054_v30 = vsub.f32 %v2050_v5, %v2053_v29 }
 0x99b   : > { %v2055_v31 = vmul.f32 1.442695, %v2054_v30 }
 0x99d   : > { %4297 = vpow2.f32 %v2055_v31 }
 0x9a0   : > { %v2163_v32 = vpop.xlane.xlu0 %2162 }
 0x9a1   : > { %v2164_v33 = vsub.f32 %v2160_v18, %v2163_v32  ;;  %v2237_v32 = vsub.s32 7, %v4907_v11  ;;  %v2405_v11 = vrot.slane %v5045_v57, %v4910_v12 }
 0x9a2   : > { %v4296_v35 = vpop.eup %4295 }
 0x9a3   : > { %v2165_v36 = vmul.f32 1.442695, %v2164_v33  ;;  %v1946_v37 = vsel %vm1469_vm5, %v4296_v35, 0.0  ;;  %v2238_v33 = vrot.slane %v4913_v13, %v2237_v32 }
 0x9a4   : > { %1947 = vadd.xlane.f32.xlu0 %v1946_v37 }
 0x9a5   : > { %4299 = vpow2.f32 %v2165_v36 }
 0x9aa   : > { %v4298_v38 = vpop.eup %4297 }
 0x9ab   : > { %v2057_v39 = vsel %vm1469_vm5, %v4298_v38, 0.0 }
 0x9ac   : > { %2058 = vadd.xlane.f32.xlu1 %v2057_v39 }
 0x9b2   : > { %v4300_v40 = vpop.eup %4299 }
 0x9b3   : > { %v2167_v41 = vsel %vm1469_vm5, %v4300_v40, 0.0 }
 0x9b4   : > { %2168 = vadd.xlane.f32.xlu0 %v2167_v41 }
 0x9ba   : > { %v1839_v42 = vpop.xlane.xlu1 %1838 }
 0x9bb   : > { %4301 = vrcp.f32 %v1839_v42 }
 0x9bd   : > { %2173 = vrot.lane.b32.xlu1 %v1776_v54, %s4547_s18 }
 0x9be   : > { %v1954_v47 = vpop.permute.xlu1 %1953 }
 0x9c8   : > { %v4302_v43 = vpop.eup %4301 }
 0x9c9   : > { %v1841_v44 = vmul.f32 %v4302_v43, %v4294_v24 }
 0x9ca   : > { %2063 = vrot.lane.b32.xlu0 %v1776_v54, %s4545_s25 }
 0x9cb   : > { %v1842_v45 = vpack.c.bf16 %v1841_v44, %v1841_v44 }
 0x9cd   : > { %3951 = vmatmul.mubr.msk.bf16.vlgmr.msra.gmra.mxu0 %vm1469_vm5, %v1842_v45 }
 0x9ce   : > { %3961 = vmatpush3.bf16.msra.mxu0 %v1954_v47  ;;  %3962 = vmatprep.mubr.msk.bf16.mxu0 %vm4544_vm1, %v4543_v2  ;;  %v4261_v47 = vld [vmem:[%s4788_s29 + $0x98] sm:$0xff]  }
 0x9cf   : > { %3972 = vmatprep.subr.bf16.mxu0 %v4543_v2 }
 0xa2d   : > { %v1948_v48 = vpop.xlane.xlu0 %1947 }
 0xa2e   : > { %4303 = vrcp.f32 %v1948_v48  ;;  %v2319_v48 = vld [vmem:[%s5525_s0] sm:$0xf] }
 0xa35   : > { %v2059_v6 = vpop.xlane.xlu1 %2058 }
 0xa36   : > { %4305 = vrcp.f32 %v2059_v6  ;;  %v4263_v6 = vld [vmem:[%s4788_s29 + $0x88] sm:$0xff]  }
 0xa39   : > { %v2174_v60 = vpop.permute.xlu1 %2173 }
 0xa3b   : > { %v4304_v49 = vpop.eup %4303 }
 0xa3c   : > { %v1950_v51 = vmul.f32 %v4304_v49, %v4296_v35  ;;  %v4264_v49 = vld [vmem:[%s4788_s29 + $0x80] sm:$0xff]  }
 0xa3d   : > { %v2169_v52 = vpop.xlane.xlu0 %2168 }
 0xa3e   : > { %4307 = vrcp.f32 %v2169_v52  ;;  %v1951_v53 = vpack.c.bf16 %v1950_v51, %v1950_v51 }
 0xa40   : > { %3963 = vmatmul.mubr.msk.bf16.vlgmr.msra.gmra.mxu0 %vm1469_vm5, %v1951_v53 }
 0xa41   : > { %v2064_v54 = vpop.permute.xlu0 %2063  ;;  %3974 = vmatprep.mubr.msk.bf16.mxu0 %vm4544_vm1, %v4543_v2 }
 0xa42   : > { %3973 = vmatpush3.bf16.msra.mxu0 %v2064_v54  ;;  %v2311_v54 = vrot.slane %v5045_v57, %v1711_v46 }
 0xa43   : > { %v4306_v55 = vpop.eup %4305  ;;  %3984 = vmatprep.subr.bf16.mxu0 %v4543_v2 }
 0xa44   : > { %v2061_v58 = vmul.f32 %v4306_v55, %v4298_v38 }
 0xa46   : > { %v2062_v59 = vpack.c.bf16 %v2061_v58, %v2061_v58  ;;  %v2316_v58 = vrot.slane %v5045_v57, %v2237_v32 }
 0xa48   : > { %3975 = vmatmul.mubr.msk.bf16.vlgmr.msra.gmra.mxu0 %vm1469_vm5, %v2062_v59 }
 0xa49   : > { %3985 = vmatpush3.bf16.msra.mxu0 %v2174_v60  ;;  %3986 = vmatprep.mubr.msk.bf16.mxu0 %vm4544_vm1, %v4543_v2 }
 0xa4a   : > { %3998 = vmatprep.subr.bf16.mxu0 %v4543_v2 }
 0xa4b   : > { %v4308_v61 = vpop.eup %4307 }
 0xa4c   : > { %v2171_v62 = vmul.f32 %v4308_v61, %v4300_v40 }
 0xa4e   : > { %v2172_v63 = vpack.c.bf16 %v2171_v62, %v2171_v62  ;;  %v4331_v62 = vld [vmem:[%s4822_s13] sm:$0xff]  ;;  %s5526_s13 = sld [smem:[#allocation34_spill]] }
 0xa50   : > { %3987 = vmatmul.mubr.msk.bf16.vlgmr.msra.gmra.mxu0 %vm1469_vm5, %v2172_v63 }
 0xa51   : > { %4002 = vmatprep.mubr.msk.bf16.mxu0 %vm4544_vm1, %v4543_v2  ;;  %3999 = vmatpush3.bf16.msra.mxu0 %v4263_v6 }
 0xa52   : > { %4000 = vmatprep.subr.bf16.mxu0 %v4543_v2 }
 0xa55   : > { %4001 = vmatpush3.bf16.msra.mxu0 %v4264_v49 }
 0xa56   : > { %4014 = vmatprep.subr.bf16.mxu0 %v4543_v2 }
 0xa8d   : > { %v1880_v1 = vpop.f32.mrf.mxu0 }
 0xa8f   : > { %v3952_v3 = vpop.f32.mrf.mxu0 }
 0xa91   : > { %v1883_v4 = vpop.f32.mrf.mxu0 }
 0xa93   : > { %v3953_v5 = vpop.f32.mrf.mxu0 }
 0xb00   : > { %v1993_v9 = vpop.f32.mrf.mxu0 }
 0xb01   : > { %2220 = vrot.lane.b32.xlu1 %v1993_v9, %s4548_s22 }
 0xb02   : > { %v3964_v10 = vpop.f32.mrf.mxu0 }
 0xb04   : > { %v1996_v16 = vpop.f32.mrf.mxu0 }
 0xb06   : > { %v3965_v17 = vpop.f32.mrf.mxu0 }
 0xb08   : > { %v2103_v18 = vpop.f32.mrf.mxu0 }
 0xb09   : > { %2224 = vrot.lane.b32.xlu0 %v2103_v18, %s4549_s14 }
 0xb0a   : > { %v3976_v7 = vpop.f32.mrf.mxu0 }
 0xb0c   : > { %v2106_v19 = vpop.f32.mrf.mxu0 }
 0xb0e   : > { %v3977_v20 = vpop.f32.mrf.mxu0 }
 0xb10   : > { %v2213_v21 = vpop.f32.mrf.mxu0 }
 0xb11   : > { %2228 = vrot.lane.b32.xlu1 %v2213_v21, %s4550_s11 }
 0xb12   : > { %v3988_v22 = vpop.f32.mrf.mxu0 }
 0xb14   : > { %v2216_v23 = vpop.f32.mrf.mxu0 }
 0xb15   : > { %v4265_v23 = vld [vmem:[%s4788_s29 + $0xa8] sm:$0xff]  }
 0xb16   : > { %v3989_v24 = vpop.f32.mrf.mxu0 }
 0xb17   : > { %v4266_v24 = vld [vmem:[%s4788_s29 + $0xa0] sm:$0xff]  }
 0xb73   : > { %v2221_v25 = vpop.permute.xlu1 %2220 }
 0xb74   : > { %v2231_v27 = vsel %vm1003_vm3, %v1880_v1, %v2221_v25  ;;  %v2320_v25 = vld [vmem:[%s5526_s13] sm:$0xf] }
 0xb7b   : > { %v2225_v26 = vpop.permute.xlu0 %2224 }
 0xb7c   : > { %v2232_v28 = vsel %vm1469_vm5, %v2231_v27, %v2225_v26 }
 0xb83   : > { %v2229_v29 = vpop.permute.xlu1 %2228 }
 0xb84   : > { %v2233_v30 = vsel %vm1471_vm6, %v2232_v28, %v2229_v29 }
 0xb85   : > { %v2234_v31 = vpack.c.bf16 %v2233_v30, %v2233_v30 }
 0xb87   : > { %3995 = vmatmul.mubr.msk.bf16.vlgmr.msra.gmra.mxu1 %vm840_vm2, %v2234_v31 }
 0xb88   : > { %4010 = vmatprep.mubr.msk.bf16.mxu1 %vm4544_vm1, %v4543_v2  ;;  %4007 = vmatpush3.bf16.msra.mxu1 %v4261_v47 }
 0xb89   : > { %4008 = vmatprep.subr.bf16.mxu1 %v4543_v2 }
 0xc47   : > { %v2288_v35 = vpop.f32.mrf.mxu1 }
 0xc48   : > { %v2289_v36 = vadd.f32 %v2288_v35, %v2238_v33  ;;  %v3711_v35 = vld [vmem:[%s5528_s28] ss:$0 sm:$0xff] }
 0xc49   : > { %v3996_v37 = vpop.f32.mrf.mxu1 }
 0xc4a   : > { %v2294_v38 = vadd.f32 %v2289_v36, %v5051_v0  ;;  %v4262_v0 = vld [vmem:[%s4788_s29 + $0x90] sm:$0xff]  }
 0xc4b   : > { %v2291_v39 = vpop.f32.mrf.mxu1  ;;  %4009 = vmatpush3.bf16.msra.mxu1 %v4262_v0 }
 0xc4c   : > { %v2295_v40 = vsel %vm840_vm2, %v2294_v38, 0.0  ;;  %4022 = vmatprep.subr.bf16.mxu1 %v4543_v2 }
 0xc4d   : > { %2296 = vadd.xlane.f32.xlu0 %v2295_v40  ;;  %v3997_v41 = vpop.f32.mrf.mxu1 }
 0xc4e   : > { %4011 = vmatmul.mubr.msk.bf16.vlgmr.msra.gmra.mxu1 %vm840_vm2, %v2319_v48 }
 0xc4f   : > { %4024 = vmatprep.mubr.msk.bf16.mxu1 %vm4544_vm1, %v4543_v2 }
 0xcd6   : > { %v2297_v42 = vpop.xlane.xlu0 %2296 }
 0xcd7   : > { %v2298_v43 = vmul.f32 0.03125, %v2297_v42  ;;  %v2464_v42 = vrot.slane %v5045_v57, %v4964_v50 }
 0xcd9   : > { %v2299_v44 = vsub.f32 %v2294_v38, %v2298_v43 }
 0xcdb   : > { %v2300_v45 = vmul.f32 %v2299_v44, %v2299_v44 }
 0xcdd   : > { %v2301_v13 = vsel %vm840_vm2, %v2300_v45, 0.0 }
 0xcde   : > { %2302 = vadd.xlane.f32.xlu1 %v2301_v13 }
 0xd0e   : > { %v2455_v46 = vpop.f32.mrf.mxu1 }
 0xd0f   : > { %v2456_v3 = vadd.f32 %v2455_v46, %v2405_v11 }
 0xd10   : > { %v4012_v4 = vpop.f32.mrf.mxu1 }
 0xd11   : > { %v2521_v5 = vpack.c.bf16 %v2456_v3, %v2456_v3 }
 0xd12   : > { %v2458_v8 = vpop.f32.mrf.mxu1 }
 0xd13   : > { %2639 = vrot.lane.b32.xlu0 %v2521_v5, %s4546_s12  ;;  %v2527_v9 = vsel %vm1003_vm3, %v2521_v5, 0 }
 0xd14   : > { %v4013_v10 = vpop.f32.mrf.mxu1  ;;  %4023 = vmatpush3.bf16.xpose.msra.mxu1 %v2527_v9 }
 0xd15   : > { %4034 = vmatprep.subr.bf16.mxu1 %v4543_v2 }
 0xd17   : > { %2752 = vrot.lane.b32.xlu0 %v2521_v5, %s4545_s25 }
 0xd1b   : > { %2864 = vrot.lane.b32.xlu0 %v2521_v5, %s4547_s18 }
 0xd67   : > { %v2303_v51 = vpop.xlane.xlu1 %2302 }
 0xd68   : > { %v2304_v52 = vmul.f32 0.03125, %v2303_v51 }
 0xd6a   : > { %v2305_v53 = vadd.f32 1e-05, %v2304_v52 }
 0xd6c   : > { %4309 = vrsqrt.f32 %v2305_v53 }
 0xd79   : > { %v4310_v55 = vpop.eup %4309 }
 0xd7a   : > { %v2307_v59 = vmul.f32 %v4310_v55, %v2299_v44 }
 0xd7c   : > { %v2312_v60 = vmul.f32 %v2311_v54, %v2307_v59 }
 0xd7e   : > { %v5169_v61 = vadd.f32 %v2316_v58, %v2312_v60 }
 0xd80   : > { %v2318_v63 = vadd.f32 %v4331_v62, %v5169_v61 }
 0xd82   : > { %v2342_v1 = vpack.c.bf16 %v2318_v63, %v2318_v63 }
 0xd84   : > { %4003 = vmatmul.mubr.msk.bf16.vlgmr.msra.gmra.mxu0 %vm840_vm2, %v2342_v1 }
 0xd85   : > { %4018 = vmatprep.mubr.msk.bf16.mxu0 %vm4544_vm1, %v4543_v2  ;;  %v2640_v7 = vpop.permute.xlu0 %2639  ;;  %4015 = vmatpush3.bf16.msra.mxu0 %v4265_v23 }
 0xd86   : > { %v2645_v20 = vsel %vm1003_vm3, %v2640_v7, 0  ;;  %4016 = vmatprep.subr.bf16.mxu0 %v4543_v2 }
 0xd89   : > { %4017 = vmatpush3.bf16.msra.mxu0 %v4266_v24  ;;  %v2753_v26 = vpop.permute.xlu0 %2752 }
 0xd8a   : > { %4028 = vmatprep.subr.bf16.mxu0 %v4543_v2  ;;  %v2758_v28 = vsel %vm1003_vm3, %v2753_v26, 0 }
 0xd8c   : > { %4019 = vmatmul.mubr.msk.bf16.vlgmr.msra.gmra.mxu0 %vm840_vm2, %v2320_v25 }
 0xd8d   : > { %4030 = vmatprep.mubr.msk.bf16.mxu0 %vm4544_vm1, %v4543_v2  ;;  %v2865_v29 = vpop.permute.xlu0 %2864 }
 0xd8e   : > { %v2870_v31 = vsel %vm1003_vm3, %v2865_v29, 0 }
 0xe44   : > { %v2396_v16 = vpop.f32.mrf.mxu0 }
 0xe45   : > { %v2397_v17 = vadd.f32 %v2396_v16, %v2346_v15 }
 0xe46   : > { %v4004_v18 = vpop.f32.mrf.mxu0 }
 0xe47   : > { %v2520_v19 = vpack.c.bf16 %v2397_v17, %v2397_v17 }
 0xe48   : > { %v2399_v21 = vpop.f32.mrf.mxu0 }
 0xe49   : > { %2636 = vrot.lane.b32.xlu1 %v2520_v19, %s4546_s12  ;;  %4025 = vmatmul.mubr.msk.bf16.vlgmr.msra.gmra.mxu1 %vm1003_vm3, %v2520_v19 }
 0xe4a   : > { %v4005_v22 = vpop.f32.mrf.mxu0  ;;  %4035 = vmatpush3.bf16.xpose.msra.mxu1 %v2645_v20  ;;  %4036 = vmatprep.mubr.msk.bf16.mxu1 %vm4544_vm1, %v4543_v2 }
 0xe4b   : > { %4046 = vmatprep.subr.bf16.mxu1 %v4543_v2 }
 0xe4c   : > { %v2514_v43 = vpop.f32.mrf.mxu0 }
 0xe4d   : > { %2750 = vrot.lane.b32.xlu1 %v2520_v19, %s4545_s25  ;;  %v2515_v44 = vadd.f32 %v2514_v43, %v2464_v42 }
 0xe4e   : > { %v4020_v45 = vpop.f32.mrf.mxu0 }
 0xe4f   : > { %v5222_v13 = vpack.c.bf16 %v2515_v44, %v2515_v44 }
 0xe50   : > { %v2517_v47 = vpop.f32.mrf.mxu0 }
 0xe51   : > { %2862 = vrot.lane.b32.xlu1 %v2520_v19, %s4547_s18  ;;  %v2593_v0 = vsel %vm1073_vm4, %v5222_v13, 0 }
 0xe52   : > { %v4021_v48 = vpop.f32.mrf.mxu0  ;;  %4029 = vmatpush3.bf16.msra.mxu0 %v2593_v0 }
 0xe53   : > { %4040 = vmatprep.subr.bf16.mxu0 %v4543_v2 }
 0xebb   : > { %v2637_v27 = vpop.permute.xlu1 %2636 }
 0xebc   : > { %4037 = vmatmul.mubr.msk.bf16.vlgmr.msra.gmra.mxu1 %vm1003_vm3, %v2637_v27 }
 0xebd   : > { %4047 = vmatpush3.bf16.xpose.msra.mxu1 %v2758_v28  ;;  %4048 = vmatprep.mubr.msk.bf16.mxu1 %vm4544_vm1, %v4543_v2 }
 0xebe   : > { %4058 = vmatprep.subr.bf16.mxu1 %v4543_v2 }
 0xebf   : > { %v2751_v30 = vpop.permute.xlu1 %2750 }
 0xec3   : > { %v2863_v32 = vpop.permute.xlu1 %2862 }
 0xec4   : > { %4049 = vmatmul.mubr.msk.bf16.vlgmr.msra.gmra.mxu1 %vm1003_vm3, %v2751_v30 }
 0xec5   : > { %4059 = vmatpush3.bf16.xpose.msra.mxu1 %v2870_v31  ;;  %4060 = vmatprep.mubr.msk.bf16.mxu1 %vm4544_vm1, %v4543_v2 }
 0xec6   : > { %4070 = vmatprep.subr.bf16.mxu1 %v4543_v2 }
 0xecc   : > { %4061 = vmatmul.mubr.msk.bf16.vlgmr.msra.gmra.mxu1 %vm1003_vm3, %v2863_v32 }
 0xecd   : > { %4074 = vmatprep.mubr.msk.bf16.mxu1 %vm4544_vm1, %v4543_v2 }
 0xf09   : > { %v2563_v33 = vpop.f32.mrf.mxu1 }
 0xf0a   : > { %v2569_v36 = vmul.f32 0.35355338, %v2563_v33 }
 0xf0b   : > { %v4026_v37 = vpop.f32.mrf.mxu1 }
 0xf0c   : > { %v2576_v38 = vadd.f32 %v3711_v35, %v2569_v36 }
 0xf0d   : > { %v2566_v39 = vpop.f32.mrf.mxu1 }
 0xf0e   : > { %v2577_v40 = vsel %vm1003_vm3, %v2576_v38, -inf }
 0xf0f   : > { %2578 = vmax.xlane.f32.xlu0 %v2577_v40  ;;  %v4027_v41 = vpop.f32.mrf.mxu1 }
 0xf7c   : > { %v2681_v6 = vpop.f32.mrf.mxu1 }
 0xf7d   : > { %v2687_v49 = vmul.f32 0.35355338, %v2681_v6 }
 0xf7e   : > { %v4038_v51 = vpop.f32.mrf.mxu1 }
 0xf7f   : > { %v2688_v52 = vadd.f32 %v3711_v35, %v2687_v49 }
 0xf80   : > { %v2684_v53 = vpop.f32.mrf.mxu1 }
 0xf81   : > { %v2689_v54 = vsel %vm1003_vm3, %v2688_v52, -inf }
 0xf82   : > { %2690 = vmax.xlane.f32.xlu1 %v2689_v54  ;;  %v4039_v55 = vpop.f32.mrf.mxu1 }
 0xf84   : > { %v2794_v58 = vpop.f32.mrf.mxu1 }
 0xf85   : > { %v2800_v59 = vmul.f32 0.35355338, %v2794_v58 }
 0xf86   : > { %v4050_v60 = vpop.f32.mrf.mxu1 }
 0xf87   : > { %v2801_v62 = vadd.f32 %v3711_v35, %v2800_v59 }
 0xf88   : > { %v2797_v63 = vpop.f32.mrf.mxu1 }
 0xf89   : > { %v2802_v1 = vsel %vm1003_vm3, %v2801_v62, -inf  ;;  %v4267_v63 = vld [vmem:[%s4788_s29 + $0xb8] sm:$0xff]  }
 0xf8a   : > { %2803 = vmax.xlane.f32.xlu0 %v2802_v1  ;;  %v4051_v11 = vpop.f32.mrf.mxu1  ;;  %4071 = vmatpush3.bf16.msra.mxu1 %v4267_v63 }
 0xf8b   : > { %4072 = vmatprep.subr.bf16.mxu1 %v4543_v2 }
 0xf8c   : > { %v2906_v46 = vpop.f32.mrf.mxu1 }
 0xf8d   : > { %v2912_v3 = vmul.f32 0.35355338, %v2906_v46  ;;  %v4268_v46 = vld [vmem:[%s4788_s29 + $0xb0] sm:$0xff]  }
 0xf8e   : > { %v4062_v4 = vpop.f32.mrf.mxu1  ;;  %4073 = vmatpush3.bf16.msra.mxu1 %v4268_v46 }
 0xf8f   : > { %v2913_v5 = vadd.f32 %v3711_v35, %v2912_v3  ;;  %4086 = vmatprep.subr.bf16.mxu1 %v4543_v2 }
 0xf90   : > { %v2909_v8 = vpop.f32.mrf.mxu1 }
 0xf91   : > { %v2914_v9 = vsel %vm1003_vm3, %v2913_v5, -inf }
 0xf92   : > { %2915 = vmax.xlane.f32.xlu0 %v2914_v9  ;;  %v4063_v10 = vpop.f32.mrf.mxu1 }
 0xf98   : > { %v2579_v15 = vpop.xlane.xlu0 %2578 }
 0xf99   : > { %v2580_v16 = vsub.f32 %v2576_v38, %v2579_v15 }
 0xf9b   : > { %v2581_v17 = vmul.f32 1.442695, %v2580_v16 }
 0xf9d   : > { %4311 = vpow2.f32 %v2581_v17 }
 0xfaa   : > { %v4312_v18 = vpop.eup %4311 }
 0xfab   : > { %v2583_v7 = vsel %vm1003_vm3, %v4312_v18, 0.0 }
 0xfac   : > { %2584 = vadd.xlane.f32.xlu1 %v2583_v7 }
 0xfbd   : > { %2702 = vrot.lane.b32.xlu1 %v5222_v13, %s4546_s12 }
0x100b   : > { %v2691_v19 = vpop.xlane.xlu1 %2690 }
0x100c   : > { %v2692_v20 = vsub.f32 %v2688_v52, %v2691_v19 }
0x100e   : > { %v2693_v21 = vmul.f32 1.442695, %v2692_v20 }
0x1010   : > { %4313 = vpow2.f32 %v2693_v21 }
0x1013   : > { %v2804_v22 = vpop.xlane.xlu0 %2803 }
0x1014   : > { %v2805_v23 = vsub.f32 %v2801_v62, %v2804_v22 }
0x1016   : > { %v2806_v24 = vmul.f32 1.442695, %v2805_v23 }
0x1018   : > { %4315 = vpow2.f32 %v2806_v24 }
0x101b   : > { %v2916_v25 = vpop.xlane.xlu0 %2915 }
0x101c   : > { %v2917_v26 = vsub.f32 %v2913_v5, %v2916_v25  ;;  %v2993_v25 = vrot.slane %v5045_v57, %v5018_v34  ;;  %v4269_v57 = vld [vmem:[%s4858_s2 + $0x8] sm:$0xff]  }
0x101d   : > { %v4314_v27 = vpop.eup %4313 }
0x101e   : > { %v2918_v28 = vmul.f32 1.442695, %v2917_v26  ;;  %v2695_v29 = vsel %vm1003_vm3, %v4314_v27, 0.0 }
0x101f   : > { %2696 = vadd.xlane.f32.xlu0 %v2695_v29 }
0x1020   : > { %4317 = vpow2.f32 %v2918_v28 }
0x1025   : > { %v4316_v30 = vpop.eup %4315 }
0x1026   : > { %v2808_v31 = vsel %vm1003_vm3, %v4316_v30, 0.0 }
0x1027   : > { %2809 = vadd.xlane.f32.xlu1 %v2808_v31 }
0x102d   : > { %v4318_v32 = vpop.eup %4317 }
0x102e   : > { %v2920_v33 = vsel %vm1003_vm3, %v4318_v32, 0.0 }
0x102f   : > { %2921 = vadd.xlane.f32.xlu0 %v2920_v33 }
0x1035   : > { %v2585_v35 = vpop.xlane.xlu1 %2584 }
0x1036   : > { %4319 = vrcp.f32 %v2585_v35 }
0x1038   : > { %2926 = vrot.lane.b32.xlu1 %v5222_v13, %s4547_s18 }
0x1039   : > { %v2703_v37 = vpop.permute.xlu1 %2702 }
0x103a   : > { %v2708_v40 = vsel %vm1073_vm4, %v2703_v37, 0 }
0x1043   : > { %v4320_v36 = vpop.eup %4319 }
0x1044   : > { %v2587_v38 = vmul.f32 %v4320_v36, %v4312_v18 }
0x1045   : > { %2814 = vrot.lane.b32.xlu0 %v5222_v13, %s4545_s25 }
0x1046   : > { %v2588_v39 = vpack.c.bf16 %v2587_v38, %v2587_v38 }
0x1048   : > { %4031 = vmatmul.mubr.msk.bf16.vlgmr.msra.gmra.mxu0 %vm1003_vm3, %v2588_v39  ;;  %v4270_v39 = vld [vmem:[%s4858_s2] sm:$0xff]  }
0x1049   : > { %4041 = vmatpush3.bf16.msra.mxu0 %v2708_v40  ;;  %4042 = vmatprep.mubr.msk.bf16.mxu0 %vm4544_vm1, %v4543_v2  ;;  %v4272_v40 = vld [vmem:[%s4869_s1 + $0x10] sm:$0xff]  }
0x104a   : > { %4052 = vmatprep.subr.bf16.mxu0 %v4543_v2 }
0x10a8   : > { %v2697_v41 = vpop.xlane.xlu0 %2696 }
0x10a9   : > { %4321 = vrcp.f32 %v2697_v41 }
0x10b0   : > { %v2810_v42 = vpop.xlane.xlu1 %2809 }
0x10b1   : > { %4323 = vrcp.f32 %v2810_v42 }
0x10b4   : > { %v2927_v49 = vpop.permute.xlu1 %2926 }
0x10b5   : > { %v2932_v52 = vsel %vm1073_vm4, %v2927_v49, 0 }
0x10b6   : > { %v4322_v43 = vpop.eup %4321 }
0x10b7   : > { %v2699_v44 = vmul.f32 %v4322_v43, %v4314_v27 }
0x10b8   : > { %v2922_v45 = vpop.xlane.xlu0 %2921 }
0x10b9   : > { %4325 = vrcp.f32 %v2922_v45  ;;  %v2700_v13 = vpack.c.bf16 %v2699_v44, %v2699_v44  ;;  %v801_v44 = vld [vmem:[%s4874_s19 + $0x10] sm:$0x1f] }
0x10ba   : > { %v3066_v45 = vrot.slane %v801_v44, %v4916_v14  ;;  %v3722_v14 = vld [vmem:[%s778_s5] ss:$0 sm:$0xff] }
0x10bb   : > { %4043 = vmatmul.mubr.msk.bf16.vlgmr.msra.gmra.mxu0 %vm1003_vm3, %v2700_v13 }
0x10bc   : > { %v2815_v47 = vpop.permute.xlu0 %2814  ;;  %4054 = vmatprep.mubr.msk.bf16.mxu0 %vm4544_vm1, %v4543_v2 }
0x10bd   : > { %v2820_v0 = vsel %vm1073_vm4, %v2815_v47, 0  ;;  %v3071_v47 = vrot.slane %v801_v44, %v4910_v12 }
0x10be   : > { %v4324_v48 = vpop.eup %4323  ;;  %4053 = vmatpush3.bf16.msra.mxu0 %v2820_v0 }
0x10bf   : > { %4064 = vmatprep.subr.bf16.mxu0 %v4543_v2  ;;  %v2812_v6 = vmul.f32 %v4324_v48, %v4316_v30 }
0x10c1   : > { %v2813_v51 = vpack.c.bf16 %v2812_v6, %v2812_v6 }
0x10c3   : > { %4055 = vmatmul.mubr.msk.bf16.vlgmr.msra.gmra.mxu0 %vm1003_vm3, %v2813_v51  ;;  %v4273_v51 = vld [vmem:[%s4869_s1 + $0x8] sm:$0xff]  }
0x10c4   : > { %4065 = vmatpush3.bf16.msra.mxu0 %v2932_v52  ;;  %4066 = vmatprep.mubr.msk.bf16.mxu0 %vm4544_vm1, %v4543_v2  ;;  %v4274_v52 = vld [vmem:[%s4869_s1] sm:$0xff]  }
0x10c5   : > { %4078 = vmatprep.subr.bf16.mxu0 %v4543_v2 }
0x10c6   : > { %v4326_v53 = vpop.eup %4325 }
0x10c7   : > { %v2924_v54 = vmul.f32 %v4326_v53, %v4318_v32 }
0x10c9   : > { %v2925_v55 = vpack.c.bf16 %v2924_v54, %v2924_v54 }
0x10cb   : > { %4067 = vmatmul.mubr.msk.bf16.vlgmr.msra.gmra.mxu0 %vm1003_vm3, %v2925_v55 }
0x10cc   : > { %4082 = vmatprep.mubr.msk.bf16.mxu0 %vm4544_vm1, %v4543_v2  ;;  %4079 = vmatpush3.bf16.msra.mxu0 %v4269_v57 }
0x10cd   : > { %4080 = vmatprep.subr.bf16.mxu0 %v4543_v2 }
0x10d0   : > { %4081 = vmatpush3.bf16.msra.mxu0 %v4270_v39 }
0x1108   : > { %v2629_v58 = vpop.f32.mrf.mxu0 }
0x110a   : > { %v4032_v59 = vpop.f32.mrf.mxu0 }
0x110c   : > { %v2632_v60 = vpop.f32.mrf.mxu0 }
0x110e   : > { %v4033_v62 = vpop.f32.mrf.mxu0 }
0x110f   : > { %v3153_v62 = vrot.slane %v801_v44, %v5042_v56  ;;  %v3239_v56 = vrot.slane %v801_v44, %v4964_v50 }
0x117b   : > { %v2744_v1 = vpop.f32.mrf.mxu0 }
0x117c   : > { %2975 = vrot.lane.b32.xlu1 %v2744_v1, %s4548_s22 }
0x117d   : > { %v4044_v11 = vpop.f32.mrf.mxu0 }
0x117f   : > { %v2747_v3 = vpop.f32.mrf.mxu0 }
0x1181   : > { %v4045_v4 = vpop.f32.mrf.mxu0 }
0x1183   : > { %v2856_v5 = vpop.f32.mrf.mxu0 }
0x1184   : > { %2979 = vrot.lane.b32.xlu0 %v2856_v5, %s4549_s14 }
0x1185   : > { %v4056_v8 = vpop.f32.mrf.mxu0 }
0x1187   : > { %v2859_v9 = vpop.f32.mrf.mxu0 }
0x1189   : > { %v4057_v10 = vpop.f32.mrf.mxu0 }
0x118b   : > { %v2968_v15 = vpop.f32.mrf.mxu0 }
0x118c   : > { %2983 = vrot.lane.b32.xlu1 %v2968_v15, %s4550_s11 }
0x118d   : > { %v4068_v16 = vpop.f32.mrf.mxu0 }
0x118f   : > { %v2971_v17 = vpop.f32.mrf.mxu0 }
0x1191   : > { %v4069_v18 = vpop.f32.mrf.mxu0 }
0x11ee   : > { %v2976_v7 = vpop.permute.xlu1 %2975 }
0x11ef   : > { %v2986_v20 = vsel %vm1003_vm3, %v2629_v58, %v2976_v7 }
0x11f6   : > { %v2980_v19 = vpop.permute.xlu0 %2979 }
0x11f7   : > { %v2987_v21 = vsel %vm1469_vm5, %v2986_v20, %v2980_v19  ;;  %v3244_v19 = vrot.slane %v801_v44, %v5018_v34 }
0x11fe   : > { %v2984_v22 = vpop.permute.xlu1 %2983 }
0x11ff   : > { %v2988_v23 = vsel %vm1471_vm6, %v2987_v21, %v2984_v22 }
0x1200   : > { %v2989_v24 = vpack.c.bf16 %v2988_v23, %v2988_v23 }
0x1202   : > { %4075 = vmatmul.mubr.msk.bf16.vlgmr.msra.gmra.mxu1 %vm840_vm2, %v2989_v24 }
0x1203   : > { %4094 = vmatprep.mubr.msk.bf16.mxu1 %vm4544_vm1, %v4543_v2 }
0x12c2   : > { %v3043_v26 = vpop.f32.mrf.mxu1 }
0x12c3   : > { %v3044_v27 = vadd.f32 %v3043_v26, %v2993_v25 }
0x12c4   : > { %v4076_v28 = vpop.f32.mrf.mxu1 }
0x12c5   : > { %v3049_v29 = vadd.f32 %v3044_v27, %v5169_v61  ;;  %v4271_v61 = vld [vmem:[%s4869_s1 + $0x18] sm:$0xff]   ;;  %s5530_s1 = sld [smem:[#allocation48_spill]] (!%p3731_p10) }
0x12c6   : > { %v3046_v30 = vpop.f32.mrf.mxu1  ;;  %4087 = vmatpush3.bf16.msra.mxu1 %v4271_v61 }
0x12c7   : > { %v3050_v31 = vsel %vm840_vm2, %v3049_v29, 0.0  ;;  %4088 = vmatprep.subr.bf16.mxu1 %v4543_v2 }
0x12c8   : > { %3051 = vadd.xlane.f32.xlu0 %v3050_v31  ;;  %v4077_v32 = vpop.f32.mrf.mxu1 }
0x12ca   : > { %4089 = vmatpush3.bf16.msra.mxu1 %v4272_v40 }
0x12cb   : > { %4090 = vmatprep.subr.bf16.mxu1 %v4543_v2 }
0x12ce   : > { %4091 = vmatpush3.bf16.msra.mxu1 %v4273_v51 }
0x12cf   : > { %4092 = vmatprep.subr.bf16.mxu1 %v4543_v2 }
0x12d2   : > { %4093 = vmatpush3.bf16.msra.mxu1 %v4274_v52 }
0x1351   : > { %v3052_v33 = vpop.xlane.xlu0 %3051 }
0x1352   : > { %v3053_v35 = vmul.f32 0.03125, %v3052_v33 }
0x1354   : > { %v3054_v36 = vsub.f32 %v3049_v29, %v3053_v35 }
0x1356   : > { %v3055_v37 = vmul.f32 %v3054_v36, %v3054_v36 }
0x1358   : > { %v3056_v38 = vsel %vm840_vm2, %v3055_v37, 0.0 }
0x1359   : > { %3057 = vadd.xlane.f32.xlu1 %v3056_v38 }
0x13e2   : > { %v3058_v41 = vpop.xlane.xlu1 %3057 }
0x13e3   : > { %v3059_v42 = vmul.f32 0.03125, %v3058_v41 }
0x13e5   : > { %v3060_v43 = vadd.f32 1e-05, %v3059_v42 }
0x13e7   : > { %4327 = vrsqrt.f32 %v3060_v43 }
0x13f4   : > { %v4328_v13 = vpop.eup %4327 }
0x13f5   : > { %v3062_v0 = vmul.f32 %v4328_v13, %v3054_v36 }
0x13f7   : > { %v3067_v48 = vmul.f32 %v3066_v45, %v3062_v0 }
0x13f9   : > { %v3072_v6 = vadd.f32 %v3071_v47, %v3067_v48 }
0x13fb   : > { %v3073_v49 = vpack.c.bf16 %v3072_v6, %v3072_v6 }
0x13fd   : > { %4083 = vmatmul.mubr.msk.bf16.vlgmr.msra.gmra.mxu0 %vm840_vm2, %v3073_v49 }
0x14bd   : > { %v3134_v53 = vpop.f32.mrf.mxu0 }
0x14be   : > { %v3135_v54 = vadd.f32 %v3722_v14, %v3134_v53 }
0x14bf   : > { %v4084_v12 = vpop.f32.mrf.mxu0 }
0x14c0   : > { %v3140_v55 = vmax.f32 %v3135_v54, 0.0 }
0x14c1   : > { %v3137_v58 = vpop.f32.mrf.mxu0 }
0x14c2   : > { %v3141_v59 = vpack.c.bf16 %v3140_v55, %v3140_v55 }
0x14c3   : > { %v4085_v60 = vpop.f32.mrf.mxu0 }
0x14c4   : > { %4095 = vmatmul.mubr.msk.bf16.vlgmr.msra.gmra.mxu1 %vm3178_vm7, %v3141_v59 }
0x1584   : > { %v3216_v63 = vpop.f32.mrf.mxu1 }
0x1585   : > { %v3217_v2 = vadd.f32 %v3216_v63, %v3153_v62 }
0x1586   : > { %v4096_v1 = vpop.f32.mrf.mxu1 }
0x1587   : > { %v3222_v11 = vadd.f32 %v3217_v2, %v3072_v6 }
0x1588   : > { %v3219_v46 = vpop.f32.mrf.mxu1 }
0x1589   : > { %v3223_v3 = vsel %vm840_vm2, %v3222_v11, 0.0 }
0x158a   : > { %3224 = vadd.xlane.f32.xlu0 %v3223_v3  ;;  %v4097_v4 = vpop.f32.mrf.mxu1 }
0x1613   : > { %v3225_v5 = vpop.xlane.xlu0 %3224 }
0x1614   : > { %v3226_v8 = vmul.f32 0.03125, %v3225_v5 }
0x1616   : > { %v3227_v9 = vsub.f32 %v3222_v11, %v3226_v8 }
0x1618   : > { %v3228_v10 = vmul.f32 %v3227_v9, %v3227_v9 }
0x161a   : > { %v3229_v15 = vsel %vm840_vm2, %v3228_v10, 0.0 }
0x161b   : > { %3230 = vadd.xlane.f32.xlu0 %v3229_v15 }
0x16a4   : > { %v3231_v16 = vpop.xlane.xlu0 %3230 }
0x16a5   : > { %v3232_v17 = vmul.f32 0.03125, %v3231_v16 }
0x16a7   : > { %v3233_v18 = vadd.f32 1e-05, %v3232_v17 }
0x16a9   : > { %4329 = vrsqrt.f32 %v3233_v18 }
0x16b6   : > { %v4330_v7 = vpop.eup %4329 }
0x16b7   : > { %v3235_v20 = vmul.f32 %v4330_v7, %v3227_v9 }
0x16b9   : > { %v3240_v21 = vmul.f32 %v3239_v56, %v3235_v20  ;;  %3250 = sbr.rel (%p3731_p10) target bundleno = 6439 (0x1927), region = 92 }
0x16bb   : > { %v3245_v22 = vadd.f32 %v3244_v19, %v3240_v21 }
0x16bd   : > { %3246 = vst.msk [vmem:[#allocation2] sm:$0xff] %vm840_vm2, %v3245_v22 }
0x16be   : > { %v3253_v23 = vsel %vm840_vm2, %v3245_v22, 0.0  ;;  %v3732_v31 = vld [vmem:[%s5530_s1] ss:$0 sm:$0xff]  ;;  %v3733_v33 = vld [vmem:[%s5530_s1 + $0x1] ss:$0 sm:$0xff] }
0x16bf   : > { %3254 = vadd.xlane.f32.xlu0 %v3253_v23 }
0x1748   : > { %v3255_v24 = vpop.xlane.xlu0 %3254 }
0x1749   : > { %v3256_v25 = vmul.f32 0.03125, %v3255_v24 }
0x174b   : > { %v3257_v26 = vsub.f32 %v3245_v22, %v3256_v25 }
0x174d   : > { %v3258_v27 = vmul.f32 %v3257_v26, %v3257_v26 }
0x174f   : > { %v3259_v50 = vsel %vm840_vm2, %v3258_v27, 0.0 }
0x1750   : > { %3260 = vadd.xlane.f32.xlu0 %v3259_v50 }
0x17d9   : > { %v3261_v34 = vpop.xlane.xlu0 %3260 }
0x17da   : > { %v3262_v28 = vmul.f32 0.03125, %v3261_v34 }
0x17dc   : > { %v3263_v29 = vadd.f32 1e-05, %v3262_v28 }
0x17de   : > { %4332 = vrsqrt.f32 %v3263_v29 }
0x17eb   : > { %v4333_v30 = vpop.eup %4332 }
0x17ec   : > { %v3265_v32 = vmul.f32 %v4333_v30, %v3257_v26 }
0x17ee   : > { %v3270_v35 = vmul.f32 %v3732_v31, %v3265_v32 }
0x17f0   : > { %v3275_v36 = vadd.f32 %v3733_v33, %v3270_v35 }
0x17f2   : > { %v3276_v37 = vsel %vm840_vm2, %v3275_v36, 0.0  ;;  %3292 = vst.msk [vmem:[%s735_s4] sm:$0xff] %vm840_vm2, %v3275_v36 }
0x17f3   : > { %3277 = vadd.xlane.f32.xlu1 %v3276_v37 }
0x187c   : > { %v3278_v38 = vpop.xlane.xlu1 %3277 }
0x187d   : > { %v3279_v57 = vmul.f32 0.03125, %v3278_v38 }
0x187f   : > { %v3280_v39 = vsub.f32 %v3275_v36, %v3279_v57 }
0x1881   : > { %v3281_v61 = vmul.f32 %v3280_v39, %v3280_v39 }
0x1883   : > { %v3282_v40 = vsel %vm840_vm2, %v3281_v61, 0.0 }
0x1884   : > { %3283 = vadd.xlane.f32.xlu1 %v3282_v40 }
0x190d   : > { %v3284_v41 = vpop.xlane.xlu1 %3283 }
0x190e   : > { %v3285_v42 = vmul.f32 0.03125, %v3284_v41 }
0x1910   : > { %v3286_v43 = vadd.f32 1e-05, %v3285_v42 }
0x1912   : > { %4334 = vrsqrt.f32 %v3286_v43 }
0x191f   : > { %v4335_v44 = vpop.eup %4334 }
0x1920   : > { %v3288_v45 = vmul.f32 %v4335_v44, %v3280_v39 }
0x1922   : > { %v3289_v13 = vmul.f32 %v3732_v31, %v3288_v45 }
0x1924   : > { %v3290_v47 = vadd.f32 %v3733_v33, %v3289_v13 }
0x1926   : > { %3291 = vst.msk [vmem:[%s4876_s3] sm:$0xff] %vm840_vm2, %v3290_v47 }
0x1927 PF: > { %p3734_p11 = scmp.ge.s32.totalorder %s4522_s30, 1 }
0x1929   : > { %3296 = sbr.rel (%p3734_p11) target bundleno = 6447 (0x192f), region = 96 }
0x192e   : > { %3297 = vst.msk [vmem:[%s4876_s3] sm:$0xff] %vm840_vm2, %v3245_v22 }
0x192f PF: > { %s5531_s12 = sld [smem:[#allocation20_spill]]  ;;  %s3737_s14 = sshll.u32 %s4522_s30, 1 }
0x1930   : > { %s5532_s18 = sld [smem:[#allocation16_spill]]  ;;  %s3319_s21 = sshll.u32 %s4876_s3, 4  ;;  %s3320_s21 = int_to_ptr.vmem [resolvable:$true] %s3319_s21 }
0x1931   : > { %s5534_s16 = sld [smem:[#allocation49_spill]]  ;;  %s4364_s13 = scalar_lea.vmem %s3320_s21, 128 }
0x1932   : > { %p4365_p0 = scmp.ne.s32.totalorder %s3320_s21, %s4364_s13  ;;  %s4551_s26 = smov [#allocation6]  }
0x1933   : > { %s4368_s8 = sshll.u32 %s4551_s26, 4  ;;  %s4369_s8 = int_to_ptr.vmem [resolvable:$false] %s4368_s8 }
0x1934   : > { %p4366_p1 = pnand %p4365_p0, %p4743_p13  ;;  %s4370_s17 = scalar_lea.vmem %s4369_s8, 256 }
0x1935   : > { %s3315_s11 = sadd.s32 %s5531_s12, %s3737_s14  ;;  %p4371_p3 = scmp.lt.s32.totalorder %s3320_s21, %s4369_s8 }
0x1936   : > { %s3738_s24 = sshll.u32 %s3315_s11, 7  ;;  %s5535_s10 = sand.u32 1, %s5532_s18  }
0x1937   : > { %s3317_s9 = scalar_lea.hbm %s5534_s16, %s3738_s24  ;;  %s3299_s0 = scalar_lea.sflag [#allocation5], %s5535_s10 }
0x1938   : > { %p4367_p4 = pneg %p4366_p1  ;;  %p4372_p6 = scmp.lt.s32.totalorder %s4370_s17, %s4364_s13 }
0x193a   : > { %p4373_p7 = por %p4372_p6, %p4371_p3 }
0x193c   : > { %p4374_p12 = pnand %p4373_p7, %p4367_p4 }
0x193e   : > { %4377 = shalt.err (!%p4374_p12)
}
0x193f   : > { %s4378_s3 = scalar_lea.hbm %s3317_s9, 128  ;;  %s4382_s2 = scalar_lea.hbm %s5534_s16, 512 }
0x1940   : > { %p4379_p2 = scmp.ne.s32.totalorder %s3317_s9, %s4378_s3  ;;  %p4383_p10 = scmp.lt.s32.totalorder %s3317_s9, %s5534_s16 }
0x1941   : > { %p4384_p11 = scmp.lt.s32.totalorder %s4382_s2, %s4378_s3 }
0x1942   : > { %p4380_p9 = pnand %p4379_p2, %p4743_p13 }
0x1943   : > { %p4385_p0 = por %p4384_p11, %p4383_p10 }
0x1944   : > { %p4381_p8 = pneg %p4380_p9 }
0x1946   : > { %p4386_p1 = pnand %p4385_p0, %p4381_p8 }
0x1948   : > { %4389 = shalt.err (!%p4386_p1)
}
0x1949   : > { %s5536_s5 = sld [smem:[#allocation13_spill]]  ;;  %s3739_s19 = sshll.u32 %s5531_s12, 7 }
0x194a   : > { %4104 = dma.vmem_to_hbm [thread:$0]  (%p4743_p13), %s3320_s21, 128, %s3317_s9, %s3299_s0  }
0x194b   : > { %s3332_s25 = sshll.u32 %s735_s4, 4  ;;  %s5538_s11 = sld [smem:[#allocation50_spill]]  ;;  %s3333_s25 = int_to_ptr.vmem [resolvable:$true] %s3332_s25 }
0x194c   : > { %s4390_s10 = scalar_lea.vmem %s3333_s25, 128  ;;  %s4552_s22 = smov [#allocation7]  }
0x194d   : > { %p4391_p4 = scmp.ne.s32.totalorder %s3333_s25, %s4390_s10  ;;  %s4394_s13 = sshll.u32 %s4552_s22, 4  ;;  %s4395_s13 = int_to_ptr.vmem [resolvable:$false] %s4394_s13 }
0x194e   : > { %s4396_s26 = scalar_lea.vmem %s4395_s13, 256  ;;  %p4397_p13 = scmp.lt.s32.totalorder %s3333_s25, %s4395_s13 }
0x194f   : > { %s5539_s20 = sand.u32 1, %s5536_s5   ;;  %p4392_p3 = pnand %p4391_p4, %p4757_p5 }
0x1950   : > { %s3304_s23 = scalar_lea.sflag [#allocation8], %s5539_s20  ;;  %p4398_p7 = scmp.lt.s32.totalorder %s4396_s26, %s4390_s10 }
0x1951   : > { %s3330_s24 = scalar_lea.hbm %s5538_s11, %s3739_s19  ;;  %p4393_p6 = pneg %p4392_p3 }
0x1952   : > { %p4399_p12 = por %p4398_p7, %p4397_p13 }
0x1954   : > { %p4400_p2 = pnand %p4399_p12, %p4393_p6 }
0x1956   : > { %4403 = shalt.err (!%p4400_p2)
}
0x1957   : > { %s4404_s7 = scalar_lea.hbm %s3330_s24, 128  ;;  %s4408_s21 = scalar_lea.hbm %s5538_s11, 256 }
0x1958   : > { %p4405_p9 = scmp.ne.s32.totalorder %s3330_s24, %s4404_s7  ;;  %p4409_p11 = scmp.lt.s32.totalorder %s3330_s24, %s5538_s11 }
0x1959   : > { %p4410_p0 = scmp.lt.s32.totalorder %s4408_s21, %s4404_s7 }
0x195a   : > { %p4406_p8 = pnand %p4405_p9, %p4757_p5 }
0x195b   : > { %p4411_p1 = por %p4410_p0, %p4409_p11 }
0x195c   : > { %p4407_p10 = pneg %p4406_p8 }
0x195e   : > { %p4412_p4 = pnand %p4411_p1, %p4407_p10 }
0x1960   : > { %4415 = shalt.err (!%p4412_p4)
}
0x1961   : > { %4105 = dma.vmem_to_hbm [thread:$0]  (%p4757_p5), %s3333_s25, 128, %s3330_s24, %s3304_s23  }
0x1962 PF: > { %s5540_s8 = sld [smem:[#allocation23_spill]] }
0x1963   : > { %s5541_s17 = sld [smem:[#allocation15_spill]] }
0x1964   : > { %s5542_s3 = sld [smem:[#allocation29_spill]] }
0x1968   : > { %p4120_p3 = scmp.ge.s32.totalorder %s5540_s8, 2 }
0x1969   : > { %s3344_s30 = sand.u32 1, %s5541_s17  }
0x196a   : > { %p5543_p6 = scmp.ne.s32.totalorder %s5542_s3, 0  ;;  %s3345_s28 = scalar_lea.sflag [#allocation5], %s3344_s30 }
0x196c   : > { %p4113_p13 = pnand %p4120_p3, %p5543_p6 }
0x196e   : > { %p4114_p7 = pneg %p4113_p13 }
0x1970   : > { %4477 = dma.done.wait (%p4114_p7), %s3345_s28, 128  }
0x1971   : > { %4479 = vsyncadd (%p4114_p7), %s3345_s28, 4294967168  ;;  %s5544_s2 = sld [smem:[#allocation12_spill]] }
0x1972   : > { %s5545_s29 = sld [smem:[#allocation32_spill]] }
0x1977   : > { %s3353_s27 = sand.u32 1, %s5544_s2  }
0x1978   : > { %p5546_p12 = scmp.ne.s32.totalorder %s5545_s29, 0  ;;  %s3354_s5 = scalar_lea.sflag [#allocation8], %s3353_s27 }
0x197a   : > { %p4116_p2 = pnand %p4120_p3, %p5546_p12 }
0x197c   : > { %p4117_p9 = pneg %p4116_p2 }
0x197e   : > { %4481 = dma.done.wait (%p4117_p9), %s3354_s5, 128  }
0x197f   : > { %4483 = vsyncadd (%p4117_p9), %s3354_s5, 4294967168  ;;  %s36_s19 = sadd.s32 1, %s5540_s8   ;;  %s5548_s21 = sld [smem:[#allocation13_spill]] }
0x1980   : > { %p5368_p5 = scmp.ge.s32.totalorder %s36_s19, 6   ;;  %s5549_s22 = sld [smem:[#allocation14_spill]] }
0x1981   : > { %s5550_s23 = sld [smem:[#allocation30_spill]] }
0x1982   : > { %s5551_s24 = sld [smem:[#allocation16_spill]] }
0x1983   : > { %s5552_s25 = sld [smem:[#allocation17_spill]] }
0x1984   : > { %s5553_s26 = sld [smem:[#allocation27_spill]] }
0x1985   : > { %s5554_s27 = sld [smem:[#allocation18_spill]] }
0x1986   : > { %s5555_s28 = sld [smem:[#allocation19_spill]] }
0x1987   : > { %s5556_s29 = sld [smem:[#allocation26_spill]]  ;;  %35 = sbr.rel (!%p5368_p5) target bundleno = 29 (0x1d), region = 204 }
0x1988   : > { %s5557_s30 = sld [smem:[#allocation21_spill]] }
0x1989   : > { %s5558_s0 = sld [smem:[#allocation22_spill]] }
0x198a   : > { %s5559_s17 = sld [smem:[#allocation24_spill]] }
0x198b   : > { %s5560_s18 = sld [smem:[#allocation25_spill]] }
0x198c   :  { %3359 = vsyncpa [#allocation4], 1 }
0x198d   :  { %3361 = vsyncpa [#allocation4 + $0x1], 1 }
0x198e   :  { %3362 = vsyncpa [#allocation5], 1 }
0x198f   :  { %3364 = vsyncpa [#allocation5 + $0x1], 1 }
0x1990   :  { %3365 = vsyncpa [#allocation8], 1 }
0x1991   :  { %3367 = vsyncpa [#allocation8 + $0x1], 1 }

</bundles_post_ra>
